<compile_context>
chip_gen: v7x
topology: tpu7x:2x2x1
jax: 0.10.0
libtpu: 0.0.40
codegen_flags: <defaults>
</compile_context>

<pallas_src>
import functools

import jax
import jax.numpy as jnp
from jax import lax
from jax.experimental import pallas as pl
from jax.experimental.pallas import tpu as pltpu

NUM_FEATURES = 768          # fixed in MYNET.__init__
NUM_CLASSES = 128           # args.num_classes (small, lane-aligned)
TEMPERATURE = 16.0          # args.temperature
EPS = 1e-12                 # F.normalize default eps


def _round_up(x, m):
    return ((x + m - 1) // m) * m


def _choose_tb(b, max_tb=1024, min_split=64):
    """Batch-tile selection.

    * b <= min_split: single tile, rounded to the 8-sublane grain.
    * larger b: at least 2 grid steps (megacore on v7x) with tiles as large as
      possible, capped at 1024 rows (fits every generation's default VMEM).
    """
    if b <= min_split:
        return _round_up(b, 8)
    return min(_round_up(-(-b // 2), 8), max_tb)


def _cos_logits_kernel(x_ref, w_ref, o_ref, *, temperature, batch, tb, ragged):
    # x_ref: (tb, D) batch tile.  w_ref: (C, D) raw fc weight (constant
    # index_map -> stays VMEM resident).  o_ref: (tb, C).
    x = x_ref[...].astype(jnp.float32)

    if ragged:
        # Last block sticks out past the batch; out-of-bounds rows hold
        # unspecified (stale) data.  Zero them so no NaN/Inf can appear
        # (those output rows are discarded at writeback anyway).
        row = (pl.program_id(0) * tb
               + lax.broadcasted_iota(jnp.int32, (tb, 1), 0))
        x = jnp.where(row < batch, x, 0.0)

    # Row-wise inverse L2 norm of x, applied on the OUTPUT side:
    # x / max(||x||, eps) == x * rsqrt(max(sumsq, eps^2)).
    sx = lax.rsqrt(jnp.maximum(jnp.sum(x * x, axis=-1, keepdims=True),
                               EPS * EPS))                       # (tb, 1)

    # Normalize the resident weight block in-kernel (hidden under the x DMA),
    # folding temperature into the scale.
    w = w_ref[...].astype(jnp.float32)                           # (C, D)
    sw = lax.rsqrt(jnp.maximum(jnp.sum(w * w, axis=-1, keepdims=True),
                               EPS * EPS))                       # (C, 1)
    wn = w * (temperature * sw)

    # (tb, D) x (C, D) contracting on D -> (tb, C); no transpose materialized.
    raw = lax.dot_general(
        x, wn,
        dimension_numbers=(((1,), (1,)), ((), ())),
        preferred_element_type=jnp.float32,
        precision=lax.Precision.HIGHEST,
    )
    # Single fused epilogue: per-row scale broadcast over C.
    o_ref[...] = (sx * raw).astype(o_ref.dtype)


def mynet_forward_cos(x, fc_weight, *, temperature=TEMPERATURE, tb=None):
    """MYNET.forward for a mode containing 'cos'.

    x:         (B, num_features)  float32 (bf16 accepted; cast in-kernel)
    fc_weight: (num_classes, num_features)
    returns:   (B, num_classes)   float32
    """
    B, D = x.shape
    C, D2 = fc_weight.shape
    assert D == D2

    if tb is None:
        tb = _choose_tb(B)
    tb = max(8, _round_up(min(tb, _round_up(B, 8)), 8))

    grid = pl.cdiv(B, tb)
    ragged = grid * tb != B

    kernel = functools.partial(
        _cos_logits_kernel,
        temperature=float(temperature),
        batch=B,
        tb=tb,
        ragged=ragged,
    )

    return pl.pallas_call(
        kernel,
        out_shape=jax.ShapeDtypeStruct((B, C), jnp.float32),
        grid_spec=pltpu.PrefetchScalarGridSpec(
            num_scalar_prefetch=0,
            grid=(grid,),
            in_specs=[
                pl.BlockSpec((tb, D), lambda i: (i, 0)),   # batch tile of x
                pl.BlockSpec((C, D), lambda i: (0, 0)),    # raw weight, resident
            ],
            out_specs=pl.BlockSpec((tb, C), lambda i: (i, 0)),
        ),
        compiler_params=pltpu.CompilerParams(
            dimension_semantics=("parallel",),
        ),
    )(x, fc_weight)


def _reference_forward_cos(x, w, temperature=TEMPERATURE):
    xn = x / jnp.maximum(jnp.linalg.norm(x, axis=-1, keepdims=True), EPS)
    wn = w / jnp.maximum(jnp.linalg.norm(w, axis=-1, keepdims=True), EPS)
    return temperature * jnp.dot(xn, wn.T, precision=lax.Precision.HIGHEST)


# TODO(synk): 'encoder' mode (self.encode) and the training-time utilities
# (update_fc / update_fc_avg / soft_calibration) are not part of the
# inference forward hot path and are not implemented here.

if __name__ == "__main__":
    key = jax.random.PRNGKey(0)
    kx, kw = jax.random.split(key)

    fc_weight = jax.random.normal(
        kw, (NUM_CLASSES, NUM_FEATURES), dtype=jnp.float32) * 0.02

    # B=8:   single aligned tile.
    # B=13:  single partial block (exercises tail masking, no pad copy).
    # B=100: two grid steps + partial last block (megacore path).
    for B in (8, 13, 100):
        xb = jax.random.normal(jax.random.fold_in(kx, B),
                               (B, NUM_FEATURES), dtype=jnp.float32)
        out = jax.block_until_ready(mynet_forward_cos(xb, fc_weight))
        ref = _reference_forward_cos(xb, fc_weight)
        assert out.shape == (B, NUM_CLASSES)
        assert jnp.allclose(out, ref, atol=1e-4, rtol=1e-4), f"mismatch at B={B}"

    print("KERNEL_OK")
</pallas_src>

<mosaic_0001>
module attributes {stable_mosaic.version = 11 : i64} {
  func.func @_cos_logits_kernel(%arg0: i32, %arg1: memref<8x768xf32, #tpu.memory_space<vmem>>, %arg2: memref<128x768xf32, #tpu.memory_space<vmem>>, %arg3: memref<8x128xf32, #tpu.memory_space<vmem>>) attributes {dimension_semantics = [#tpu.dimension_semantics<parallel>], iteration_bounds = array<i64: 1>, scalar_prefetch = 0 : i64, scratch_operands = 0 : i64, tpu.core_type = #tpu.core_type<tc>, window_params = [{transform_indices = @transform_0, window_bounds = array<i64: 8, 768>}, {pipeline_mode = #tpu.pipeline_mode<synchronous>, transform_indices = @transform_1, window_bounds = array<i64: 128, 768>}, {transform_indices = @transform_2, window_bounds = array<i64: 8, 128>}]} {
    %c0 = arith.constant 0 : index
    %c0_0 = arith.constant 0 : index
    %0 = vector.load %arg1[%c0, %c0_0] : memref<8x768xf32, #tpu.memory_space<vmem>>, vector<8x768xf32>
    %1 = arith.mulf %0, %0 : vector<8x768xf32>
    %cst = arith.constant dense<0.000000e+00> : vector<8xf32>
    %2 = vector.multi_reduction <add>, %1, %cst [1] : vector<8x768xf32> to vector<8xf32>
    %3 = vector.shape_cast %2 : vector<8xf32> to vector<8x1xf32>
    %cst_1 = arith.constant 1.000000e-24 : f32
    %4 = vector.broadcast %cst_1 : f32 to vector<8x1xf32>
    %5 = arith.maximumf %3, %4 : vector<8x1xf32>
    %6 = math.rsqrt %5 : vector<8x1xf32>
    %c0_2 = arith.constant 0 : index
    %c0_3 = arith.constant 0 : index
    %7 = vector.load %arg2[%c0_2, %c0_3] : memref<128x768xf32, #tpu.memory_space<vmem>>, vector<128x768xf32>
    %8 = arith.mulf %7, %7 : vector<128x768xf32>
    %cst_4 = arith.constant dense<0.000000e+00> : vector<128xf32>
    %9 = vector.multi_reduction <add>, %8, %cst_4 [1] : vector<128x768xf32> to vector<128xf32>
    %10 = vector.shape_cast %9 : vector<128xf32> to vector<128x1xf32>
    %cst_5 = arith.constant 1.000000e-24 : f32
    %11 = vector.broadcast %cst_5 : f32 to vector<128x1xf32>
    %12 = arith.maximumf %10, %11 : vector<128x1xf32>
    %13 = math.rsqrt %12 : vector<128x1xf32>
    %cst_6 = arith.constant 1.600000e+01 : f32
    %14 = vector.broadcast %cst_6 : f32 to vector<128x1xf32>
    %15 = arith.mulf %14, %13 : vector<128x1xf32>
    %16 = vector.broadcast %15 : vector<128x1xf32> to vector<128x768xf32>
    %17 = arith.mulf %7, %16 : vector<128x768xf32>
    %cst_7 = arith.constant dense<0.000000e+00> : vector<8x128xf32>
    %18 = tpu.matmul %0, %17, %cst_7 {dimension_numbers = #tpu.dot_dimension_numbers<[1], [1], [0], [0], [0, 0, 1, 0], [], []>, precision = #tpu.contract_precision<fp32>} : vector<8x768xf32>, vector<128x768xf32>, vector<8x128xf32> -> vector<8x128xf32>
    %19 = vector.broadcast %6 : vector<8x1xf32> to vector<8x128xf32>
    %20 = arith.mulf %19, %18 : vector<8x128xf32>
    %c0_8 = arith.constant 0 : index
    %c0_9 = arith.constant 0 : index
    %21 = vector.load %arg3[%c0_8, %c0_9] : memref<8x128xf32, #tpu.memory_space<vmem>>, vector<8x128xf32>
    tpu.vector_store %arg3[%c0_8, %c0_9], %20 {strides = array<i32>} : memref<8x128xf32, #tpu.memory_space<vmem>>, vector<8x128xf32>,
    return
  }
  func.func @transform_0(%arg0: i32) -> (i32, i32) {
    %c0_i32 = arith.constant 0 : i32
    %c0_i32_0 = arith.constant 0 : i32
    return %arg0, %c0_i32 : i32, i32
  }
  func.func @transform_1(%arg0: i32) -> (i32, i32) {
    %c0_i32 = arith.constant 0 : i32
    %c0_i32_0 = arith.constant 0 : i32
    %c0_i32_1 = arith.constant 0 : i32
    return %c0_i32, %c0_i32_0 : i32, i32
  }
  func.func @transform_2(%arg0: i32) -> (i32, i32) {
    %c0_i32 = arith.constant 0 : i32
    %c0_i32_0 = arith.constant 0 : i32
    return %arg0, %c0_i32 : i32, i32
  }
}

</mosaic_0001>

<bundles_post_ra>
// kernel: tpu_custom_call.1
= control target key start
LH: loop header
LB: loop body
LE: loop exit
PB: predicated region body
PF: predicated region fallthrough
CT: control target
= control target key end

     0   :  { %7 = vsyncpa [#allocation3], 0  ;;  %s6507_s0 = inlined_call_operand.hbm [shape: f32[8,768], index: 0, kind: input, shape index: {}]   ;;  %s6508_s1 = inlined_call_operand.hbm [shape: f32[128,768], index: 1, kind: input, shape index: {}]   ;;  %s6509_s2 = inlined_call_operand.hbm [shape: f32[8,128], index: 2, kind: output, shape index: {}]  }
   0x1   :  { %8 = vsyncpa [#allocation6], 0 }
   0x2   :  { %9 = vsyncpa [#allocation4], 0  ;;  %s3867_s9 = smov [#allocation2]   ;;  %s3868_s11 = smov [#allocation5]  }
   0x3   :  { %s16_s10 = sshll.u32 %s3867_s9, 4  ;;  %s25_s12 = sshll.u32 %s3868_s11, 4  ;;  %s17_s10 = int_to_ptr.vmem [resolvable:$true] %s16_s10  ;;  %s3887_s12 = int_to_ptr.vmem [resolvable:$true] %s25_s12 }
   0x4   :  { %s3795_s15 = scalar_lea.hbm %s6507_s0, 768 }
   0x5   :  { %p3796_p0 = scmp.ne.s32.totalorder %s6507_s0, %s3795_s15  ;;  %p3799_p1 = scmp.lt.u32.totalorder %s3795_s15, %s6507_s0 }
   0x7   :  { %p3801_p2 = pnand %p3799_p1, %p3796_p0 }
   0x9   :  { %3804 = shalt.err (!%p3801_p2)
}
   0xa   :  { %s3805_s20 = scalar_lea.vmem %s17_s10, 768  ;;  %p3810_p4 = scmp.lt.s32.totalorder %s17_s10, %s17_s10 }
   0xb   :  { %p3806_p3 = scmp.ne.s32.totalorder %s17_s10, %s3805_s20  ;;  %p3811_p5 = scmp.lt.s32.totalorder %s3805_s20, %s3805_s20 }
   0xd   :  { %p3812_p6 = por %p3811_p5, %p3810_p4 }
   0xf   :  { %p3813_p7 = pnand %p3812_p6, %p3806_p3 }
  0x11   :  { %3816 = shalt.err (!%p3813_p7)
}
  0x12   :  { %19 = dma.hbm_to_vmem [thread:$0]  %s6507_s0, 768, %s17_s10, [#allocation3]  }
  0x13   :  { %s3817_s25 = scalar_lea.hbm %s6508_s1, 12288 }
  0x14   :  { %p3818_p8 = scmp.ne.s32.totalorder %s6508_s1, %s3817_s25  ;;  %p3821_p9 = scmp.lt.u32.totalorder %s3817_s25, %s6508_s1 }
  0x16   :  { %p3823_p10 = pnand %p3821_p9, %p3818_p8 }
  0x18   :  { %3826 = shalt.err (!%p3823_p10)
}
  0x19   :  { %s3827_s30 = scalar_lea.vmem %s3887_s12, 12288  ;;  %p3832_p12 = scmp.lt.s32.totalorder %s3887_s12, %s3887_s12 }
  0x1a   :  { %p3828_p11 = scmp.ne.s32.totalorder %s3887_s12, %s3827_s30  ;;  %p3833_p13 = scmp.lt.s32.totalorder %s3827_s30, %s3827_s30 }
  0x1c   :  { %p3834_p0 = por %p3833_p13, %p3832_p12 }
  0x1e   :  { %p3835_p1 = pnand %p3834_p0, %p3828_p11 }
  0x20   :  { %3838 = shalt.err (!%p3835_p1)
}
  0x21   :  { %s3869_s0 = smov 768   ;;  %s3870_s3 = smov 48  }
  0x22   :  { %31 = dma.hbm_to_vmem [thread:$0]  %s6508_s1, 12288, %s3887_s12, [#allocation6], %s3869_s0, %s3869_s0, %s3870_s3  }
  0x23   :  { %3861 = dma.done.wait [#allocation3], 768  }
  0x24   :  { %3862 = vsyncadd [#allocation3], 4294966528 }
  0x25   :  { %3863 = dma.done.wait [#allocation6], 12288  }
  0x26   :  { %3864 = vsyncadd [#allocation6], 4294955008  ;;  %v3918_v0 = vld [vmem:[#allocation5 + $0x60] sm:$0xff]  ;;  %v3920_v1 = vld [vmem:[#allocation5 + $0x68] sm:$0xff]  ;;  %s3871_s1 = smov [#allocation7]  }
  0x27   :  { %v3922_v2 = vld [vmem:[#allocation5 + $0x70] sm:$0xff]  ;;  %v3924_v3 = vld [vmem:[#allocation5 + $0x78] sm:$0xff]  ;;  %v75_v4 = vld [vmem:[#allocation5 + $0x80] sm:$0xff]  ;;  %v167_v6 = vmul.f32 %v3918_v0, %v3918_v0  ;;  %v168_v7 = vmul.f32 %v3920_v1, %v3920_v1  ;;  %s3101_s6 = sshll.u32 %s3871_s1, 4  ;;  %s3102_s6 = int_to_ptr.vmem [resolvable:$true] %s3101_s6 }
  0x28   :  { %v76_v5 = vld [vmem:[#allocation5 + $0x88] sm:$0xff]  ;;  %v169_v8 = vmul.f32 %v3922_v2, %v3922_v2  ;;  %v170_v9 = vmul.f32 %v3924_v3, %v3924_v3  ;;  %v3934_v10 = vld [vmem:[#allocation5] sm:$0xff]  ;;  %v3938_v12 = vld [vmem:[#allocation5 + $0x10] sm:$0xff]  ;;  %v171_v20 = vmul.f32 %v75_v4, %v75_v4  ;;  %s3839_s7 = scalar_lea.vmem %s3102_s6, 128  ;;  %p3844_p3 = scmp.lt.s32.totalorder %s3102_s6, %s3102_s6 }
  0x29   :  { %v3936_v11 = vld [vmem:[#allocation5 + $0x8] sm:$0xff]  ;;  %v265_v13 = vadd.f32 %v168_v7, %v167_v6  ;;  %v3940_v14 = vld [vmem:[#allocation5 + $0x18] sm:$0xff]  ;;  %v63_v15 = vld [vmem:[#allocation5 + $0x20] sm:$0xff]  ;;  %v155_v17 = vmul.f32 %v3934_v10, %v3934_v10  ;;  %v157_v19 = vmul.f32 %v3938_v12, %v3938_v12  ;;  %v172_v21 = vmul.f32 %v76_v5, %v76_v5  ;;  %p3840_p2 = scmp.ne.s32.totalorder %s3102_s6, %s3839_s7  ;;  %p3845_p4 = scmp.lt.s32.totalorder %s3839_s7, %s3839_s7 }
  0x2a   :  { %v64_v16 = vld [vmem:[#allocation5 + $0x28] sm:$0xff]  ;;  %v156_v18 = vmul.f32 %v3936_v11, %v3936_v11  ;;  %v158_v22 = vmul.f32 %v3940_v14, %v3940_v14  ;;  %v3950_v23 = vld [vmem:[#allocation5 + $0x90] sm:$0xff]  ;;  %v3952_v24 = vld [vmem:[#allocation5 + $0x98] sm:$0xff]  ;;  %v159_v33 = vmul.f32 %v63_v15, %v63_v15 }
  0x2b   :  { %v3954_v25 = vld [vmem:[#allocation5 + $0xa0] sm:$0xff]  ;;  %v266_v26 = vadd.f32 %v265_v13, %v169_v8  ;;  %v3956_v28 = vld [vmem:[#allocation5 + $0xa8] sm:$0xff]  ;;  %v81_v29 = vld [vmem:[#allocation5 + $0xb0] sm:$0xff]  ;;  %v173_v31 = vmul.f32 %v3950_v23, %v3950_v23  ;;  %v174_v32 = vmul.f32 %v3952_v24, %v3952_v24  ;;  %v160_v34 = vmul.f32 %v64_v16, %v64_v16  ;;  %p3846_p5 = por %p3845_p4, %p3844_p3 }
  0x2c   :  { %v251_v27 = vadd.f32 %v156_v18, %v155_v17  ;;  %v82_v30 = vld [vmem:[#allocation5 + $0xb8] sm:$0xff]  ;;  %v175_v35 = vmul.f32 %v3954_v25, %v3954_v25  ;;  %v176_v36 = vmul.f32 %v3956_v28, %v3956_v28  ;;  %v3966_v37 = vld [vmem:[#allocation5 + $0x30] sm:$0xff]  ;;  %v3970_v39 = vld [vmem:[#allocation5 + $0x40] sm:$0xff]  ;;  %v177_v46 = vmul.f32 %v81_v29, %v81_v29 }
  0x2d   :  { %v3968_v38 = vld [vmem:[#allocation5 + $0x38] sm:$0xff]  ;;  %v267_v40 = vadd.f32 %v266_v26, %v170_v9  ;;  %v272_v42 = vadd.f32 %v174_v32, %v173_v31  ;;  %v3972_v43 = vld [vmem:[#allocation5 + $0x48] sm:$0xff]  ;;  %v69_v44 = vld [vmem:[#allocation5 + $0x50] sm:$0xff]  ;;  %v161_v45 = vmul.f32 %v3966_v37, %v3966_v37  ;;  %v178_v47 = vmul.f32 %v82_v30, %v82_v30  ;;  %p3847_p6 = pnand %p3846_p5, %p3840_p2 }
  0x2e   :  { %v252_v41 = vadd.f32 %v251_v27, %v157_v19  ;;  %v162_v48 = vmul.f32 %v3968_v38, %v3968_v38  ;;  %v163_v49 = vmul.f32 %v3970_v39, %v3970_v39  ;;  %v3980_v50 = vld [vmem:[#allocation5 + $0xf0] sm:$0xff]  ;;  %v3982_v51 = vld [vmem:[#allocation5 + $0xf8] sm:$0xff]  ;;  %v3984_v52 = vld [vmem:[#allocation5 + $0x100] sm:$0xff]  ;;  %v164_v57 = vmul.f32 %v3972_v43, %v3972_v43 }
  0x2f   :  { %v268_v53 = vadd.f32 %v267_v40, %v171_v20  ;;  %v273_v55 = vadd.f32 %v272_v42, %v175_v35  ;;  %v70_v56 = vld [vmem:[#allocation5 + $0x58] sm:$0xff]  ;;  %v3988_v58 = vld [vmem:[#allocation5 + $0x108] sm:$0xff]  ;;  %v185_v60 = vmul.f32 %v3980_v50, %v3980_v50  ;;  %v186_v61 = vmul.f32 %v3982_v51, %v3982_v51  ;;  %v3996_v63 = vld [vmem:[#allocation5 + $0xc0] sm:$0xff] }
  0x30   :  { %v253_v54 = vadd.f32 %v252_v41, %v158_v22  ;;  %v258_v59 = vadd.f32 %v162_v48, %v161_v45  ;;  %v187_v62 = vmul.f32 %v3984_v52, %v3984_v52  ;;  %v3998_v4 = vld [vmem:[#allocation5 + $0xc8] sm:$0xff]  ;;  %v165_v8 = vmul.f32 %v69_v44, %v69_v44  ;;  %v93_v9 = vld [vmem:[#allocation5 + $0x110] sm:$0xff]  ;;  %v94_v17 = vld [vmem:[#allocation5 + $0x118] sm:$0xff] }
  0x31   :  { %v269_v5 = vadd.f32 %v268_v53, %v172_v21  ;;  %v274_v7 = vadd.f32 %v273_v55, %v176_v36  ;;  %v4000_v13 = vld [vmem:[#allocation5 + $0xd0] sm:$0xff]  ;;  %v166_v15 = vmul.f32 %v70_v56, %v70_v56  ;;  %v188_v18 = vmul.f32 %v3988_v58, %v3988_v58  ;;  %v4004_v20 = vld [vmem:[#allocation5 + $0xd8] sm:$0xff]  ;;  %v87_v35 = vld [vmem:[#allocation5 + $0xe0] sm:$0xff] }
  0x32   :  { %v254_v6 = vadd.f32 %v253_v54, %v159_v33  ;;  %v259_v16 = vadd.f32 %v258_v59, %v163_v49  ;;  %v286_v19 = vadd.f32 %v186_v61, %v185_v60  ;;  %v179_v21 = vmul.f32 %v3996_v63, %v3996_v63  ;;  %v4010_v29 = vld [vmem:[#allocation5 + $0x150] sm:$0xff]  ;;  %v4012_v30 = vld [vmem:[#allocation5 + $0x158] sm:$0xff]  ;;  %v88_v36 = vld [vmem:[#allocation5 + $0xe8] sm:$0xff] }
  0x33   :  { %270 = vadd.xlane.f32.xlu1 %v269_v5  ;;  %v275_v26 = vadd.f32 %v274_v7, %v177_v46  ;;  %v180_v27 = vmul.f32 %v3998_v4, %v3998_v4  ;;  %v189_v32 = vmul.f32 %v93_v9, %v93_v9  ;;  %v181_v40 = vmul.f32 %v4000_v13, %v4000_v13  ;;  %v4020_v46 = vld [vmem:[#allocation5 + $0x168] sm:$0xff]  ;;  %v4026_v55 = vld [vmem:[#allocation5 + $0x120] sm:$0xff]  ;;  %v105_v61 = vld [vmem:[#allocation5 + $0x170] sm:$0xff] }
  0x34   :  { %v255_v22 = vadd.f32 %v254_v6, %v160_v34  ;;  %v260_v31 = vadd.f32 %v259_v16, %v164_v57  ;;  %v287_v33 = vadd.f32 %v286_v19, %v187_v62  ;;  %v4016_v34 = vld [vmem:[#allocation5 + $0x160] sm:$0xff]  ;;  %v190_v42 = vmul.f32 %v94_v17, %v94_v17  ;;  %v4028_v56 = vld [vmem:[#allocation5 + $0x128] sm:$0xff]  ;;  %v106_v62 = vld [vmem:[#allocation5 + $0x178] sm:$0xff] }
  0x35   :  { %v276_v41 = vadd.f32 %v275_v26, %v178_v47  ;;  %v182_v44 = vmul.f32 %v4004_v20, %v4004_v20  ;;  %v279_v45 = vadd.f32 %v180_v27, %v179_v21  ;;  %v197_v53 = vmul.f32 %v4010_v29, %v4010_v29  ;;  %v4030_v47 = vld [vmem:[#allocation5 + $0x130] sm:$0xff]  ;;  %v4036_v16 = vld [vmem:[#allocation5 + $0x138] sm:$0xff]  ;;  %v99_v19 = vld [vmem:[#allocation5 + $0x140] sm:$0xff] }
  0x36   :  { %256 = vadd.xlane.f32.xlu0 %v255_v22  ;;  %v261_v48 = vadd.f32 %v260_v31, %v165_v8  ;;  %v288_v49 = vadd.f32 %v287_v33, %v188_v18  ;;  %v198_v54 = vmul.f32 %v4012_v30, %v4012_v30  ;;  %v183_v57 = vmul.f32 %v87_v35, %v87_v35  ;;  %v4038_v17 = vld [vmem:[#allocation5 + $0x1b0] sm:$0xff]  ;;  %v4046_v21 = vld [vmem:[#allocation5 + $0x1b8] sm:$0xff]  ;;  %v4048_v27 = vld [vmem:[#allocation5 + $0x1c0] sm:$0xff] }
  0x37   :  { %277 = vadd.xlane.f32.xlu1 %v276_v41  ;;  %v184_v59 = vmul.f32 %v88_v36, %v88_v36  ;;  %v280_v60 = vadd.f32 %v279_v45, %v181_v40  ;;  %v199_v5 = vmul.f32 %v4016_v34, %v4016_v34  ;;  %v200_v8 = vmul.f32 %v4020_v46, %v4020_v46  ;;  %v100_v36 = vld [vmem:[#allocation5 + $0x148] sm:$0xff] }
  0x38   :  { %v262_v6 = vadd.f32 %v261_v48, %v166_v15  ;;  %v289_v7 = vadd.f32 %v288_v49, %v189_v32  ;;  %v300_v9 = vadd.f32 %v198_v54, %v197_v53  ;;  %6953 = vst [vmem:[#allocation11_spill] sm:$0xff] %v4038_v17  ;;  %v191_v22 = vmul.f32 %v4026_v55, %v4026_v55  ;;  %v4050_v40 = vld [vmem:[#allocation5 + $0x1c8] sm:$0xff]  ;;  %v4056_v49 = vld [vmem:[#allocation5 + $0x180] sm:$0xff] }
  0x39   :  { %v281_v18 = vadd.f32 %v280_v60, %v182_v44  ;;  %v192_v26 = vmul.f32 %v4028_v56, %v4028_v56  ;;  %v193_v15 = vmul.f32 %v4030_v47, %v4030_v47  ;;  %6954 = vst [vmem:[#allocation12_spill] sm:$0xff] %v4046_v21  ;;  %6955 = vst [vmem:[#allocation13_spill] sm:$0xff] %v4048_v27  ;;  %v4058_v53 = vld [vmem:[#allocation5 + $0x188] sm:$0xff]  ;;  %v117_v60 = vld [vmem:[#allocation5 + $0x1d0] sm:$0xff] }
  0x3a   :  { %263 = vadd.xlane.f32.xlu0 %v262_v6  ;;  %v290_v31 = vadd.f32 %v289_v7, %v190_v42  ;;  %v201_v32 = vmul.f32 %v105_v61, %v105_v61  ;;  %v202_v33 = vmul.f32 %v106_v62, %v106_v62  ;;  %v301_v35 = vadd.f32 %v300_v9, %v199_v5  ;;  %v118_v61 = vld [vmem:[#allocation5 + $0x1d8] sm:$0xff]  ;;  %v4064_v5 = vld [vmem:[#allocation5 + $0x190] sm:$0xff] }
  0x3b   :  { %6956 = vst [vmem:[#allocation14_spill] sm:$0xff] %v4050_v40  ;;  %v282_v41 = vadd.f32 %v281_v18, %v183_v57  ;;  %v194_v44 = vmul.f32 %v4036_v16, %v4036_v16  ;;  %v293_v45 = vadd.f32 %v192_v26, %v191_v22  ;;  %v209_v48 = vmul.f32 %v4038_v17, %v4038_v17  ;;  %v4068_v22 = vld [vmem:[#allocation5 + $0x198] sm:$0xff]  ;;  %v112_v17 = vld [vmem:[#allocation5 + $0x1a8] sm:$0xff] }
  0x3c   :  { %6957 = vst [vmem:[#allocation15_spill] sm:$0xff] %v4056_v49  ;;  %6958 = vst [vmem:[#allocation16_spill] sm:$0xff] %v4058_v53  ;;  %291 = vadd.xlane.f32.xlu1 %v290_v31  ;;  %v302_v42 = vadd.f32 %v301_v35, %v200_v8  ;;  %v195_v54 = vmul.f32 %v99_v19, %v99_v19  ;;  %v210_v62 = vmul.f32 %v4046_v21, %v4046_v21  ;;  %v4074_v35 = vld [vmem:[#allocation5 + $0x210] sm:$0xff]  ;;  %v4086_v21 = vld [vmem:[#allocation5 + $0x1e0] sm:$0xff] }
  0x3d   :  { %v211_v57 = vmul.f32 %v4048_v27, %v4048_v27  ;;  %6959 = vst [vmem:[#allocation17_spill] sm:$0xff] %v4064_v5  ;;  %v283_v6 = vadd.f32 %v282_v41, %v184_v59  ;;  %v196_v7 = vmul.f32 %v100_v36, %v100_v36  ;;  %v294_v9 = vadd.f32 %v293_v45, %v193_v15  ;;  %v4076_v27 = vld [vmem:[#allocation5 + $0x218] sm:$0xff]  ;;  %v4078_v59 = vld [vmem:[#allocation5 + $0x220] sm:$0xff] }
  0x3e   :  { %v212_v18 = vmul.f32 %v4050_v40, %v4050_v40  ;;  %6960 = vst [vmem:[#allocation18_spill] sm:$0xff] %v4068_v22  ;;  %v303_v8 = vadd.f32 %v302_v42, %v201_v32  ;;  %v314_v19 = vadd.f32 %v210_v62, %v209_v48  ;;  %v203_v26 = vmul.f32 %v4056_v49, %v4056_v49  ;;  %v111_v45 = vld [vmem:[#allocation5 + $0x1a0] sm:$0xff]  ;;  %v4084_v40 = vld [vmem:[#allocation5 + $0x228] sm:$0xff] }
  0x3f   :  { %v204_v31 = vmul.f32 %v4058_v53, %v4058_v53  ;;  %6961 = vst [vmem:[#allocation19_spill] sm:$0xff] %v4074_v35  ;;  %6962 = vst [vmem:[#allocation20_spill] sm:$0xff] %v4076_v27  ;;  %284 = vadd.xlane.f32.xlu0 %v283_v6  ;;  %v295_v15 = vadd.f32 %v294_v9, %v194_v44  ;;  %v213_v36 = vmul.f32 %v117_v60, %v117_v60 }
  0x40   :  { %6963 = vst [vmem:[#allocation21_spill] sm:$0xff] %v4078_v59  ;;  %v214_v41 = vmul.f32 %v118_v61, %v118_v61  ;;  %v205_v32 = vmul.f32 %v4064_v5, %v4064_v5  ;;  %v304_v48 = vadd.f32 %v303_v8, %v202_v33  ;;  %v315_v42 = vadd.f32 %v314_v19, %v211_v57  ;;  %v4094_v33 = vld [vmem:[#allocation5 + $0x1e8] sm:$0xff]  ;;  %v4096_v57 = vld [vmem:[#allocation5 + $0x1f0] sm:$0xff] }
  0x41   :  { %v206_v62 = vmul.f32 %v4068_v22, %v4068_v22  ;;  %v307_v49 = vadd.f32 %v204_v31, %v203_v26  ;;  %6964 = vst [vmem:[#allocation22_spill] sm:$0xff] %v4084_v40  ;;  %6965 = vst [vmem:[#allocation23_spill] sm:$0xff] %v4086_v21  ;;  %v296_v53 = vadd.f32 %v295_v15, %v195_v54  ;;  %v129_v26 = vld [vmem:[#allocation5 + $0x230] sm:$0xff]  ;;  %v130_v54 = vld [vmem:[#allocation5 + $0x238] sm:$0xff] }
  0x42   :  { %v221_v44 = vmul.f32 %v4074_v35, %v4074_v35  ;;  %v222_v60 = vmul.f32 %v4076_v27, %v4076_v27  ;;  %v223_v61 = vmul.f32 %v4078_v59, %v4078_v59  ;;  %6966 = vst [vmem:[#allocation24_spill] sm:$0xff] %v4094_v33  ;;  %6967 = vst [vmem:[#allocation25_spill] sm:$0xff] %v4096_v57  ;;  %305 = vadd.xlane.f32.xlu1 %v304_v48  ;;  %v4098_v31 = vld [vmem:[#allocation5 + $0x1f8] sm:$0xff]  ;;  %v4104_v5 = vld [vmem:[#allocation5 + $0x270] sm:$0xff] }
  0x43   :  { %v316_v6 = vadd.f32 %v315_v42, %v212_v18  ;;  %v207_v9 = vmul.f32 %v111_v45, %v111_v45  ;;  %v208_v8 = vmul.f32 %v112_v17, %v112_v17  ;;  %v308_v19 = vadd.f32 %v307_v49, %v205_v32  ;;  %6968 = vst [vmem:[#allocation26_spill] sm:$0xff] %v4098_v31  ;;  %v123_v18 = vld [vmem:[#allocation5 + $0x200] sm:$0xff]  ;;  %v4110_v45 = vld [vmem:[#allocation5 + $0x278] sm:$0xff] }
  0x44   :  { %v297_v15 = vadd.f32 %v296_v53, %v196_v7  ;;  %v224_v35 = vmul.f32 %v4084_v40, %v4084_v40  ;;  %v328_v27 = vadd.f32 %v222_v60, %v221_v44  ;;  %v215_v59 = vmul.f32 %v4086_v21, %v4086_v21  ;;  %6969 = vst [vmem:[#allocation27_spill] sm:$0xff] %v4104_v5  ;;  %v4112_v53 = vld [vmem:[#allocation5 + $0x280] sm:$0xff]  ;;  %v124_v44 = vld [vmem:[#allocation5 + $0x208] sm:$0xff] }
  0x45   :  { %v317_v22 = vadd.f32 %v316_v6, %v213_v36  ;;  %v309_v48 = vadd.f32 %v308_v19, %v206_v62  ;;  %v216_v17 = vmul.f32 %v4094_v33, %v4094_v33  ;;  %v217_v49 = vmul.f32 %v4096_v57, %v4096_v57  ;;  %6970 = vst [vmem:[#allocation28_spill] sm:$0xff] %v4110_v45  ;;  %v4116_v62 = vld [vmem:[#allocation5 + $0x288] sm:$0xff]  ;;  %v4120_v21 = vld [vmem:[#allocation5 + $0x240] sm:$0xff] }
  0x46   :  { %6971 = vst [vmem:[#allocation29_spill] sm:$0xff] %v4112_v53  ;;  %298 = vadd.xlane.f32.xlu0 %v297_v15  ;;  %v225_v7 = vmul.f32 %v129_v26, %v129_v26  ;;  %v226_v32 = vmul.f32 %v130_v54, %v130_v54  ;;  %v329_v42 = vadd.f32 %v328_v27, %v223_v61  ;;  %6972 = vst [vmem:[#allocation30_spill] sm:$0xff] %v4116_v62  ;;  %v4122_v40 = vld [vmem:[#allocation5 + $0x248] sm:$0xff]  ;;  %v141_v54 = vld [vmem:[#allocation5 + $0x290] sm:$0xff] }
  0x47   :  { %v218_v36 = vmul.f32 %v4098_v31, %v4098_v31  ;;  %v318_v60 = vadd.f32 %v317_v22, %v214_v41  ;;  %v310_v6 = vadd.f32 %v309_v48, %v207_v9  ;;  %v321_v19 = vadd.f32 %v216_v17, %v215_v59  ;;  %6973 = vst [vmem:[#allocation31_spill] sm:$0xff] %v4120_v21  ;;  %v142_v27 = vld [vmem:[#allocation5 + $0x298] sm:$0xff]  ;;  %v4128_v22 = vld [vmem:[#allocation5 + $0x250] sm:$0xff] }
  0x48   :  { %v233_v57 = vmul.f32 %v4104_v5, %v4104_v5  ;;  %6974 = vst [vmem:[#allocation32_spill] sm:$0xff] %v4122_v40  ;;  %v330_v15 = vadd.f32 %v329_v42, %v224_v35  ;;  %v219_v26 = vmul.f32 %v123_v18, %v123_v18  ;;  %v234_v61 = vmul.f32 %v4110_v45, %v4110_v45  ;;  %v4132_v17 = vld [vmem:[#allocation5 + $0x258] sm:$0xff] }
  0x49   :  { %v235_v31 = vmul.f32 %v4112_v53, %v4112_v53  ;;  %6975 = vst [vmem:[#allocation33_spill] sm:$0xff] %v4128_v22  ;;  %319 = vadd.xlane.f32.xlu1 %v318_v60  ;;  %v311_v59 = vadd.f32 %v310_v6, %v208_v8  ;;  %v220_v41 = vmul.f32 %v124_v44, %v124_v44  ;;  %6976 = vst [vmem:[#allocation34_spill] sm:$0xff] %v4132_v17  ;;  %v4138_v53 = vld [vmem:[#allocation5 + $0x2d0] sm:$0xff]  ;;  %v4140_v45 = vld [vmem:[#allocation5 + $0x2d8] sm:$0xff] }
  0x4a   :  { %v322_v9 = vadd.f32 %v321_v19, %v217_v49  ;;  %v236_v48 = vmul.f32 %v4116_v62, %v4116_v62  ;;  %v331_v35 = vadd.f32 %v330_v15, %v225_v7  ;;  %v342_v18 = vadd.f32 %v234_v61, %v233_v57  ;;  %6977 = vst [vmem:[#allocation35_spill] sm:$0xff] %v4138_v53  ;;  %v4142_v8 = vld [vmem:[#allocation5 + $0x2e0] sm:$0xff]  ;;  %v136_v19 = vld [vmem:[#allocation5 + $0x268] sm:$0xff] }
  0x4b   :  { %v227_v42 = vmul.f32 %v4120_v21, %v4120_v21  ;;  %v228_v5 = vmul.f32 %v4122_v40, %v4122_v40  ;;  %6978 = vst [vmem:[#allocation36_spill] sm:$0xff] %v4140_v45  ;;  %6979 = vst [vmem:[#allocation37_spill] sm:$0xff] %v4142_v8  ;;  %312 = vadd.xlane.f32.xlu0 %v311_v59  ;;  %v237_v44 = vmul.f32 %v141_v54, %v141_v54  ;;  %v135_v6 = vld [vmem:[#allocation5 + $0x260] sm:$0xff]  ;;  %v4148_v62 = vld [vmem:[#allocation5 + $0x2e8] sm:$0xff] }
  0x4c   :  { %v323_v49 = vadd.f32 %v322_v9, %v218_v36  ;;  %v238_v60 = vmul.f32 %v142_v27, %v142_v27  ;;  %v229_v57 = vmul.f32 %v4128_v22, %v4128_v22  ;;  %v332_v7 = vadd.f32 %v331_v35, %v226_v32  ;;  %v4150_v40 = vld [vmem:[#allocation5 + $0x2a0] sm:$0xff]  ;;  %v4158_v32 = vld [vmem:[#allocation5 + $0x2a8] sm:$0xff] }
  0x4d   :  { %v343_v15 = vadd.f32 %v342_v18, %v235_v31  ;;  %v230_v61 = vmul.f32 %v4132_v17, %v4132_v17  ;;  %v335_v21 = vadd.f32 %v228_v5, %v227_v42  ;;  %6980 = vst [vmem:[#allocation38_spill] sm:$0xff] %v4150_v40  ;;  %v245_v36 = vmul.f32 %v4138_v53, %v4138_v53  ;;  %v4160_v31 = vld [vmem:[#allocation5 + $0x2b0] sm:$0xff]  ;;  %v4164_v53 = vld [vmem:[#allocation5 + $0x2b8] sm:$0xff] }
  0x4e   :  { %v324_v33 = vadd.f32 %v323_v49, %v219_v26  ;;  %v246_v54 = vmul.f32 %v4140_v45, %v4140_v45  ;;  %v247_v27 = vmul.f32 %v4142_v8, %v4142_v8  ;;  %6981 = vst [vmem:[#allocation39_spill] sm:$0xff] %v4160_v31  ;;  %333 = vadd.xlane.f32.xlu1 %v332_v7  ;;  %v153_v18 = vld [vmem:[#allocation5 + $0x2f0] sm:$0xff]  ;;  %v154_v17 = vld [vmem:[#allocation5 + $0x2f8] sm:$0xff] }
  0x4f   :  { %v344_v5 = vadd.f32 %v343_v15, %v236_v48  ;;  %v231_v59 = vmul.f32 %v135_v6, %v135_v6  ;;  %v232_v9 = vmul.f32 %v136_v19, %v136_v19  ;;  %v336_v35 = vadd.f32 %v335_v21, %v229_v57  ;;  %v147_v6 = vld [vmem:[#allocation5 + $0x2c0] sm:$0xff] }
  0x50   :  { %v325_v26 = vadd.f32 %v324_v33, %v220_v41  ;;  %v248_v42 = vmul.f32 %v4148_v62, %v4148_v62  ;;  %v356_v49 = vadd.f32 %v246_v54, %v245_v36  ;;  %v239_v8 = vmul.f32 %v4150_v40, %v4150_v40 }
  0x51   :  { %v345_v45 = vadd.f32 %v344_v5, %v237_v44  ;;  %v337_v22 = vadd.f32 %v336_v35, %v230_v61  ;;  %v240_v48 = vmul.f32 %v4158_v32, %v4158_v32  ;;  %v241_v21 = vmul.f32 %v4160_v31, %v4160_v31  ;;  %v148_v61 = vld [vmem:[#allocation5 + $0x2c8] sm:$0xff] }
  0x52   :  { %326 = vadd.xlane.f32.xlu0 %v325_v26  ;;  %v249_v33 = vmul.f32 %v153_v18, %v153_v18  ;;  %v357_v41 = vadd.f32 %v356_v49, %v247_v27  ;;  %v242_v7 = vmul.f32 %v4164_v53, %v4164_v53  ;;  %v250_v36 = vmul.f32 %v154_v17, %v154_v17 }
  0x53   :  { %v346_v19 = vadd.f32 %v345_v45, %v238_v60  ;;  %v338_v57 = vadd.f32 %v337_v22, %v231_v59  ;;  %v349_v15 = vadd.f32 %v240_v48, %v239_v8  ;;  %v243_v5 = vmul.f32 %v147_v6, %v147_v6  ;;  %v39_v22 = vld [vmem:[#allocation2 + $0x8] sm:$0xff]  ;;  %v41_v60 = vld [vmem:[#allocation2 + $0x18] sm:$0xff] }
  0x54   :  { %v358_v44 = vadd.f32 %v357_v41, %v248_v42  ;;  %v244_v31 = vmul.f32 %v148_v61, %v148_v61  ;;  %v4174_v59 = vand.u32 4294901760, %v39_v22  ;;  %v4176_v17 = vand.u32 4294901760, %v41_v60 }
  0x55   :  { %347 = vadd.xlane.f32.xlu1 %v346_v19  ;;  %v339_v54 = vadd.f32 %v338_v57, %v232_v9  ;;  %v350_v35 = vadd.f32 %v349_v15, %v241_v21 }
  0x56   :  { %v359_v40 = vadd.f32 %v358_v44, %v249_v33  ;;  %6982 = vst [vmem:[#allocation40_spill] sm:$0xff] %v4174_v59  ;;  %6983 = vst [vmem:[#allocation41_spill] sm:$0xff] %v4176_v17  ;;  %v4179_v8 = vsub.f32 %v39_v22, %v4174_v59  ;;  %v4182_v9 = vsub.f32 %v41_v60, %v4176_v17 }
  0x57   :  { %340 = vadd.xlane.f32.xlu0 %v339_v54  ;;  %v351_v26 = vadd.f32 %v350_v35, %v242_v7 }
  0x58   :  { %v360_v18 = vadd.f32 %v359_v40, %v250_v36  ;;  %6984 = vst [vmem:[#allocation42_spill] sm:$0xff] %v4179_v8  ;;  %6985 = vst [vmem:[#allocation43_spill] sm:$0xff] %v4182_v9  ;;  %v6540_v42 = vand.u32 4294901760, %v4179_v8  ;;  %v6539_v40 = vand.u32 4294901760, %v4182_v9 }
  0x59   :  { %v352_v27 = vadd.f32 %v351_v26, %v243_v5 }
  0x5a   :  { %361 = vadd.xlane.f32.xlu1 %v360_v18  ;;  %1950 = vmatprep.mubr.f32.mxu0 %v6539_v40 }
  0x5b   :  { %v353_v45 = vadd.f32 %v352_v27, %v244_v31  ;;  %v606_v31 = vsub.f32 %v4179_v8, %v6540_v42 }
  0x5d   :  { %354 = vadd.xlane.f32.xlu0 %v353_v45  ;;  %v607_v49 = vand.u32 4294901760, %v606_v31 }
  0x5f   :  { %608 = vmatprep.mubr.f32.mxu1 %v607_v49 }
  0xc0   :  { %v271_v48 = vpop.xlane.xlu1 %270 }
  0xc1   :  { %v365_v21 = vmax.f32 %v271_v48, 1e-24 }
  0xc3   :  { %v257_v33 = vpop.xlane.xlu0 %256  ;;  %3725 = vrsqrt.f32 %v365_v21 }
  0xc4   :  { %v363_v41 = vmax.f32 %v257_v33, 1e-24  ;;  %v278_v6 = vpop.xlane.xlu1 %277 }
  0xc5   :  { %v366_v19 = vmax.f32 %v278_v6, 1e-24 }
  0xc6   :  { %3727 = vrsqrt.f32 %v363_v41 }
  0xc7   :  { %3729 = vrsqrt.f32 %v366_v19  ;;  %v264_v57 = vpop.xlane.xlu0 %263 }
  0xc8   :  { %v364_v7 = vmax.f32 %v264_v57, 1e-24 }
  0xc9   :  { %v292_v15 = vpop.xlane.xlu1 %291 }
  0xca   :  { %3731 = vrsqrt.f32 %v364_v7  ;;  %v368_v61 = vmax.f32 %v292_v15, 1e-24 }
  0xcc   :  { %v285_v36 = vpop.xlane.xlu0 %284 }
  0xcd   :  { %v3726_v44 = vpop.eup %3725  ;;  %v367_v54 = vmax.f32 %v285_v36, 1e-24 }
  0xce   :  { %v4191_v5 = vmul.f32 16.0, %v3726_v44 }
  0xcf   :  { %v306_v26 = vpop.xlane.xlu1 %305  ;;  %3733 = vrsqrt.f32 %v367_v54 }
  0xd0   :  { %6986 = vst [vmem:[#allocation44_spill] sm:$0xff] %v4191_v5  ;;  %v3728_v35 = vpop.eup %3727  ;;  %3735 = vrsqrt.f32 %v368_v61  ;;  %v370_v22 = vmax.f32 %v306_v26, 1e-24  ;;  %v4199_v31 = vmul.f32 %v4191_v5, %v3920_v1  ;;  %v4217_v1 = vmul.f32 %v4191_v5, %v3924_v3 }
  0xd1   :  { %v4193_v18 = vmul.f32 16.0, %v3728_v35  ;;  %v3730_v27 = vpop.eup %3729 }
  0xd2   :  { %v4195_v45 = vmul.f32 16.0, %v3730_v27  ;;  %3737 = vrsqrt.f32 %v370_v22  ;;  %v6550_v19 = vand.u32 4294901760, %v4199_v31  ;;  %v6547_v22 = vand.u32 4294901760, %v4217_v1 }
  0xd3   :  { %6987 = vst [vmem:[#allocation45_spill] sm:$0xff] %v4193_v18  ;;  %v299_v60 = vpop.xlane.xlu0 %298  ;;  %v4203_v48 = vmul.f32 %v4193_v18, %v3936_v11  ;;  %v4207_v21 = vmul.f32 %v4193_v18, %v3940_v14  ;;  %v4221_v11 = vmul.f32 %v4193_v18, %v3934_v10  ;;  %v4225_v14 = vmul.f32 %v4193_v18, %v3938_v12 }
  0xd4   :  { %6988 = vst [vmem:[#allocation46_spill] sm:$0xff] %v4195_v45  ;;  %v3732_v49 = vpop.eup %3731  ;;  %v4211_v33 = vmul.f32 %v4195_v45, %v3952_v24  ;;  %v369_v6 = vmax.f32 %v299_v60, 1e-24  ;;  %v4242_v10 = vmul.f32 %v4195_v45, %v3956_v28 }
  0xd5   :  { %v4213_v41 = vmul.f32 16.0, %v3732_v49  ;;  %v6552_v12 = vand.u32 4294901760, %v4203_v48  ;;  %v6551_v7 = vand.u32 4294901760, %v4207_v21  ;;  %v6549_v28 = vand.u32 4294901760, %v4221_v11 }
  0xd6   :  { %v6541_v15 = vand.u32 4294901760, %v4211_v33  ;;  %3739 = vrsqrt.f32 %v369_v6  ;;  %v6548_v61 = vand.u32 4294901760, %v4225_v14  ;;  %v6546_v60 = vand.u32 4294901760, %v4242_v10  ;;  %v320_v49 = vpop.xlane.xlu1 %319 }
  0xd7   :  { %6989 = vst [vmem:[#allocation47_spill] sm:$0xff] %v4213_v41  ;;  %v4230_v24 = vmul.f32 %v4213_v41, %v3968_v38  ;;  %v4234_v57 = vmul.f32 %v4213_v41, %v3972_v43  ;;  %v4238_v3 = vmul.f32 %v4213_v41, %v3966_v37  ;;  %v4248_v38 = vmul.f32 %v4213_v41, %v3970_v39 }
  0xd8   :  { %v4261_v39 = vpack.c.bf16 %v6541_v15, %v6550_v19  ;;  %v313_v6 = vpop.xlane.xlu0 %312  ;;  %v4291_v15 = vmul.f32 %v4191_v5, %v3918_v0  ;;  %v372_v0 = vmax.f32 %v320_v49, 1e-24 }
  0xd9   :  { %v6543_v43 = vand.u32 4294901760, %v4230_v24  ;;  %v6542_v37 = vand.u32 4294901760, %v4234_v57  ;;  %v6545_v36 = vand.u32 4294901760, %v4238_v3  ;;  %v3734_v44 = vpop.eup %3733  ;;  %v6544_v54 = vand.u32 4294901760, %v4248_v38 }
  0xda   :  { %6990 = vst [vmem:[#allocation48_spill] sm:$0xff] %v4261_v39  ;;  %v3736_v35 = vpop.eup %3735  ;;  %3741 = vrsqrt.f32 %v372_v0 }
  0xdb   :  { %v4267_v26 = vpack.c.bf16 %v6543_v43, %v6552_v12  ;;  %v4273_v27 = vpack.c.bf16 %v6542_v37, %v6551_v7  ;;  %v4281_v40 = vpack.c.bf16 %v6545_v36, %v6549_v28  ;;  %v4287_v42 = vpack.c.bf16 %v6544_v54, %v6548_v61  ;;  %v334_v19 = vpop.xlane.xlu1 %333 }
  0xdc   :  { %v4295_v37 = vmul.f32 %v4191_v5, %v3922_v2  ;;  %v4297_v43 = vmul.f32 16.0, %v3734_v44  ;;  %v4305_v54 = vpack.c.bf16 %v6546_v60, %v6547_v22  ;;  %v4307_v36 = vmul.f32 16.0, %v3736_v35  ;;  %v3738_v22 = vpop.eup %3737  ;;  %v7035_v5 = vld [vmem:[#allocation20_spill] sm:$0xff] }
  0xdd   :  { %6991 = vst [vmem:[#allocation49_spill] sm:$0xff] %v4267_v26  ;;  %6992 = vst [vmem:[#allocation50_spill] sm:$0xff] %v4273_v27  ;;  %3112 = vmatprep.subr.bf16.mxu1 %v4267_v26  ;;  %3400 = vmatprep.subr.bf16.mxu0 %v4273_v27  ;;  %v371_v2 = vmax.f32 %v313_v6, 1e-24  ;;  %v4313_v44 = vmul.f32 %v4195_v45, %v3950_v23  ;;  %v4319_v60 = vmul.f32 %v4195_v45, %v3954_v25  ;;  %v7015_v45 = vld [vmem:[#allocation14_spill] sm:$0xff] }
  0xde   :  { %6993 = vst [vmem:[#allocation51_spill] sm:$0xff] %v4281_v40  ;;  %6994 = vst [vmem:[#allocation52_spill] sm:$0xff] %v4287_v42  ;;  %3114 = vmatpush1.bf16.xpose.msra.mxu1 %v4281_v40  ;;  %3402 = vmatpush1.bf16.xpose.msra.mxu0 %v4287_v42  ;;  %v6556_v61 = vand.u32 4294901760, %v4291_v15  ;;  %v6558_v49 = vand.u32 4294901760, %v4295_v37  ;;  %v4327_v28 = vmul.f32 %v4297_v43, %v3998_v4 }
  0xdf   :  { %6995 = vst [vmem:[#allocation53_spill] sm:$0xff] %v4297_v43  ;;  %6996 = vst [vmem:[#allocation54_spill] sm:$0xff] %v4305_v54  ;;  %3116 = vmatprep.subr.bf16.mxu1 %v4261_v39  ;;  %3404 = vmatprep.subr.bf16.mxu0 %v4305_v54  ;;  %v327_v35 = vpop.xlane.xlu0 %326  ;;  %3743 = vrsqrt.f32 %v371_v2  ;;  %v6555_v6 = vand.u32 4294901760, %v4313_v44  ;;  %v6557_v23 = vand.u32 4294901760, %v4319_v60  ;;  %v4331_v25 = vmul.f32 %v4307_v36, %v3982_v51 }
  0xe0   :  { %6997 = vst [vmem:[#allocation55_spill] sm:$0xff] %v4307_v36  ;;  %v373_v7 = vmax.f32 %v327_v35, 1e-24  ;;  %v3740_v0 = vpop.eup %3739  ;;  %v6560_v4 = vand.u32 4294901760, %v4327_v28  ;;  %v4349_v51 = vmul.f32 %v4297_v43, %v4004_v20  ;;  %v4353_v9 = vmul.f32 %v4307_v36, %v3988_v58 }
  0xe1   :  { %v4337_v2 = vpack.c.bf16 %v6555_v6, %v6556_v61  ;;  %v4343_v12 = vpack.c.bf16 %v6557_v23, %v6558_v49  ;;  %v6559_v35 = vand.u32 4294901760, %v4331_v25  ;;  %v4357_v6 = vmul.f32 %v4297_v43, %v3996_v63 }
  0xe2   :  { %v374_v61 = vmax.f32 %v334_v19, 1e-24  ;;  %v4361_v23 = vmul.f32 %v4307_v36, %v3980_v50  ;;  %v4365_v49 = vmul.f32 %v4297_v43, %v4000_v13  ;;  %v4369_v20 = vmul.f32 %v4307_v36, %v3984_v52  ;;  %v7014_v36 = vld [vmem:[#allocation18_spill] sm:$0xff] }
  0xe3   :  { %6998 = vst [vmem:[#allocation56_spill] sm:$0xff] %v4337_v2  ;;  %6999 = vst [vmem:[#allocation57_spill] sm:$0xff] %v4343_v12  ;;  %3745 = vrsqrt.f32 %v373_v7  ;;  %v4377_v58 = vpack.c.bf16 %v6559_v35, %v6560_v4  ;;  %v6568_v50 = vand.u32 4294901760, %v4349_v51  ;;  %v6567_v63 = vand.u32 4294901760, %v4353_v9 }
  0xe4   :  { %v4381_v13 = vmul.f32 16.0, %v3738_v22  ;;  %v4383_v19 = vmul.f32 16.0, %v3740_v0  ;;  %v6574_v52 = vand.u32 4294901760, %v4357_v6  ;;  %v6573_v35 = vand.u32 4294901760, %v4361_v23  ;;  %v341_v22 = vpop.xlane.xlu0 %340  ;;  %v348_v0 = vpop.xlane.xlu1 %347 }
  0xe5   :  { %7000 = vst [vmem:[#allocation58_spill] sm:$0xff] %v4377_v58  ;;  %v4391_v7 = vpack.c.bf16 %v6567_v63, %v6568_v50  ;;  %v6578_v4 = vand.u32 4294901760, %v4365_v49  ;;  %3747 = vrsqrt.f32 %v374_v61  ;;  %v3742_v39 = vpop.eup %3741  ;;  %v375_v40 = vmax.f32 %v341_v22, 1e-24 }
  0xe6   :  { %3118 = vmatpush1.bf16.xpose.msra.mxu1 %v4337_v2  ;;  %3406 = vmatpush1.bf16.xpose.msra.mxu0 %v4343_v12  ;;  %7001 = vst [vmem:[#allocation59_spill] sm:$0xff] %v4381_v13  ;;  %7002 = vst [vmem:[#allocation60_spill] sm:$0xff] %v4383_v19  ;;  %v6577_v2 = vand.u32 4294901760, %v4369_v20  ;;  %v4411_v61 = vmul.f32 %v4383_v19, %v4028_v56  ;;  %v4415_v26 = vmul.f32 %v4381_v13, %v4012_v30 }
  0xe7   :  { %3120 = vmatprep.subr.bf16.mxu1 %v4377_v58  ;;  %7003 = vst [vmem:[#allocation61_spill] sm:$0xff] %v4391_v7  ;;  %3408 = vmatprep.subr.bf16.mxu0 %v4391_v7  ;;  %v4401_v58 = vpack.c.bf16 %v6573_v35, %v6574_v52  ;;  %v4419_v35 = vmul.f32 %v4383_v19, %v4036_v16  ;;  %v376_v52 = vmax.f32 %v348_v0, 1e-24  ;;  %3749 = vrsqrt.f32 %v375_v40 }
  0xe8   :  { %v4407_v63 = vpack.c.bf16 %v6577_v2, %v6578_v4  ;;  %v4423_v7 = vmul.f32 %v4381_v13, %v4020_v46  ;;  %v4427_v22 = vmul.f32 %v4383_v19, %v4026_v55  ;;  %v4429_v2 = vmul.f32 16.0, %v3742_v39 }
  0xe9   :  { %7004 = vst [vmem:[#allocation62_spill] sm:$0xff] %v4401_v58  ;;  %v3744_v50 = vpop.eup %3743  ;;  %v6584_v56 = vand.u32 4294901760, %v4411_v61  ;;  %v6583_v30 = vand.u32 4294901760, %v4415_v26  ;;  %v6586_v16 = vand.u32 4294901760, %v4419_v35  ;;  %v4441_v55 = vmul.f32 %v4381_v13, %v4010_v29 }
  0xea   :  { %7005 = vst [vmem:[#allocation63_spill] sm:$0xff] %v4407_v63  ;;  %7006 = vst [vmem:[#allocation64_spill] sm:$0xff] %v4429_v2  ;;  %v4433_v4 = vmul.f32 16.0, %v3744_v50  ;;  %v6585_v46 = vand.u32 4294901760, %v4423_v7  ;;  %v355_v39 = vpop.xlane.xlu0 %354  ;;  %3751 = vrsqrt.f32 %v376_v52  ;;  %v4460_v40 = vmul.f32 %v4383_v19, %v4030_v47  ;;  %v362_v52 = vpop.xlane.xlu1 %361  ;;  %v7012_v47 = vld [vmem:[#allocation12_spill] sm:$0xff] }
  0xeb   :  { %v4447_v50 = vpack.c.bf16 %v6583_v30, %v6584_v56  ;;  %v6599_v29 = vand.u32 4294901760, %v4441_v55  ;;  %v4464_v30 = vmul.f32 %v4381_v13, %v4016_v34  ;;  %v377_v56 = vmax.f32 %v355_v39, 1e-24  ;;  %v38_v34 = vld [vmem:[#allocation2] sm:$0xff] }
  0xec   :  { %7007 = vst [vmem:[#allocation65_spill] sm:$0xff] %v4433_v4  ;;  %v4479_v12 = vmul.f32 %v4429_v2, %v7012_v47  ;;  %v6608_v39 = vand.u32 4294901760, %v4460_v40  ;;  %v4493_v47 = vmul.f32 %v4429_v2, %v7015_v45  ;;  %v4501_v8 = vand.u32 4294901760, %v38_v34 }
  0xed   :  { %7008 = vst [vmem:[#allocation66_spill] sm:$0xff] %v4447_v50  ;;  %v3746_v0 = vpop.eup %3745  ;;  %3753 = vrsqrt.f32 %v377_v56 }
  0xee   :  { %3122 = vmatpush1.bf16.xpose.msra.mxu1 %v4401_v58  ;;  %3410 = vmatpush1.bf16.xpose.msra.mxu0 %v4407_v63  ;;  %v4453_v58 = vpack.c.bf16 %v6585_v46, %v6586_v16  ;;  %v6600_v63 = vand.u32 4294901760, %v4427_v22  ;;  %v7011_v16 = vld [vmem:[#allocation16_spill] sm:$0xff]  ;;  %v4481_v19 = vmul.f32 16.0, %v3746_v0  ;;  %v6613_v43 = vand.u32 4294901760, %v4479_v12  ;;  %7016 = vst [vmem:[#allocation12_spill] sm:$0xff] %v4493_v47  ;;  %7018 = vst [vmem:[#allocation14_spill] sm:$0xff] %v4501_v8 }
  0xef   :  { %3124 = vmatprep.subr.bf16.mxu1 %v4447_v50  ;;  %v4475_v50 = vmul.f32 %v4433_v4, %v7011_v16  ;;  %v3748_v13 = vpop.eup %3747 }
  0xf0   :  { %7009 = vst [vmem:[#allocation67_spill] sm:$0xff] %v4453_v58  ;;  %3412 = vmatprep.subr.bf16.mxu0 %v4453_v58  ;;  %v4471_v46 = vpack.c.bf16 %v6599_v29, %v6600_v63  ;;  %7013 = vst [vmem:[#allocation16_spill] sm:$0xff] %v4481_v19  ;;  %v6607_v58 = vand.u32 4294901760, %v4464_v30  ;;  %v4487_v29 = vmul.f32 %v4433_v4, %v7014_v36  ;;  %v378_v63 = vmax.f32 %v362_v52, 1e-24 }
  0xf1   :  { %v6614_v16 = vand.u32 4294901760, %v4475_v50  ;;  %v4503_v36 = vmul.f32 16.0, %v3748_v13  ;;  %v7023_v13 = vld [vmem:[#allocation11_spill] sm:$0xff] }
  0xf2   :  { %7010 = vst [vmem:[#allocation68_spill] sm:$0xff] %v4471_v46  ;;  %v4499_v0 = vpack.c.bf16 %v6607_v58, %v6608_v39  ;;  %v7021_v39 = vld [vmem:[#allocation15_spill] sm:$0xff]  ;;  %v4521_v41 = vmul.f32 %v4429_v2, %v7023_v13  ;;  %3755 = vrsqrt.f32 %v378_v63  ;;  %v7029_v58 = vld [vmem:[#allocation24_spill] sm:$0xff]  ;;  %v7031_v54 = vand.u32 4294901760, %v4487_v29 }
  0xf3   :  { %7019 = vst [vmem:[#allocation69_spill] sm:$0xff] %v4503_v36  ;;  %v4510_v52 = vpack.c.bf16 %v6613_v43, %v6614_v16  ;;  %v4517_v56 = vmul.f32 %v4433_v4, %v7021_v39  ;;  %v7027_v16 = vld [vmem:[#allocation13_spill] sm:$0xff]  ;;  %v3750_v39 = vpop.eup %3749  ;;  %v7032_v13 = vand.u32 4294901760, %v4493_v47  ;;  %v4551_v18 = vmul.f32 %v4503_v36, %v7035_v5  ;;  %v7065_v47 = vld [vmem:[#allocation30_spill] sm:$0xff] }
  0xf4   :  { %7017 = vst [vmem:[#allocation18_spill] sm:$0xff] %v4499_v0  ;;  %7024 = vst [vmem:[#allocation11_spill] sm:$0xff] %v4521_v41  ;;  %v4530_v45 = vmul.f32 %v4429_v2, %v7027_v16  ;;  %v3752_v16 = vpop.eup %3751  ;;  %v4564_v42 = vmul.f32 16.0, %v3750_v39 }
  0xf5   :  { %7020 = vst [vmem:[#allocation70_spill] sm:$0xff] %v4510_v52  ;;  %7022 = vst [vmem:[#allocation15_spill] sm:$0xff] %v4517_v56  ;;  %v4540_v63 = vpack.c.bf16 %v7032_v13, %v7031_v54  ;;  %v7038_v13 = vld [vmem:[#allocation26_spill] sm:$0xff]  ;;  %v4574_v27 = vmul.f32 16.0, %v3752_v16  ;;  %v7048_v16 = vld [vmem:[#allocation19_spill] sm:$0xff] }
  0xf6   :  { %3126 = vmatpush1.bf16.xpose.msra.mxu1 %v4471_v46  ;;  %3414 = vmatpush1.bf16.xpose.msra.mxu0 %v4499_v0  ;;  %v7025_v46 = vld [vmem:[#allocation17_spill] sm:$0xff]  ;;  %7028 = vst [vmem:[#allocation13_spill] sm:$0xff] %v4530_v45  ;;  %v4534_v0 = vmul.f32 %v4481_v19, %v7029_v58  ;;  %v6641_v58 = vand.u32 4294901760, %v4530_v45  ;;  %7036 = vst [vmem:[#allocation20_spill] sm:$0xff] %v4551_v18 }
  0xf7   :  { %3128 = vmatprep.subr.bf16.mxu1 %v4510_v52  ;;  %v4526_v43 = vmul.f32 %v4433_v4, %v7025_v46  ;;  %7033 = vst [vmem:[#allocation71_spill] sm:$0xff] %v4540_v63  ;;  %v6638_v52 = vand.u32 4294901760, %v4517_v56  ;;  %v6637_v46 = vand.u32 4294901760, %v4521_v41  ;;  %v4545_v4 = vsub.f32 %v38_v34, %v4501_v8  ;;  %3416 = vmatprep.subr.bf16.mxu0 %v4540_v63  ;;  %v3754_v45 = vpop.eup %3753  ;;  %v7054_v41 = vld [vmem:[#allocation32_spill] sm:$0xff]  ;;  %v7063_v56 = vld [vmem:[#allocation34_spill] sm:$0xff] }
  0xf8   :  { %7030 = vst [vmem:[#allocation24_spill] sm:$0xff] %v4534_v0  ;;  %v4562_v34 = vmul.f32 %v4481_v19, %v7038_v13  ;;  %7040 = vst [vmem:[#allocation74_spill] sm:$0xff] %v4564_v42  ;;  %v6650_v63 = vand.u32 4294901760, %v4534_v0  ;;  %v6649_v8 = vand.u32 4294901760, %v4551_v18  ;;  %v7045_v13 = vld [vmem:[#allocation23_spill] sm:$0xff] }
  0xf9   :  { %7026 = vst [vmem:[#allocation17_spill] sm:$0xff] %v4526_v43  ;;  %7034 = vst [vmem:[#allocation72_spill] sm:$0xff] %v4545_v4  ;;  %v6642_v2 = vand.u32 4294901760, %v4526_v43  ;;  %v4558_v54 = vpack.c.bf16 %v6637_v46, %v6638_v52  ;;  %v7043_v46 = vld [vmem:[#allocation22_spill] sm:$0xff]  ;;  %v4582_v39 = vmul.f32 %v4481_v19, %v7045_v13 }
  0xfa   :  { %7039 = vst [vmem:[#allocation26_spill] sm:$0xff] %v4562_v34  ;;  %7042 = vst [vmem:[#allocation76_spill] sm:$0xff] %v4574_v27  ;;  %v4578_v52 = vmul.f32 %v4503_v36, %v7043_v46  ;;  %v40_v46 = vld [vmem:[#allocation2 + $0x10] sm:$0xff]  ;;  %v6668_v13 = vand.u32 4294901760, %v4562_v34 }
  0xfb   :  { %7037 = vst [vmem:[#allocation73_spill] sm:$0xff] %v4558_v54  ;;  %v4570_v5 = vpack.c.bf16 %v6641_v58, %v6642_v2  ;;  %7046 = vst [vmem:[#allocation23_spill] sm:$0xff] %v4582_v39  ;;  %v4590_v58 = vpack.c.bf16 %v6649_v8, %v6650_v63  ;;  %v4594_v2 = vmul.f32 %v4503_v36, %v7048_v16  ;;  %v7050_v8 = vld [vmem:[#allocation25_spill] sm:$0xff]  ;;  %v7060_v34 = vand.u32 4294901760, %v4582_v39 }
  0xfc   :  { %7044 = vst [vmem:[#allocation22_spill] sm:$0xff] %v4578_v52  ;;  %v6667_v43 = vand.u32 4294901760, %v4578_v52  ;;  %v4604_v63 = vmul.f32 %v4481_v19, %v7050_v8  ;;  %v7052_v16 = vld [vmem:[#allocation21_spill] sm:$0xff]  ;;  %v7057_v8 = vand.u32 4294901760, %v4545_v4  ;;  %v4650_v39 = vmul.f32 %v4574_v27, %v7065_v47 }
  0xfd   :  { %7041 = vst [vmem:[#allocation75_spill] sm:$0xff] %v4570_v5  ;;  %7047 = vst [vmem:[#allocation77_spill] sm:$0xff] %v4590_v58  ;;  %v4608_v0 = vmul.f32 %v4503_v36, %v7052_v16  ;;  %v4629_v16 = vand.u32 4294901760, %v40_v46  ;;  %v3756_v36 = vpop.eup %3755  ;;  %v7061_v52 = vand.u32 4294901760, %v4594_v2 }
  0xfe   :  { %3130 = vmatpush1.bf16.xpose.msra.mxu1 %v4558_v54  ;;  %7049 = vst [vmem:[#allocation19_spill] sm:$0xff] %v4594_v2  ;;  %3418 = vmatpush1.bf16.xpose.msra.mxu0 %v4570_v5  ;;  %7051 = vst [vmem:[#allocation25_spill] sm:$0xff] %v4604_v63  ;;  %v4612_v5 = vmul.f32 %v4564_v42, %v7054_v41  ;;  %v4618_v54 = vpack.c.bf16 %v6667_v43, %v6668_v13  ;;  %v4631_v41 = vmul.f32 16.0, %v3754_v45 }
  0xff   :  { %3132 = vmatprep.subr.bf16.mxu1 %v4590_v58  ;;  %7053 = vst [vmem:[#allocation21_spill] sm:$0xff] %v4608_v0  ;;  %v7056_v58 = vld [vmem:[#allocation28_spill] sm:$0xff]  ;;  %v4627_v19 = vsub.f32 %v4545_v4, %v7057_v8  ;;  %v4637_v43 = vpack.c.bf16 %v7061_v52, %v7060_v34  ;;  %v6682_v13 = vand.u32 4294901760, %v4604_v63  ;;  %v4646_v45 = vmul.f32 %v4564_v42, %v7063_v56  ;;  %v7068_v34 = vld [vmem:[#allocation31_spill] sm:$0xff] }
 0x100   :  { %7055 = vst [vmem:[#allocation32_spill] sm:$0xff] %v4618_v54  ;;  %v4622_v18 = vmul.f32 %v4574_v27, %v7056_v58  ;;  %7058 = vst [vmem:[#allocation28_spill] sm:$0xff] %v4629_v16  ;;  %v6681_v58 = vand.u32 4294901760, %v4608_v0  ;;  %3420 = vmatprep.subr.bf16.mxu0 %v4618_v54  ;;  %v4660_v54 = vmul.f32 %v4564_v42, %v7068_v34  ;;  %v4662_v8 = vmul.f32 16.0, %v3756_v36  ;;  %v7074_v0 = vld [vmem:[#allocation27_spill] sm:$0xff]  ;;  %v7075_v36 = vld [vmem:[#allocation33_spill] sm:$0xff] }
 0x101   :  { %7059 = vst [vmem:[#allocation78_spill] sm:$0xff] %v4631_v41  ;;  %7062 = vst [vmem:[#allocation79_spill] sm:$0xff] %v4637_v43  ;;  %v7070_v4 = vand.u32 4294901760, %v4612_v5  ;;  %v4671_v47 = vsub.f32 %v40_v46, %v4629_v16  ;;  %v4678_v34 = vmul.f32 %v4574_v27, %v7074_v0  ;;  %v4682_v63 = vmul.f32 %v4564_v42, %v7075_v36  ;;  %v7079_v46 = vld [vmem:[#allocation29_spill] sm:$0xff]  ;;  %v7098_v16 = vld [vmem:[#allocation38_spill] sm:$0xff] }
 0x102   :  { %7064 = vst [vmem:[#allocation34_spill] sm:$0xff] %v4646_v45  ;;  %7066 = vst [vmem:[#allocation30_spill] sm:$0xff] %v4650_v39  ;;  %v4656_v52 = vpack.c.bf16 %v6681_v58, %v6682_v13  ;;  %v7071_v56 = vand.u32 4294901760, %v4622_v18  ;;  %v4693_v13 = vmul.f32 %v4574_v27, %v7079_v46  ;;  %v4697_v0 = vmul.f32 %v4631_v41, %v4158_v32 }
 0x103   :  { %7069 = vst [vmem:[#allocation31_spill] sm:$0xff] %v4662_v8  ;;  %7073 = vst [vmem:[#allocation82_spill] sm:$0xff] %v4671_v47  ;;  %v7081_v58 = vand.u32 4294901760, %v4207_v21  ;;  %v6700_v46 = vand.u32 4294901760, %v4660_v54  ;;  %v7086_v32 = vand.u32 4294901760, %v4199_v31  ;;  %v6707_v36 = vand.u32 4294901760, %v4682_v63 }
 0x104   :  { %7067 = vst [vmem:[#allocation80_spill] sm:$0xff] %v4656_v52  ;;  %v4668_v2 = vpack.c.bf16 %v7071_v56, %v7070_v4  ;;  %7076 = vst [vmem:[#allocation27_spill] sm:$0xff] %v4682_v63  ;;  %v7077_v4 = vand.u32 4294901760, %v4203_v48 }
 0x105   :  { %7080 = vst [vmem:[#allocation29_spill] sm:$0xff] %v4693_v13  ;;  %v4716_v27 = vsub.f32 %v4199_v31, %v7086_v32  ;;  %v4738_v32 = vmul.f32 %v4631_v41, %v4164_v53 }
 0x106   :  { %7072 = vst [vmem:[#allocation81_spill] sm:$0xff] %v4668_v2  ;;  %3134 = vmatpush1.bf16.xpose.msra.mxu1 %v4637_v43  ;;  %v4687_v56 = vsub.f32 %v4203_v48, %v7077_v4  ;;  %3422 = vmatpush1.bf16.xpose.msra.mxu0 %v4656_v52  ;;  %v4703_v43 = vsub.f32 %v4207_v21, %v7081_v58  ;;  %v7083_v48 = vand.u32 4294901760, %v4646_v45  ;;  %v7084_v4 = vand.u32 4294901760, %v4650_v39  ;;  %v7088_v58 = vld [vmem:[#allocation36_spill] sm:$0xff] }
 0x107   :  { %3136 = vmatprep.subr.bf16.mxu1 %v4668_v2  ;;  %v6699_v52 = vand.u32 4294901760, %v4678_v34  ;;  %7087 = vst [vmem:[#allocation85_spill] sm:$0xff] %v4716_v27  ;;  %v4722_v42 = vmul.f32 %v4662_v8, %v7088_v58  ;;  %7092 = vst [vmem:[#allocation87_spill] sm:$0xff] %v4738_v32  ;;  %v4742_v58 = vmul.f32 %v4662_v8, %v4148_v62  ;;  %v7094_v21 = vand.u32 4294901760, %v4230_v24 }
 0x108   :  { %7078 = vst [vmem:[#allocation33_spill] sm:$0xff] %v4687_v56  ;;  %7082 = vst [vmem:[#allocation83_spill] sm:$0xff] %v4703_v43  ;;  %v4709_v2 = vpack.c.bf16 %v7084_v4, %v7083_v48  ;;  %v7089_v48 = vand.u32 4294901760, %v4221_v11  ;;  %v4761_v39 = vmul.f32 %v4631_v41, %v7098_v16 }
 0x109   :  { %v4734_v31 = vpack.c.bf16 %v6699_v52, %v6700_v46  ;;  %7093 = vst [vmem:[#allocation88_spill] sm:$0xff] %v4742_v58  ;;  %v6711_v52 = vand.u32 4294901760, %v4697_v0  ;;  %v6710_v53 = vand.u32 4294901760, %v4722_v42  ;;  %v7103_v46 = vld [vmem:[#allocation39_spill] sm:$0xff] }
 0x10a   :  { %7085 = vst [vmem:[#allocation84_spill] sm:$0xff] %v4709_v2  ;;  %v4727_v4 = vsub.f32 %v4221_v11, %v7089_v48  ;;  %3424 = vmatprep.subr.bf16.mxu0 %v4709_v2  ;;  %v4747_v11 = vsub.f32 %v4230_v24, %v7094_v21  ;;  %v7096_v48 = vand.u32 4294901760, %v4693_v13  ;;  %v7099_v21 = vand.u32 4294901760, %v4225_v14 }
 0x10b   :  { %7091 = vst [vmem:[#allocation86_spill] sm:$0xff] %v4734_v31  ;;  %v4781_v16 = vmul.f32 %v4631_v41, %v7103_v46  ;;  %v7104_v24 = vand.u32 4294901760, %v4234_v57  ;;  %v7111_v46 = vand.u32 4294901760, %v4742_v58 }
 0x10c   :  { %7090 = vst [vmem:[#allocation36_spill] sm:$0xff] %v4727_v4  ;;  %7095 = vst [vmem:[#allocation89_spill] sm:$0xff] %v4747_v11  ;;  %v4753_v2 = vpack.c.bf16 %v7096_v48, %v6707_v36  ;;  %v4767_v13 = vsub.f32 %v4225_v14, %v7099_v21  ;;  %v4773_v48 = vpack.c.bf16 %v6710_v53, %v6711_v52  ;;  %v7102_v36 = vld [vmem:[#allocation35_spill] sm:$0xff]  ;;  %v7106_v14 = vand.u32 4294901760, %v4238_v3 }
 0x10d   :  { %v4777_v62 = vmul.f32 %v4662_v8, %v7102_v36  ;;  %v4786_v63 = vsub.f32 %v4234_v57, %v7104_v24  ;;  %v7108_v53 = vand.u32 4294901760, %v4211_v33  ;;  %v7110_v36 = vand.u32 4294901760, %v4738_v32 }
 0x10e   :  { %7097 = vst [vmem:[#allocation90_spill] sm:$0xff] %v4753_v2  ;;  %7100 = vst [vmem:[#allocation38_spill] sm:$0xff] %v4767_v13  ;;  %v4791_v21 = vsub.f32 %v4238_v3, %v7106_v14  ;;  %3138 = vmatpush1.bf16.xpose.msra.mxu1 %v4734_v31  ;;  %v7113_v57 = vand.u32 4294901760, %v4248_v38  ;;  %v7115_v3 = vand.u32 4294901760, %v4217_v1  ;;  %3426 = vmatpush1.bf16.xpose.msra.mxu0 %v4753_v2  ;;  %v6732_v32 = vand.u32 4294901760, %v4703_v43 }
 0x10f   :  { %7101 = vst [vmem:[#allocation91_spill] sm:$0xff] %v4773_v48  ;;  %7105 = vst [vmem:[#allocation35_spill] sm:$0xff] %v4786_v63  ;;  %v4796_v52 = vsub.f32 %v4211_v33, %v7108_v53  ;;  %v4803_v41 = vpack.c.bf16 %v7111_v46, %v7110_v36  ;;  %3140 = vmatprep.subr.bf16.mxu1 %v4773_v48  ;;  %v7117_v33 = vld [vmem:[#allocation37_spill] sm:$0xff]  ;;  %v7119_v48 = vand.u32 4294901760, %v4242_v10  ;;  %v7128_v46 = vand.u32 4294901760, %v4295_v37 }
 0x110   :  { %7107 = vst [vmem:[#allocation39_spill] sm:$0xff] %v4791_v21  ;;  %v4808_v24 = vsub.f32 %v4248_v38, %v7113_v57  ;;  %v4813_v14 = vsub.f32 %v4217_v1, %v7115_v3  ;;  %v4819_v53 = vmul.f32 %v4662_v8, %v7117_v33  ;;  %v7118_v57 = vand.u32 4294901760, %v4687_v56 }
 0x111   :  { %7109 = vst [vmem:[#allocation92_spill] sm:$0xff] %v4796_v52  ;;  %7112 = vst [vmem:[#allocation93_spill] sm:$0xff] %v4803_v41  ;;  %3428 = vmatprep.subr.bf16.mxu0 %v4803_v41  ;;  %v6726_v3 = vand.u32 4294901760, %v4747_v11  ;;  %v4832_v31 = vsub.f32 %v4242_v10, %v7119_v48  ;;  %v7121_v33 = vand.u32 4294901760, %v4291_v15  ;;  %v7123_v41 = vand.u32 4294901760, %v4761_v39 }
 0x112   :  { %7114 = vst [vmem:[#allocation94_spill] sm:$0xff] %v4808_v24  ;;  %7116 = vst [vmem:[#allocation95_spill] sm:$0xff] %v4813_v14  ;;  %v622_v1 = vsub.f32 %v4687_v56, %v7118_v57  ;;  %v7124_v57 = vand.u32 4294901760, %v4777_v62  ;;  %v4860_v38 = vsub.f32 %v4295_v37, %v7128_v46  ;;  %v7135_v37 = vand.u32 4294901760, %v4331_v25 }
 0x113   :  { %7120 = vst [vmem:[#allocation37_spill] sm:$0xff] %v4832_v31  ;;  %v4837_v36 = vsub.f32 %v4291_v15, %v7121_v33  ;;  %v634_v10 = vsub.f32 %v4747_v11, %v6726_v3  ;;  %v7126_v15 = vand.u32 4294901760, %v4313_v44  ;;  %v6731_v3 = vand.u32 4294901760, %v4791_v21 }
 0x114   :  { %v4845_v2 = vpack.c.bf16 %v7124_v57, %v7123_v41  ;;  %7129 = vst [vmem:[#allocation99_spill] sm:$0xff] %v4860_v38  ;;  %v7130_v41 = vand.u32 4294901760, %v4781_v16  ;;  %v7131_v57 = vand.u32 4294901760, %v4819_v53  ;;  %v623_v48 = vand.u32 4294901760, %v622_v1 }
 0x115   :  { %7122 = vst [vmem:[#allocation96_spill] sm:$0xff] %v4837_v36  ;;  %v4855_v33 = vsub.f32 %v4313_v44, %v7126_v15  ;;  %v635_v8 = vand.u32 4294901760, %v634_v10  ;;  %v7133_v15 = vand.u32 4294901760, %v4327_v28  ;;  %v4879_v46 = vsub.f32 %v4331_v25, %v7135_v37 }
 0x116   :  { %7125 = vst [vmem:[#allocation97_spill] sm:$0xff] %v4845_v2  ;;  %v4866_v58 = vpack.c.bf16 %v7131_v57, %v7130_v41  ;;  %v640_v41 = vsub.f32 %v4791_v21, %v6731_v3  ;;  %3142 = vmatpush1.bf16.xpose.msra.mxu1 %v4845_v2  ;;  %v7137_v57 = vand.u32 4294901760, %v4786_v63  ;;  %v7139_v25 = vand.u32 4294901760, %v4716_v27 }
 0x117   :  { %7127 = vst [vmem:[#allocation98_spill] sm:$0xff] %v4855_v33  ;;  %v4874_v45 = vsub.f32 %v4327_v28, %v7133_v15  ;;  %7136 = vst [vmem:[#allocation102_spill] sm:$0xff] %v4879_v46  ;;  %v3143_v10 = vpack.c.bf16 %v635_v8, %v623_v48  ;;  %v7138_v15 = vand.u32 4294901760, %v4727_v4  ;;  %v7140_v3 = vand.u32 4294901760, %v4319_v60 }
 0x118   :  { %7132 = vst [vmem:[#allocation100_spill] sm:$0xff] %v4866_v58  ;;  %v3431_v28 = vpack.c.bf16 %v7137_v57, %v6732_v32  ;;  %v646_v37 = vsub.f32 %v4716_v27, %v7139_v25  ;;  %v7142_v8 = vand.u32 4294901760, %v4349_v51  ;;  %v7144_v57 = vand.u32 4294901760, %v4353_v9  ;;  %3430 = vmatpush1.bf16.xpose.msra.mxu0 %v4866_v58 }
 0x119   :  { %7134 = vst [vmem:[#allocation101_spill] sm:$0xff] %v4874_v45  ;;  %v628_v44 = vsub.f32 %v4727_v4, %v7138_v15  ;;  %v4899_v1 = vsub.f32 %v4319_v60, %v7140_v3  ;;  %v7146_v15 = vand.u32 4294901760, %v4796_v52  ;;  %v7147_v43 = vand.u32 4294901760, %v4357_v6  ;;  %3144 = vmatprep.subr.bf16.mxu1 %v3143_v10 }
 0x11a   :  { %v4904_v48 = vsub.f32 %v4349_v51, %v7142_v8  ;;  %v4909_v32 = vsub.f32 %v4353_v9, %v7144_v57  ;;  %3432 = vmatprep.subr.bf16.mxu0 %v3431_v28  ;;  %v641_v51 = vand.u32 4294901760, %v640_v41  ;;  %v6741_v3 = vand.u32 4294901760, %v4837_v36 }
 0x11b   :  { %7141 = vst [vmem:[#allocation103_spill] sm:$0xff] %v4899_v1  ;;  %v658_v25 = vsub.f32 %v4796_v52, %v7146_v15  ;;  %v4918_v60 = vsub.f32 %v4357_v6, %v7147_v43  ;;  %v6742_v8 = vand.u32 4294901760, %v4855_v33  ;;  %v647_v57 = vand.u32 4294901760, %v646_v37 }
 0x11c   :  { %7143 = vst [vmem:[#allocation104_spill] sm:$0xff] %v4904_v48  ;;  %7145 = vst [vmem:[#allocation105_spill] sm:$0xff] %v4909_v32  ;;  %v7149_v15 = vand.u32 4294901760, %v4361_v23  ;;  %v7151_v43 = vand.u32 4294901760, %v4365_v49  ;;  %v629_v41 = vand.u32 4294901760, %v628_v44  ;;  %v6745_v10 = vand.u32 4294901760, %v4879_v46 }
 0x11d   :  { %7148 = vst [vmem:[#allocation106_spill] sm:$0xff] %v4918_v60  ;;  %v659_v63 = vand.u32 4294901760, %v658_v25  ;;  %v7153_v28 = vand.u32 4294901760, %v4411_v61  ;;  %v7155_v25 = vand.u32 4294901760, %v4415_v26  ;;  %v652_v44 = vsub.f32 %v4837_v36, %v6741_v3 }
 0x11e   :  { %v4927_v58 = vsub.f32 %v4361_v23, %v7149_v15  ;;  %v4932_v6 = vsub.f32 %v4365_v49, %v7151_v43  ;;  %v6743_v23 = vand.u32 4294901760, %v4767_v13  ;;  %v6744_v15 = vand.u32 4294901760, %v4813_v14 }
 0x11f   :  { %v4938_v37 = vsub.f32 %v4411_v61, %v7153_v28  ;;  %v4943_v2 = vsub.f32 %v4415_v26, %v7155_v25  ;;  %v3145_v9 = vpack.c.bf16 %v641_v51, %v629_v41  ;;  %v664_v61 = vsub.f32 %v4855_v33, %v6742_v8 }
 0x120   :  { %7150 = vst [vmem:[#allocation107_spill] sm:$0xff] %v4927_v58  ;;  %7152 = vst [vmem:[#allocation108_spill] sm:$0xff] %v4932_v6  ;;  %v7157_v43 = vand.u32 4294901760, %v4627_v19  ;;  %v7158_v26 = vand.u32 4294901760, %v4808_v24  ;;  %v3147_v25 = vpack.c.bf16 %v659_v63, %v647_v57  ;;  %v7159_v51 = vand.u32 4294901760, %v4874_v45 }
 0x121   :  { %7154 = vst [vmem:[#allocation109_spill] sm:$0xff] %v4938_v37  ;;  %7156 = vst [vmem:[#allocation110_spill] sm:$0xff] %v4943_v2  ;;  %v682_v3 = vsub.f32 %v4879_v46, %v6745_v10  ;;  %v7160_v49 = vand.u32 4294901760, %v4369_v20  ;;  %v7162_v19 = vand.u32 4294901760, %v4419_v35  ;;  %v7164_v63 = vand.u32 4294901760, %v4671_v47 }
 0x122   :  { %614 = vmatmul.mubr.f32.vlgmr.msra.gmra.mrb[0].mxu1 %v7157_v43  ;;  %v3433_v28 = vpack.c.bf16 %v7158_v26, %v6743_v23  ;;  %v670_v41 = vsub.f32 %v4874_v45, %v7159_v51  ;;  %v7165_v57 = vand.u32 4294901760, %v4832_v31  ;;  %v7166_v51 = vand.u32 4294901760, %v4423_v7 }
 0x123   :  { %v4969_v8 = vsub.f32 %v4369_v20, %v7160_v49  ;;  %v4974_v43 = vsub.f32 %v4419_v35, %v7162_v19  ;;  %3146 = vmatpush1.bf16.xpose.msra.mxu1 %v3145_v9  ;;  %1954 = vmatmul.mubr.f32.vlgmr.msra.gmra.mrb[0].mxu0 %v7164_v63  ;;  %v7168_v20 = vand.u32 4294901760, %v4427_v22  ;;  %v7170_v35 = vand.u32 4294901760, %v4441_v55 }
 0x124   :  { %v3435_v26 = vpack.c.bf16 %v7165_v57, %v6744_v15  ;;  %v4985_v23 = vsub.f32 %v4423_v7, %v7166_v51  ;;  %3434 = vmatpush1.bf16.xpose.msra.mxu0 %v3433_v28  ;;  %3148 = vmatprep.subr.bf16.mxu1 %v3147_v25  ;;  %v653_v19 = vand.u32 4294901760, %v652_v44  ;;  %v665_v63 = vand.u32 4294901760, %v664_v61 }
 0x125   :  { %7161 = vst [vmem:[#allocation111_spill] sm:$0xff] %v4969_v8  ;;  %7163 = vst [vmem:[#allocation112_spill] sm:$0xff] %v4974_v43  ;;  %v4990_v49 = vsub.f32 %v4427_v22, %v7168_v20  ;;  %v4995_v9 = vsub.f32 %v4441_v55, %v7170_v35  ;;  %v6746_v57 = vand.u32 4294901760, %v4918_v60  ;;  %v6747_v7 = vand.u32 4294901760, %v4927_v58  ;;  %844 = vmatprep.mubr.f32.mxu1 %v4174_v59 }
 0x126   :  { %7167 = vst [vmem:[#allocation113_spill] sm:$0xff] %v4985_v23  ;;  %3436 = vmatprep.subr.bf16.mxu0 %v3435_v26  ;;  %v671_v51 = vand.u32 4294901760, %v670_v41  ;;  %v683_v15 = vand.u32 4294901760, %v682_v3  ;;  %v6753_v22 = vand.u32 4294901760, %v4938_v37  ;;  %v6752_v20 = vand.u32 4294901760, %v4943_v2  ;;  %2120 = vmatprep.mubr.f32.mxu0 %v4176_v17 }
 0x127   :  { %7169 = vst [vmem:[#allocation114_spill] sm:$0xff] %v4990_v49  ;;  %7171 = vst [vmem:[#allocation115_spill] sm:$0xff] %v4995_v9  ;;  %v7172_v55 = vand.u32 4294901760, %v4460_v40  ;;  %v7174_v44 = vand.u32 4294901760, %v4464_v30  ;;  %v7176_v25 = vand.u32 4294901760, %v4475_v50  ;;  %v7178_v41 = vand.u32 4294901760, %v4479_v12 }
 0x128   :  { %v7180_v35 = vand.u32 4294901760, %v4487_v29  ;;  %v3149_v10 = vpack.c.bf16 %v665_v63, %v653_v19  ;;  %v694_v19 = vsub.f32 %v4938_v37, %v6753_v22  ;;  %v706_v63 = vsub.f32 %v4943_v2, %v6752_v20 }
 0x129   :  { %v5006_v28 = vsub.f32 %v4460_v40, %v7172_v55  ;;  %v5011_v61 = vsub.f32 %v4464_v30, %v7174_v44  ;;  %v5016_v3 = vsub.f32 %v4475_v50, %v7176_v25  ;;  %v5021_v26 = vsub.f32 %v4479_v12, %v7178_v41 }
 0x12a   :  { %v5026_v40 = vsub.f32 %v4487_v29, %v7180_v35  ;;  %v6751_v55 = vand.u32 4294901760, %v4860_v38  ;;  %v6750_v30 = vand.u32 4294901760, %v4899_v1  ;;  %v676_v25 = vsub.f32 %v4918_v60, %v6746_v57  ;;  %v7182_v35 = vld [vmem:[#allocation12_spill] sm:$0xff]  ;;  %v7193_v1 = vld [vmem:[#allocation17_spill] sm:$0xff] }
 0x12b   :  { %7173 = vst [vmem:[#allocation116_spill] sm:$0xff] %v5006_v28  ;;  %7175 = vst [vmem:[#allocation117_spill] sm:$0xff] %v5011_v61  ;;  %v688_v12 = vsub.f32 %v4927_v58, %v6747_v7  ;;  %v3151_v41 = vpack.c.bf16 %v683_v15, %v671_v51  ;;  %v7183_v57 = vand.u32 4294901760, %v7182_v35  ;;  %v7185_v7 = vld [vmem:[#allocation15_spill] sm:$0xff]  ;;  %3150 = vmatpush1.bf16.xpose.msra.mxu1 %v3149_v10  ;;  %v7192_v20 = vand.u32 4294901760, %v4909_v32 }
 0x12c   :  { %7177 = vst [vmem:[#allocation118_spill] sm:$0xff] %v5016_v3  ;;  %7179 = vst [vmem:[#allocation119_spill] sm:$0xff] %v5021_v26  ;;  %v3437_v29 = vpack.c.bf16 %v6750_v30, %v6751_v55  ;;  %v7186_v44 = vand.u32 4294901760, %v7185_v7  ;;  %v7188_v30 = vld [vmem:[#allocation11_spill] sm:$0xff]  ;;  %v7191_v55 = vand.u32 4294901760, %v4904_v48  ;;  %v7194_v13 = vand.u32 4294901760, %v7193_v1 }
 0x12d   :  { %7181 = vst [vmem:[#allocation120_spill] sm:$0xff] %v5026_v40  ;;  %v5051_v50 = vsub.f32 %v7182_v35, %v7183_v57  ;;  %v7189_v15 = vand.u32 4294901760, %v7188_v30  ;;  %v7196_v35 = vld [vmem:[#allocation13_spill] sm:$0xff]  ;;  %3152 = vmatprep.subr.bf16.mxu1 %v3151_v41  ;;  %v677_v10 = vand.u32 4294901760, %v676_v25  ;;  %v7208_v25 = vld [vmem:[#allocation22_spill] sm:$0xff]  ;;  %v7212_v32 = vand.u32 4294901760, %v5016_v3 }
 0x12e   :  { %v5056_v38 = vsub.f32 %v7185_v7, %v7186_v44  ;;  %v3439_v22 = vpack.c.bf16 %v7192_v20, %v7191_v55  ;;  %v5070_v57 = vsub.f32 %v7193_v1, %v7194_v13  ;;  %v7197_v31 = vand.u32 4294901760, %v7196_v35  ;;  %v7199_v44 = vld [vmem:[#allocation24_spill] sm:$0xff]  ;;  %3438 = vmatpush1.bf16.xpose.msra.mxu0 %v3437_v29  ;;  %v7205_v29 = vld [vmem:[#allocation26_spill] sm:$0xff]  ;;  %v7214_v13 = vld [vmem:[#allocation23_spill] sm:$0xff] }
 0x12f   :  { %7184 = vst [vmem:[#allocation12_spill] sm:$0xff] %v5051_v50  ;;  %v5061_v51 = vsub.f32 %v7188_v30, %v7189_v15  ;;  %v7200_v14 = vand.u32 4294901760, %v7199_v44  ;;  %v689_v20 = vand.u32 4294901760, %v688_v12  ;;  %v6766_v55 = vand.u32 4294901760, %v4990_v49 }
 0x130   :  { %7187 = vst [vmem:[#allocation15_spill] sm:$0xff] %v5056_v38  ;;  %7195 = vst [vmem:[#allocation17_spill] sm:$0xff] %v5070_v57  ;;  %v5075_v7 = vsub.f32 %v7196_v35, %v7197_v31  ;;  %3440 = vmatprep.subr.bf16.mxu0 %v3439_v22  ;;  %v695_v1 = vand.u32 4294901760, %v694_v19  ;;  %v707_v15 = vand.u32 4294901760, %v706_v63  ;;  %v7202_v35 = vld [vmem:[#allocation20_spill] sm:$0xff]  ;;  %v7206_v41 = vand.u32 4294901760, %v7205_v29 }
 0x131   :  { %7190 = vst [vmem:[#allocation11_spill] sm:$0xff] %v5061_v51  ;;  %v5080_v30 = vsub.f32 %v7199_v44, %v7200_v14  ;;  %v7203_v48 = vand.u32 4294901760, %v7202_v35  ;;  %v7209_v12 = vand.u32 4294901760, %v7208_v25  ;;  %v6774_v19 = vand.u32 4294901760, %v4932_v6 }
 0x132   :  { %7198 = vst [vmem:[#allocation13_spill] sm:$0xff] %v5075_v7  ;;  %v5094_v22 = vsub.f32 %v7205_v29, %v7206_v41  ;;  %v6773_v63 = vand.u32 4294901760, %v4969_v8  ;;  %v700_v29 = vsub.f32 %v4990_v49, %v6766_v55  ;;  %v7211_v41 = vand.u32 4294901760, %v4995_v9  ;;  %v7295_v8 = vld [vmem:[#allocation59_spill] sm:$0xff] }
 0x133   :  { %7201 = vst [vmem:[#allocation24_spill] sm:$0xff] %v5080_v30  ;;  %v5089_v14 = vsub.f32 %v7202_v35, %v7203_v48  ;;  %v5099_v44 = vsub.f32 %v7208_v25, %v7209_v12  ;;  %v3153_v35 = vpack.c.bf16 %v689_v20, %v677_v10  ;;  %v3155_v31 = vpack.c.bf16 %v707_v15, %v695_v1 }
 0x134   :  { %7207 = vst [vmem:[#allocation26_spill] sm:$0xff] %v5094_v22  ;;  %v712_v25 = vsub.f32 %v4995_v9, %v7211_v41  ;;  %v3441_v12 = vpack.c.bf16 %v6773_v63, %v6774_v19  ;;  %v718_v10 = vsub.f32 %v5016_v3, %v7212_v32  ;;  %v7213_v20 = vand.u32 4294901760, %v5021_v26  ;;  %v7216_v41 = vld [vmem:[#allocation19_spill] sm:$0xff] }
 0x135   :  { %7204 = vst [vmem:[#allocation20_spill] sm:$0xff] %v5089_v14  ;;  %7210 = vst [vmem:[#allocation22_spill] sm:$0xff] %v5099_v44  ;;  %v7215_v55 = vand.u32 4294901760, %v7214_v13  ;;  %v7217_v24 = vand.u32 4294901760, %v7216_v41  ;;  %v7218_v1 = vand.u32 4294901760, %v4612_v5  ;;  %3154 = vmatpush1.bf16.xpose.msra.mxu1 %v3153_v35  ;;  %v7219_v32 = vand.u32 4294901760, %v4974_v43 }
 0x136   :  { %v730_v48 = vsub.f32 %v5021_v26, %v7213_v20  ;;  %v7220_v20 = vand.u32 4294901760, %v4985_v23  ;;  %v7221_v19 = vand.u32 4294901760, %v4622_v18  ;;  %3442 = vmatpush1.bf16.xpose.msra.mxu0 %v3441_v12  ;;  %3156 = vmatprep.subr.bf16.mxu1 %v3155_v31  ;;  %v7226_v12 = vand.u32 4294901760, %v4678_v34 }
 0x137   :  { %v5126_v47 = vsub.f32 %v7214_v13, %v7215_v55  ;;  %v5131_v6 = vsub.f32 %v7216_v41, %v7217_v24  ;;  %v5136_v15 = vsub.f32 %v4612_v5, %v7218_v1  ;;  %v7223_v24 = vand.u32 4294901760, %v5056_v38 }
 0x138   :  { %v3443_v63 = vpack.c.bf16 %v7220_v20, %v7219_v32  ;;  %v5145_v55 = vsub.f32 %v4622_v18, %v7221_v19  ;;  %v7224_v5 = vand.u32 4294901760, %v5061_v51  ;;  %v7225_v1 = vand.u32 4294901760, %v4660_v54 }
 0x139   :  { %v724_v13 = vsub.f32 %v5056_v38, %v7223_v24  ;;  %v701_v18 = vand.u32 4294901760, %v700_v29  ;;  %v713_v19 = vand.u32 4294901760, %v712_v25  ;;  %v5163_v20 = vsub.f32 %v4678_v34, %v7226_v12 }
 0x13a   :  { %7222 = vst [vmem:[#allocation23_spill] sm:$0xff] %v5145_v55  ;;  %v736_v35 = vsub.f32 %v5061_v51, %v7224_v5  ;;  %v5157_v32 = vsub.f32 %v4660_v54, %v7225_v1  ;;  %3444 = vmatprep.subr.bf16.mxu0 %v3443_v63  ;;  %v7227_v24 = vand.u32 4294901760, %v4697_v0  ;;  %v719_v41 = vand.u32 4294901760, %v718_v10 }
 0x13b   :  { %v731_v23 = vand.u32 4294901760, %v730_v48  ;;  %v7228_v54 = vand.u32 4294901760, %v4722_v42  ;;  %v725_v12 = vand.u32 4294901760, %v724_v13  ;;  %v3157_v48 = vpack.c.bf16 %v713_v19, %v701_v18 }
 0x13c   :  { %v5168_v5 = vsub.f32 %v4697_v0, %v7227_v24  ;;  %v737_v31 = vand.u32 4294901760, %v736_v35  ;;  %v7229_v0 = vand.u32 4294901760, %v5080_v30  ;;  %v7231_v25 = vand.u32 4294901760, %v4761_v39 }
 0x13d   :  { %v5173_v63 = vsub.f32 %v4722_v42, %v7228_v54  ;;  %v7230_v54 = vand.u32 4294901760, %v5089_v14  ;;  %v7232_v13 = vand.u32 4294901760, %v5006_v28  ;;  %v7233_v35 = vand.u32 4294901760, %v5011_v61  ;;  %3158 = vmatpush1.bf16.xpose.msra.mxu1 %v3157_v48 }
 0x13e   :  { %v742_v10 = vsub.f32 %v5080_v30, %v7229_v0  ;;  %v5190_v1 = vsub.f32 %v4761_v39, %v7231_v25  ;;  %v3159_v0 = vpack.c.bf16 %v731_v23, %v719_v41  ;;  %v6781_v18 = vand.u32 4294901760, %v5126_v47 }
 0x13f   :  { %v754_v29 = vsub.f32 %v5089_v14, %v7230_v54  ;;  %v3445_v34 = vpack.c.bf16 %v7233_v35, %v7232_v13  ;;  %v7234_v19 = vand.u32 4294901760, %v4777_v62  ;;  %v7235_v54 = vand.u32 4294901760, %v5026_v40  ;;  %v3771_v40 = vld [vmem:[#allocation5 + $0x148] sm:$0xff] }
 0x140   :  { %v7236_v24 = vand.u32 4294901760, %v5051_v50  ;;  %v7237_v25 = vand.u32 4294901760, %v5070_v57  ;;  %v7238_v28 = vand.u32 4294901760, %v5075_v7  ;;  %v6788_v23 = vand.u32 4294901760, %v5094_v22  ;;  %3160 = vmatprep.subr.bf16.mxu1 %v3159_v0  ;;  %v7288_v57 = vld [vmem:[#allocation55_spill] sm:$0xff] }
 0x141   :  { %v5200_v42 = vsub.f32 %v4777_v62, %v7234_v19  ;;  %3446 = vmatpush1.bf16.xpose.msra.mxu0 %v3445_v34  ;;  %v3161_v41 = vpack.c.bf16 %v737_v31, %v725_v12  ;;  %v743_v13 = vand.u32 4294901760, %v742_v10  ;;  %v6787_v62 = vand.u32 4294901760, %v5099_v44 }
 0x142   :  { %v3447_v39 = vpack.c.bf16 %v7236_v24, %v7235_v54  ;;  %v3449_v61 = vpack.c.bf16 %v7238_v28, %v7237_v25  ;;  %v6782_v48 = vand.u32 4294901760, %v5131_v6  ;;  %v755_v35 = vand.u32 4294901760, %v754_v29  ;;  %v7248_v24 = vld [vmem:[#allocation30_spill] sm:$0xff] }
 0x143   :  { %v748_v31 = vsub.f32 %v5126_v47, %v6781_v18  ;;  %v6783_v34 = vand.u32 4294901760, %v5136_v15  ;;  %v6784_v12 = vand.u32 4294901760, %v5145_v55  ;;  %v7239_v18 = vld [vmem:[#allocation25_spill] sm:$0xff]  ;;  %v7249_v7 = vand.u32 4294901760, %v7248_v24 }
 0x144   :  { %3448 = vmatprep.subr.bf16.mxu0 %v3447_v39  ;;  %v760_v25 = vsub.f32 %v5131_v6, %v6782_v48  ;;  %v3163_v28 = vpack.c.bf16 %v755_v35, %v743_v13  ;;  %v7240_v54 = vand.u32 4294901760, %v7239_v18  ;;  %v3451_v13 = vpack.c.bf16 %v6787_v62, %v6788_v23  ;;  %v7242_v35 = vld [vmem:[#allocation21_spill] sm:$0xff] }
 0x145   :  { %v766_v29 = vsub.f32 %v5136_v15, %v6783_v34  ;;  %v778_v10 = vsub.f32 %v5145_v55, %v6784_v12  ;;  %3162 = vmatpush1.bf16.xpose.msra.mxu1 %v3161_v41  ;;  %v7243_v34 = vand.u32 4294901760, %v7242_v35  ;;  %v7245_v12 = vld [vmem:[#allocation34_spill] sm:$0xff]  ;;  %v749_v41 = vand.u32 4294901760, %v748_v31 }
 0x146   :  { %v5262_v19 = vsub.f32 %v7239_v18, %v7240_v54  ;;  %v7246_v39 = vand.u32 4294901760, %v7245_v12  ;;  %v5281_v18 = vsub.f32 %v7248_v24, %v7249_v7  ;;  %3164 = vmatprep.subr.bf16.mxu1 %v3163_v28  ;;  %v761_v54 = vand.u32 4294901760, %v760_v25 }
 0x147   :  { %v5271_v48 = vsub.f32 %v7242_v35, %v7243_v34  ;;  %v6791_v62 = vand.u32 4294901760, %v5157_v32  ;;  %v6792_v34 = vand.u32 4294901760, %v5163_v20  ;;  %v767_v35 = vand.u32 4294901760, %v766_v29 }
 0x148   :  { %7241 = vst [vmem:[#allocation19_spill] sm:$0xff] %v5262_v19  ;;  %v5276_v0 = vsub.f32 %v7245_v12, %v7246_v39  ;;  %7250 = vst [vmem:[#allocation34_spill] sm:$0xff] %v5281_v18  ;;  %v779_v23 = vand.u32 4294901760, %v778_v10  ;;  %v6795_v44 = vand.u32 4294901760, %v5168_v5  ;;  %v6798_v12 = vand.u32 4294901760, %v5173_v63 }
 0x149   :  { %7244 = vst [vmem:[#allocation25_spill] sm:$0xff] %v5271_v48  ;;  %3450 = vmatpush1.bf16.xpose.msra.mxu0 %v3449_v61  ;;  %v6794_v39 = vand.u32 4294901760, %v5262_v19  ;;  %v6793_v7 = vand.u32 4294901760, %v5271_v48  ;;  %v3165_v24 = vpack.c.bf16 %v761_v54, %v749_v41  ;;  %v772_v31 = vsub.f32 %v5157_v32, %v6791_v62  ;;  %v7251_v54 = vld [vmem:[#allocation27_spill] sm:$0xff]  ;;  %v7261_v19 = vld [vmem:[#allocation88_spill] sm:$0xff] }
 0x14a   :  { %7247 = vst [vmem:[#allocation21_spill] sm:$0xff] %v5276_v0  ;;  %3452 = vmatprep.subr.bf16.mxu0 %v3451_v13  ;;  %v6803_v61 = vand.u32 4294901760, %v5276_v0  ;;  %v784_v29 = vsub.f32 %v5163_v20, %v6792_v34  ;;  %v3167_v25 = vpack.c.bf16 %v779_v23, %v767_v35  ;;  %v790_v13 = vsub.f32 %v5168_v5, %v6795_v44  ;;  %v7255_v23 = vld [vmem:[#allocation29_spill] sm:$0xff]  ;;  %v7258_v44 = vld [vmem:[#allocation87_spill] sm:$0xff] }
 0x14b   :  { %v3453_v10 = vpack.c.bf16 %v6793_v7, %v6794_v39  ;;  %v802_v41 = vsub.f32 %v5173_v63, %v6798_v12  ;;  %v7252_v62 = vand.u32 4294901760, %v7251_v54  ;;  %v7254_v34 = vand.u32 4294901760, %v5281_v18 }
 0x14c   :  { %v7256_v35 = vand.u32 4294901760, %v7255_v23  ;;  %v7259_v48 = vand.u32 4294901760, %v7258_v44  ;;  %v7262_v22 = vand.u32 4294901760, %v7261_v19 }
 0x14d   :  { %v5310_v28 = vsub.f32 %v7251_v54, %v7252_v62  ;;  %3166 = vmatpush1.bf16.xpose.msra.mxu1 %v3165_v24  ;;  %v3455_v7 = vpack.c.bf16 %v7254_v34, %v6803_v61  ;;  %v773_v24 = vand.u32 4294901760, %v772_v31  ;;  %v785_v34 = vand.u32 4294901760, %v784_v29 }
 0x14e   :  { %v5319_v39 = vsub.f32 %v7255_v23, %v7256_v35  ;;  %v5324_v12 = vsub.f32 %v7258_v44, %v7259_v48  ;;  %v5329_v62 = vsub.f32 %v7261_v19, %v7262_v22  ;;  %3168 = vmatprep.subr.bf16.mxu1 %v3167_v25  ;;  %v6815_v54 = vand.u32 4294901760, %v5190_v1 }
 0x14f   :  { %7253 = vst [vmem:[#allocation30_spill] sm:$0xff] %v5310_v28  ;;  %v6814_v23 = vand.u32 4294901760, %v5200_v42  ;;  %v791_v35 = vand.u32 4294901760, %v790_v13  ;;  %v803_v61 = vand.u32 4294901760, %v802_v41  ;;  %v6813_v18 = vand.u32 4294901760, %v5310_v28 }
 0x150   :  { %7257 = vst [vmem:[#allocation27_spill] sm:$0xff] %v5319_v39  ;;  %7260 = vst [vmem:[#allocation29_spill] sm:$0xff] %v5324_v12  ;;  %v6812_v44 = vand.u32 4294901760, %v5319_v39  ;;  %v6811_v48 = vand.u32 4294901760, %v5324_v12  ;;  %v3169_v0 = vpack.c.bf16 %v785_v34, %v773_v24  ;;  %v6808_v22 = vand.u32 4294901760, %v5329_v62  ;;  %v3766_v39 = vld [vmem:[#allocation5 + $0xb0] sm:$0xff] }
 0x151   :  { %7263 = vst [vmem:[#allocation87_spill] sm:$0xff] %v5329_v62  ;;  %3454 = vmatpush1.bf16.xpose.msra.mxu0 %v3453_v10  ;;  %v796_v19 = vsub.f32 %v5190_v1, %v6815_v54  ;;  %v3171_v29 = vpack.c.bf16 %v803_v61, %v791_v35  ;;  %v7264_v25 = vand.u32 4294901760, %v4781_v16  ;;  %v7266_v41 = vand.u32 4294901760, %v4819_v53  ;;  %v7282_v54 = vld [vmem:[#allocation46_spill] sm:$0xff] }
 0x152   :  { %3456 = vmatprep.subr.bf16.mxu0 %v3455_v7  ;;  %v808_v7 = vsub.f32 %v5200_v42, %v6814_v23  ;;  %v3457_v31 = vpack.c.bf16 %v6812_v44, %v6813_v18  ;;  %v3459_v10 = vpack.c.bf16 %v6808_v22, %v6811_v48  ;;  %v7280_v44 = vld [vmem:[#allocation42_spill] sm:$0xff] }
 0x153   :  { %v5354_v13 = vsub.f32 %v4781_v16, %v7264_v25  ;;  %v5359_v24 = vsub.f32 %v4819_v53, %v7266_v41  ;;  %v797_v61 = vand.u32 4294901760, %v796_v19  ;;  %v7268_v53 = vpack.c.bf16 %v4747_v11, %v4687_v56  ;;  %v7270_v19 = vld [vmem:[#allocation14_spill] sm:$0xff]  ;;  %v3759_v25 = vld [vmem:[#allocation5 + $0x28] sm:$0xff]  ;;  %v7275_v41 = vld [vmem:[#allocation45_spill] sm:$0xff] }
 0x154   :  { %v3762_v18 = vld [vmem:[#allocation5 + $0x20] sm:$0xff]  ;;  %v3778_v11 = vld [vmem:[#allocation5 + $0x1d0] sm:$0xff]  ;;  %v3779_v56 = vld [vmem:[#allocation5 + $0x208] sm:$0xff] }
 0x155   :  { %3170 = vmatpush1.bf16.xpose.msra.mxu1 %v3169_v0  ;;  %7265 = vst [vmem:[#allocation88_spill] sm:$0xff] %v5354_v13  ;;  %7267 = vst [vmem:[#allocation121_spill] sm:$0xff] %v5359_v24  ;;  %v809_v0 = vand.u32 4294901760, %v808_v7  ;;  %v6810_v34 = vand.u32 4294901760, %v5354_v13  ;;  %v6809_v35 = vand.u32 4294901760, %v5359_v24  ;;  %v7271_v7 = vpack.c.bf16 %v4791_v21, %v4727_v4  ;;  %v3765_v13 = vld [vmem:[#allocation5 + $0x80] sm:$0xff] }
 0x156   :  { %3172 = vmatprep.subr.bf16.mxu1 %v3171_v29  ;;  %v7272_v29 = vld [vmem:[#allocation28_spill] sm:$0xff]  ;;  %v3769_v62 = vld [vmem:[#allocation5 + $0xe0] sm:$0xff] }
 0x157   :  { %v3173_v22 = vpack.c.bf16 %v809_v0, %v797_v61  ;;  %v3461_v16 = vpack.c.bf16 %v6809_v35, %v6810_v34  ;;  %v5381_v61 = vmul.f32 %v3759_v25, %v7275_v41  ;;  %v3760_v0 = vld [vmem:[#allocation5 + $0x88] sm:$0xff]  ;;  %v7278_v35 = vld [vmem:[#allocation54_spill] sm:$0xff]  ;;  %v3761_v34 = vld [vmem:[#allocation5 + $0x58] sm:$0xff] }
 0x158   :  { %v3763_v25 = vld [vmem:[#allocation5 + $0x50] sm:$0xff] }
 0x159   :  { %3458 = vmatpush1.bf16.xpose.msra.mxu0 %v3457_v31  ;;  %v7269_v31 = vld [vmem:[#allocation50_spill] sm:$0xff] }
 0x15a   :  { %3460 = vmatprep.subr.bf16.mxu0 %v3459_v10  ;;  %v7273_v10 = vld [vmem:[#allocation52_spill] sm:$0xff] }
 0x15d   :  { %3174 = vmatpush1.bf16.xpose.msra.mxu1 %v3173_v22  ;;  %v7274_v22 = vpack.c.bf16 %v4796_v52, %v4716_v27  ;;  %v7320_v27 = vld [vmem:[#allocation16_spill] sm:$0xff] }
 0x15e   :  { %3176 = vmatprep.subr.bf16.mxu1 %v7268_v53 }
 0x161   :  { %3462 = vmatpush1.bf16.xpose.msra.mxu0 %v3461_v16  ;;  %v7276_v16 = vld [vmem:[#allocation44_spill] sm:$0xff] }
 0x162   :  { %3464 = vmatprep.subr.bf16.mxu0 %v7269_v31  ;;  %v5384_v53 = vmul.f32 %v3760_v0, %v7276_v16  ;;  %v3764_v0 = vld [vmem:[#allocation5 + $0xb8] sm:$0xff]  ;;  %v3774_v31 = vld [vmem:[#allocation5 + $0x170] sm:$0xff] }
 0x163   :  { %v5399_v24 = vmul.f32 %v3764_v0, %v7282_v54  ;;  %v3768_v0 = vld [vmem:[#allocation5 + $0x118] sm:$0xff] }
 0x164   :  { %846 = vmatmul.mubr.f32.vlgmr.msra.gmra.mrb[0].mxu1 %v7270_v19  ;;  %7277 = vst [vmem:[#allocation45_spill] sm:$0xff] %v5384_v53  ;;  %v5414_v50 = vmul.f32 %v3768_v0, %v7288_v57  ;;  %v7300_v0 = vand.u32 4294901760, %v5384_v53 }
 0x165   :  { %3178 = vmatpush1.bf16.xpose.msra.mxu1 %v7271_v7  ;;  %v7279_v7 = vld [vmem:[#allocation47_spill] sm:$0xff]  ;;  %981 = vmatprep.mubr.f32.mxu1 %v7280_v44  ;;  %v7337_v44 = vld [vmem:[#allocation78_spill] sm:$0xff] }
 0x166   :  { %3180 = vmatprep.subr.bf16.mxu1 %v7274_v22  ;;  %v5388_v48 = vmul.f32 %v3761_v34, %v7279_v7  ;;  %v5393_v22 = vmul.f32 %v3762_v18, %v7275_v41  ;;  %v5396_v23 = vmul.f32 %v3763_v25, %v7279_v7  ;;  %7283 = vst [vmem:[#allocation47_spill] sm:$0xff] %v5399_v24  ;;  %v3767_v7 = vld [vmem:[#allocation5 + $0xe8] sm:$0xff]  ;;  %v7286_v25 = vld [vmem:[#allocation53_spill] sm:$0xff]  ;;  %7289 = vst [vmem:[#allocation55_spill] sm:$0xff] %v5414_v50 }
 0x167   :  { %v5402_v34 = vmul.f32 %v3765_v13, %v7276_v16  ;;  %v5407_v18 = vmul.f32 %v3766_v39, %v7282_v54  ;;  %v5411_v28 = vmul.f32 %v3767_v7, %v7286_v25  ;;  %v5419_v12 = vmul.f32 %v3769_v62, %v7286_v25  ;;  %v3770_v39 = vld [vmem:[#allocation5 + $0x110] sm:$0xff]  ;;  %v3772_v16 = vld [vmem:[#allocation5 + $0x178] sm:$0xff] }
 0x168   :  { %2122 = vmatmul.mubr.f32.vlgmr.msra.gmra.mrb[0].mxu0 %v7272_v29  ;;  %7281 = vst [vmem:[#allocation44_spill] sm:$0xff] %v5396_v23  ;;  %v5422_v54 = vmul.f32 %v3770_v39, %v7288_v57  ;;  %v7292_v7 = vpack.c.bf16 %v4855_v33, %v4837_v36  ;;  %v7293_v13 = vld [vmem:[#allocation60_spill] sm:$0xff]  ;;  %v5433_v62 = vmul.f32 %v3772_v16, %v7295_v8  ;;  %v7297_v25 = vld [vmem:[#allocation57_spill] sm:$0xff]  ;;  %v7299_v39 = vand.u32 4294901760, %v5381_v61  ;;  %v3773_v16 = vld [vmem:[#allocation5 + $0x140] sm:$0xff] }
 0x169   :  { %3466 = vmatpush1.bf16.xpose.msra.mxu0 %v7273_v10  ;;  %2224 = vmatprep.mubr.f32.mxu0 %v4176_v17  ;;  %7284 = vst [vmem:[#allocation46_spill] sm:$0xff] %v5402_v34  ;;  %7285 = vst [vmem:[#allocation122_spill] sm:$0xff] %v5407_v18  ;;  %v5430_v43 = vmul.f32 %v3771_v40, %v7293_v13  ;;  %v7298_v57 = vpack.c.bf16 %v4879_v46, %v4874_v45  ;;  %v7306_v41 = vand.u32 4294901760, %v5393_v22  ;;  %v7310_v46 = vld [vmem:[#allocation65_spill] sm:$0xff]  ;;  %v3790_v29 = vld [vmem:[#allocation5 + $0x2f0] sm:$0xff] }
 0x16a   :  { %3468 = vmatprep.subr.bf16.mxu0 %v7278_v35  ;;  %7287 = vst [vmem:[#allocation53_spill] sm:$0xff] %v5411_v28  ;;  %7290 = vst [vmem:[#allocation123_spill] sm:$0xff] %v5419_v12  ;;  %v5447_v40 = vsub.f32 %v5384_v53, %v7300_v0  ;;  %v5451_v17 = vmul.f32 %v3773_v16, %v7293_v13  ;;  %v5462_v0 = vmul.f32 %v3774_v31, %v7295_v8  ;;  %v3776_v36 = vld [vmem:[#allocation5 + $0x1d8] sm:$0xff]  ;;  %v7314_v8 = vld [vmem:[#allocation64_spill] sm:$0xff] }
 0x16b   :  { %7291 = vst [vmem:[#allocation124_spill] sm:$0xff] %v5422_v54  ;;  %7294 = vst [vmem:[#allocation60_spill] sm:$0xff] %v5430_v43  ;;  %v5467_v13 = vsub.f32 %v5393_v22, %v7306_v41  ;;  %v7307_v16 = vand.u32 4294901760, %v5396_v23  ;;  %v7308_v10 = vand.u32 4294901760, %v5399_v24  ;;  %v3775_v41 = vld [vmem:[#allocation5 + $0x1a8] sm:$0xff]  ;;  %v5498_v59 = vmul.f32 %v3776_v36, %v7314_v8 }
 0x16c   :  { %7296 = vst [vmem:[#allocation59_spill] sm:$0xff] %v5433_v62  ;;  %7301 = vst [vmem:[#allocation125_spill] sm:$0xff] %v5447_v40  ;;  %v5484_v45 = vmul.f32 %v3775_v41, %v7310_v46  ;;  %v7315_v31 = vand.u32 4294901760, %v5411_v28  ;;  %v7316_v52 = vand.u32 4294901760, %v5414_v50  ;;  %v7319_v4 = vand.u32 4294901760, %v5422_v54 }
 0x16d   :  { %3182 = vmatpush1.bf16.xpose.msra.mxu1 %v7292_v7  ;;  %v5442_v7 = vsub.f32 %v5381_v61, %v7299_v39  ;;  %7302 = vst [vmem:[#allocation126_spill] sm:$0xff] %v5451_v17  ;;  %7305 = vst [vmem:[#allocation127_spill] sm:$0xff] %v5462_v0  ;;  %v5479_v19 = vsub.f32 %v5399_v24, %v7308_v10  ;;  %v7313_v39 = vand.u32 4294901760, %v5407_v18  ;;  %v7318_v10 = vand.u32 4294901760, %v5419_v12  ;;  %v7338_v24 = vld [vmem:[#allocation31_spill] sm:$0xff] }
 0x16e   :  { %3184 = vmatprep.subr.bf16.mxu1 %v7298_v57  ;;  %v7304_v57 = vand.u32 4294901760, %v5388_v48  ;;  %7311 = vst [vmem:[#allocation65_spill] sm:$0xff] %v5484_v45  ;;  %v5503_v41 = vsub.f32 %v5411_v28, %v7315_v31  ;;  %v5522_v31 = vsub.f32 %v5422_v54, %v7319_v4  ;;  %v7323_v4 = vand.u32 4294901760, %v5433_v62  ;;  %v7325_v28 = vld [vmem:[#allocation63_spill] sm:$0xff] }
 0x16f   :  { %7309 = vst [vmem:[#allocation128_spill] sm:$0xff] %v5479_v19  ;;  %v5517_v36 = vsub.f32 %v5419_v12, %v7318_v10  ;;  %v7322_v10 = vand.u32 4294901760, %v5430_v43  ;;  %v7324_v12 = vld [vmem:[#allocation69_spill] sm:$0xff] }
 0x170   :  { %v5457_v35 = vsub.f32 %v5388_v48, %v7304_v57  ;;  %v5494_v57 = vsub.f32 %v5407_v18, %v7313_v39  ;;  %v3777_v39 = vld [vmem:[#allocation5 + $0x1a0] sm:$0xff]  ;;  %v5541_v54 = vsub.f32 %v5433_v62, %v7323_v4  ;;  %v3782_v62 = vld [vmem:[#allocation5 + $0x230] sm:$0xff] }
 0x171   :  { %3470 = vmatpush1.bf16.xpose.msra.mxu0 %v7297_v25  ;;  %v7303_v25 = vld [vmem:[#allocation61_spill] sm:$0xff]  ;;  %v5512_v21 = vmul.f32 %v3777_v39, %v7310_v46  ;;  %v7321_v46 = vpack.c.bf16 %v4927_v58, %v4918_v60  ;;  %v5536_v39 = vsub.f32 %v5430_v43, %v7322_v10  ;;  %v7327_v10 = vand.u32 4294901760, %v5451_v17  ;;  %v3781_v60 = vld [vmem:[#allocation5 + $0x200] sm:$0xff] }
 0x172   :  { %3472 = vmatprep.subr.bf16.mxu0 %v7303_v25  ;;  %v5472_v25 = vsub.f32 %v5396_v23, %v7307_v16  ;;  %v7312_v16 = vand.u32 4294901760, %v5402_v34  ;;  %v3784_v43 = vld [vmem:[#allocation5 + $0x298] sm:$0xff] }
 0x173   :  { %7317 = vst [vmem:[#allocation64_spill] sm:$0xff] %v5512_v21  ;;  %v5554_v58 = vsub.f32 %v5451_v17, %v7327_v10  ;;  %v7330_v17 = vld [vmem:[#allocation74_spill] sm:$0xff]  ;;  %v7336_v10 = vand.u32 4294901760, %v5484_v45 }
 0x174   :  { %v5489_v33 = vsub.f32 %v5402_v34, %v7312_v16  ;;  %v5508_v16 = vsub.f32 %v5414_v50, %v7316_v52  ;;  %v5525_v52 = vmul.f32 %v3778_v11, %v7314_v8  ;;  %v5528_v50 = vmul.f32 %v3779_v56, %v7320_v27  ;;  %v3780_v8 = vld [vmem:[#allocation5 + $0x238] sm:$0xff]  ;;  %v3787_v34 = vld [vmem:[#allocation5 + $0x2c8] sm:$0xff] }
 0x175   :  { %3186 = vmatpush1.bf16.xpose.msra.mxu1 %v7321_v46  ;;  %v5545_v56 = vmul.f32 %v3780_v8, %v7324_v12  ;;  %v7326_v46 = vpack.c.bf16 %v4943_v2, %v4938_v37  ;;  %v5558_v11 = vmul.f32 %v3781_v60, %v7320_v27  ;;  %v5561_v8 = vmul.f32 %v3782_v62, %v7324_v12  ;;  %v3783_v37 = vld [vmem:[#allocation5 + $0x268] sm:$0xff]  ;;  %v7332_v27 = vld [vmem:[#allocation76_spill] sm:$0xff]  ;;  %v3788_v62 = vld [vmem:[#allocation5 + $0x2f8] sm:$0xff] }
 0x176   :  { %v7329_v2 = vand.u32 4294901760, %v5462_v0  ;;  %v5571_v4 = vmul.f32 %v3783_v37, %v7330_v17  ;;  %v5574_v60 = vmul.f32 %v3784_v43, %v7332_v27  ;;  %v5587_v37 = vsub.f32 %v5484_v45, %v7336_v10 }
 0x177   :  { %3188 = vmatprep.subr.bf16.mxu1 %v7326_v46  ;;  %v5591_v12 = vmul.f32 %v3787_v34, %v7337_v44  ;;  %v5594_v53 = vmul.f32 %v3788_v62, %v7338_v24  ;;  %v5609_v62 = vmul.f32 %v3790_v29, %v7338_v24  ;;  %v7345_v34 = vand.u32 4294901760, %v5173_v63 }
 0x178   :  { %v5567_v46 = vsub.f32 %v5462_v0, %v7329_v2  ;;  %7331 = vst [vmem:[#allocation16_spill] sm:$0xff] %v5571_v4  ;;  %7333 = vst [vmem:[#allocation69_spill] sm:$0xff] %v5574_v60  ;;  %v3786_v2 = vld [vmem:[#allocation5 + $0x290] sm:$0xff]  ;;  %v7347_v24 = vpack.c.bf16 %v4995_v9, %v4990_v49  ;;  %v7348_v29 = vand.u32 4294901760, %v5525_v52 }
 0x179   :  { %3474 = vmatpush1.bf16.xpose.msra.mxu0 %v7325_v28  ;;  %v7328_v28 = vld [vmem:[#allocation67_spill] sm:$0xff]  ;;  %v5582_v0 = vmul.f32 %v3786_v2, %v7332_v27  ;;  %7339 = vst [vmem:[#allocation78_spill] sm:$0xff] %v5594_v53  ;;  %v3789_v2 = vld [vmem:[#allocation5 + $0x2c0] sm:$0xff]  ;;  %7342 = vst [vmem:[#allocation129_spill] sm:$0xff] %v5609_v62 }
 0x17a   :  { %3476 = vmatprep.subr.bf16.mxu0 %v7328_v28  ;;  %v3785_v28 = vld [vmem:[#allocation5 + $0x260] sm:$0xff]  ;;  %v5604_v43 = vmul.f32 %v3789_v2, %v7337_v44  ;;  %v7344_v2 = vand.u32 4294901760, %v5168_v5  ;;  %v5631_v23 = vsub.f32 %v5525_v52, %v7348_v29  ;;  %v7360_v44 = vand.u32 4294901760, %v5574_v60 }
 0x17b   :  { %v5579_v18 = vmul.f32 %v3785_v28, %v7330_v17  ;;  %7335 = vst [vmem:[#allocation76_spill] sm:$0xff] %v5582_v0  ;;  %v7340_v17 = vand.u32 4294901760, %v5498_v59 }
 0x17c   :  { %7341 = vst [vmem:[#allocation31_spill] sm:$0xff] %v5604_v43  ;;  %v5623_v45 = vpack.c.bf16 %v7345_v34, %v7344_v2  ;;  %v7350_v34 = vld [vmem:[#allocation18_spill] sm:$0xff]  ;;  %v7351_v2 = vpack.c.bf16 %v5021_v26, %v5016_v3  ;;  %v7357_v26 = vld [vmem:[#allocation71_spill] sm:$0xff]  ;;  %v7359_v3 = vand.u32 4294901760, %v5571_v4  ;;  %v5675_v49 = vsub.f32 %v5574_v60, %v7360_v44 }
 0x17d   :  { %7334 = vst [vmem:[#allocation74_spill] sm:$0xff] %v5579_v18  ;;  %v5599_v28 = vsub.f32 %v5498_v59, %v7340_v17  ;;  %v7343_v17 = vand.u32 4294901760, %v5512_v21  ;;  %3190 = vmatpush1.bf16.xpose.msra.mxu1 %v7347_v24  ;;  %v7352_v24 = vand.u32 4294901760, %v5545_v56  ;;  %v7363_v44 = vand.u32 4294901760, %v5591_v12 }
 0x17e   :  { %7346 = vst [vmem:[#allocation130_spill] sm:$0xff] %v5623_v45  ;;  %3192 = vmatprep.subr.bf16.mxu1 %v7351_v2  ;;  %v7353_v45 = vand.u32 4294901760, %v5558_v11  ;;  %v7358_v2 = vand.u32 4294901760, %v5561_v8  ;;  %v7364_v60 = vand.u32 4294901760, %v5594_v53 }
 0x17f   :  { %v5615_v27 = vsub.f32 %v5512_v21, %v7343_v17  ;;  %v7349_v17 = vand.u32 4294901760, %v5528_v50  ;;  %v5647_v29 = vsub.f32 %v5545_v56, %v7352_v24  ;;  %v7354_v21 = vand.u32 4294901760, %v5190_v1 }
 0x180   :  { %v5665_v24 = vsub.f32 %v5561_v8, %v7358_v2  ;;  %v7362_v2 = vand.u32 4294901760, %v5582_v0 }
 0x181   :  { %v5636_v10 = vsub.f32 %v5528_v50, %v7349_v17  ;;  %3478 = vmatpush1.bf16.xpose.msra.mxu0 %v7350_v34  ;;  %v5652_v17 = vsub.f32 %v5558_v11, %v7353_v45  ;;  %v7355_v34 = vand.u32 4294901760, %v5200_v42  ;;  %v5670_v45 = vsub.f32 %v5571_v4, %v7359_v3 }
 0x182   :  { %3480 = vmatprep.subr.bf16.mxu0 %v7357_v26  ;;  %v7365_v3 = vand.u32 4294901760, %v5604_v43  ;;  %v7371_v4 = vand.u32 4294901760, %v5442_v7 }
 0x183   :  { %v5659_v9 = vpack.c.bf16 %v7355_v34, %v7354_v21  ;;  %v7361_v34 = vand.u32 4294901760, %v5579_v18  ;;  %v5695_v21 = vsub.f32 %v5591_v12, %v7363_v44 }
 0x185   :  { %7356 = vst [vmem:[#allocation131_spill] sm:$0xff] %v5659_v9  ;;  %v5681_v26 = vsub.f32 %v5579_v18, %v7361_v34  ;;  %v5686_v9 = vsub.f32 %v5582_v0, %v7362_v2  ;;  %v5700_v34 = vsub.f32 %v5594_v53, %v7364_v60  ;;  %v5708_v0 = vsub.f32 %v5604_v43, %v7365_v3  ;;  %v7370_v60 = vld [vmem:[#allocation32_spill] sm:$0xff] }
 0x186   :  { %v7366_v53 = vand.u32 4294901760, %v5609_v62  ;;  %v7367_v2 = vpack.c.bf16 %v5061_v51, %v5056_v38  ;;  %v6886_v3 = vand.u32 4294901760, %v5447_v40  ;;  %v6885_v43 = vand.u32 4294901760, %v5479_v19 }
 0x187   :  { %v7372_v51 = vand.u32 4294901760, %v5457_v35  ;;  %v6890_v38 = vand.u32 4294901760, %v5503_v41 }
 0x188   :  { %v5719_v18 = vsub.f32 %v5609_v62, %v7366_v53  ;;  %3194 = vmatpush1.bf16.xpose.msra.mxu1 %v7367_v2  ;;  %v7368_v62 = vld [vmem:[#allocation75_spill] sm:$0xff]  ;;  %v7369_v53 = vpack.c.bf16 %v5089_v14, %v5080_v30  ;;  %v7375_v14 = vand.u32 4294901760, %v5472_v25  ;;  %v6888_v2 = vand.u32 4294901760, %v5489_v33 }
 0x189   :  { %3482 = vmatpush1.bf16.xpose.msra.mxu0 %v7368_v62  ;;  %v5757_v44 = vpack.c.bf16 %v7372_v51, %v7371_v4  ;;  %v7374_v62 = vand.u32 4294901760, %v5467_v13  ;;  %v5771_v30 = vpack.c.bf16 %v6885_v43, %v6886_v3  ;;  %v6889_v51 = vand.u32 4294901760, %v5508_v16 }
 0x18a   :  { %3196 = vmatprep.subr.bf16.mxu1 %v7369_v53  ;;  %3484 = vmatprep.subr.bf16.mxu0 %v7370_v60  ;;  %v6887_v60 = vand.u32 4294901760, %v5494_v57  ;;  %v6891_v4 = vand.u32 4294901760, %v5517_v36  ;;  %v7380_v43 = vpack.c.bf16 %v5131_v6, %v5126_v47  ;;  %v6893_v3 = vand.u32 4294901760, %v5567_v46 }
 0x18b   :  { %7373 = vst [vmem:[#allocation132_spill] sm:$0xff] %v5757_v44  ;;  %v5763_v53 = vpack.c.bf16 %v7375_v14, %v7374_v62  ;;  %7377 = vst [vmem:[#allocation134_spill] sm:$0xff] %v5771_v30  ;;  %v5787_v62 = vpack.c.bf16 %v6889_v51, %v6890_v38  ;;  %v7381_v30 = vand.u32 4294901760, %v5522_v31  ;;  %v7384_v51 = vpack.c.bf16 %v5145_v55, %v5136_v15  ;;  %v7385_v38 = vld [vmem:[#allocation84_spill] sm:$0xff] }
 0x18c   :  { %v5781_v14 = vpack.c.bf16 %v6887_v60, %v6888_v2  ;;  %v7383_v2 = vld [vmem:[#allocation80_spill] sm:$0xff]  ;;  %v7386_v44 = vand.u32 4294901760, %v5536_v39 }
 0x18d   :  { %7376 = vst [vmem:[#allocation133_spill] sm:$0xff] %v5763_v53  ;;  %7379 = vst [vmem:[#allocation136_spill] sm:$0xff] %v5787_v62  ;;  %v5798_v60 = vpack.c.bf16 %v7381_v30, %v6891_v4  ;;  %v7387_v62 = vand.u32 4294901760, %v5541_v54  ;;  %v6895_v30 = vand.u32 4294901760, %v5587_v37  ;;  %v6894_v4 = vand.u32 4294901760, %v5599_v28 }
 0x18e   :  { %7378 = vst [vmem:[#allocation135_spill] sm:$0xff] %v5781_v14  ;;  %v6897_v53 = vand.u32 4294901760, %v5631_v23 }
 0x18f   :  { %7382 = vst [vmem:[#allocation137_spill] sm:$0xff] %v5798_v60  ;;  %v5811_v14 = vpack.c.bf16 %v7387_v62, %v7386_v44  ;;  %v5815_v60 = vld [vmem:[#allocation2 + $0x28] sm:$0xff]  ;;  %v5829_v44 = vpack.c.bf16 %v6894_v4, %v6895_v30  ;;  %v6900_v62 = vand.u32 4294901760, %v5636_v10  ;;  %v6904_v30 = vand.u32 4294901760, %v5681_v26 }
 0x190   :  { %3198 = vmatpush1.bf16.xpose.msra.mxu1 %v7380_v43  ;;  %v6896_v43 = vand.u32 4294901760, %v5554_v58  ;;  %7389 = vst [vmem:[#allocation139_spill] sm:$0xff] %v5815_v60  ;;  %v5840_v55 = vand.u32 4294901760, %v5815_v60  ;;  %v6905_v4 = vand.u32 4294901760, %v5700_v34 }
 0x191   :  { %3486 = vmatpush1.bf16.xpose.msra.mxu0 %v7383_v2  ;;  %3200 = vmatprep.subr.bf16.mxu1 %v7384_v51  ;;  %7388 = vst [vmem:[#allocation138_spill] sm:$0xff] %v5811_v14  ;;  %v6898_v51 = vand.u32 4294901760, %v5615_v27  ;;  %7391 = vst [vmem:[#allocation141_spill] sm:$0xff] %v5829_v44  ;;  %v6899_v14 = vand.u32 4294901760, %v5647_v29  ;;  %v7395_v44 = vld [vmem:[#allocation90_spill] sm:$0xff] }
 0x192   :  { %3488 = vmatprep.subr.bf16.mxu0 %v7385_v38  ;;  %v5823_v38 = vpack.c.bf16 %v6893_v3, %v6896_v43  ;;  %v7393_v3 = vpack.c.bf16 %v5163_v20, %v5157_v32 }
 0x193   :  { %v5837_v2 = vpack.c.bf16 %v6897_v53, %v6898_v51  ;;  %v5851_v43 = vpack.c.bf16 %v6899_v14, %v6900_v62  ;;  %v7396_v53 = vpack.c.bf16 %v5173_v63, %v5168_v5  ;;  %v6902_v51 = vand.u32 4294901760, %v5670_v45 }
 0x194   :  { %7390 = vst [vmem:[#allocation140_spill] sm:$0xff] %v5823_v38  ;;  %v7398_v38 = vand.u32 4294901760, %v5652_v17  ;;  %v7399_v14 = vand.u32 4294901760, %v5665_v24  ;;  %v5870_v5 = vsub.f32 %v5815_v60, %v5840_v55  ;;  %v7407_v60 = vand.u32 4294901760, %v5381_v61  ;;  %v7415_v61 = vld [vmem:[#allocation44_spill] sm:$0xff] }
 0x195   :  { %7392 = vst [vmem:[#allocation142_spill] sm:$0xff] %v5837_v2  ;;  %7394 = vst [vmem:[#allocation143_spill] sm:$0xff] %v5851_v43  ;;  %v7397_v2 = vld [vmem:[#allocation93_spill] sm:$0xff]  ;;  %v7403_v43 = vand.u32 4294901760, %v5686_v9 }
 0x196   :  { %v5866_v62 = vpack.c.bf16 %v7399_v14, %v7398_v38  ;;  %7401 = vst [vmem:[#allocation145_spill] sm:$0xff] %v5870_v5  ;;  %v6908_v14 = vand.u32 4294901760, %v5708_v0 }
 0x197   :  { %v5884_v38 = vpack.c.bf16 %v7403_v43, %v6904_v30  ;;  %v7408_v43 = vand.u32 4294901760, %v5388_v48  ;;  %v7414_v48 = vand.u32 4294901760, %v5393_v22  ;;  %v7426_v22 = vld [vmem:[#allocation42_spill] sm:$0xff] }
 0x198   :  { %3202 = vmatpush1.bf16.xpose.msra.mxu1 %v7393_v3  ;;  %v6901_v3 = vand.u32 4294901760, %v5675_v49  ;;  %7400 = vst [vmem:[#allocation144_spill] sm:$0xff] %v5866_v62  ;;  %v6907_v62 = vand.u32 4294901760, %v5719_v18 }
 0x199   :  { %3490 = vmatpush1.bf16.xpose.msra.mxu0 %v7395_v44  ;;  %3204 = vmatprep.subr.bf16.mxu1 %v7396_v53  ;;  %v6906_v53 = vand.u32 4294901760, %v5695_v21  ;;  %7404 = vst [vmem:[#allocation147_spill] sm:$0xff] %v5884_v38  ;;  %v5902_v30 = vpack.c.bf16 %v7408_v43, %v7407_v60  ;;  %v7416_v60 = vand.u32 4294901760, %v7415_v61 }
 0x19a   :  { %3492 = vmatprep.subr.bf16.mxu0 %v7397_v2  ;;  %v5876_v63 = vpack.c.bf16 %v6901_v3, %v6902_v51  ;;  %v6909_v51 = vand.u32 4294901760, %v5870_v5  ;;  %v5908_v38 = vpack.c.bf16 %v6907_v62, %v6908_v14  ;;  %v7418_v62 = vld [vmem:[#allocation51_spill] sm:$0xff]  ;;  %v7419_v14 = vld [vmem:[#allocation28_spill] sm:$0xff] }
 0x19b   :  { %v5892_v3 = vpack.c.bf16 %v6905_v4, %v6906_v53  ;;  %7409 = vst [vmem:[#allocation149_spill] sm:$0xff] %v5902_v30  ;;  %v7411_v4 = vld [vmem:[#allocation100_spill] sm:$0xff]  ;;  %v7412_v53 = vld [vmem:[#allocation49_spill] sm:$0xff] }
 0x19c   :  { %7402 = vst [vmem:[#allocation146_spill] sm:$0xff] %v5876_v63  ;;  %v7406_v63 = vpack.c.bf16 %v5200_v42, %v5190_v1  ;;  %7410 = vst [vmem:[#allocation150_spill] sm:$0xff] %v5908_v38  ;;  %v2330_v1 = vsub.f32 %v5870_v5, %v6909_v51  ;;  %v7413_v42 = vld [vmem:[#allocation72_spill] sm:$0xff]  ;;  %v7420_v38 = vld [vmem:[#allocation45_spill] sm:$0xff] }
 0x19d   :  { %7405 = vst [vmem:[#allocation148_spill] sm:$0xff] %v5892_v3  ;;  %v7421_v3 = vand.u32 4294901760, %v7420_v38  ;;  %v7425_v51 = vld [vmem:[#allocation48_spill] sm:$0xff] }
 0x19e   :  { %v2331_v43 = vand.u32 4294901760, %v2330_v1  ;;  %v7428_v1 = vld [vmem:[#allocation46_spill] sm:$0xff]  ;;  %v7433_v38 = vld [vmem:[#allocation56_spill] sm:$0xff] }
 0x19f   :  { %v7429_v61 = vand.u32 4294901760, %v7428_v1 }
 0x1a0   :  { %3206 = vmatpush1.bf16.xpose.msra.mxu1 %v7406_v63  ;;  %v5921_v63 = vpack.c.bf16 %v7416_v60, %v7414_v48  ;;  %v7427_v48 = vand.u32 4294901760, %v7426_v22  ;;  %v7430_v60 = vld [vmem:[#allocation122_spill] sm:$0xff] }
 0x1a1   :  { %3494 = vmatpush1.bf16.xpose.msra.mxu0 %v7411_v4  ;;  %3208 = vmatprep.subr.bf16.mxu1 %v7412_v53  ;;  %v7422_v4 = vld [vmem:[#allocation47_spill] sm:$0xff] }
 0x1a2   :  { %3496 = vmatprep.subr.bf16.mxu0 %v5902_v30  ;;  %7417 = vst [vmem:[#allocation49_spill] sm:$0xff] %v5921_v63  ;;  %v7423_v2 = vand.u32 4294901760, %v7422_v4 }
 0x1a4   :  { %v5929_v44 = vpack.c.bf16 %v7423_v2, %v7421_v3  ;;  %v7434_v2 = vld [vmem:[#allocation53_spill] sm:$0xff]  ;;  %v7436_v3 = vld [vmem:[#allocation55_spill] sm:$0xff] }
 0x1a5   :  { %v7435_v4 = vand.u32 4294901760, %v7434_v2 }
 0x1a6   :  { %7424 = vst [vmem:[#allocation72_spill] sm:$0xff] %v5929_v44 }
 0x1a7   :  { %984 = vmatmul.mubr.f32.vlgmr.msra.gmra.mrb[0].mxu1 %v7413_v42 }
 0x1a8   :  { %3210 = vmatpush1.bf16.xpose.msra.mxu1 %v7418_v62  ;;  %2226 = vmatmul.mubr.f32.vlgmr.msra.gmra.mrb[0].mxu0 %v7419_v14  ;;  %v7431_v14 = vand.u32 4294901760, %v7430_v60  ;;  %v7446_v60 = vld [vmem:[#allocation60_spill] sm:$0xff] }
 0x1a9   :  { %3498 = vmatpush1.bf16.xpose.msra.mxu0 %v5921_v63  ;;  %3212 = vmatprep.subr.bf16.mxu1 %v7425_v51  ;;  %v7437_v63 = vand.u32 4294901760, %v7436_v3  ;;  %v7447_v2 = vand.u32 4294901760, %v7446_v60 }
 0x1aa   :  { %3500 = vmatprep.subr.bf16.mxu0 %v5929_v44  ;;  %1088 = vmatprep.mubr.f32.mxu1 %v7427_v48  ;;  %v5940_v30 = vpack.c.bf16 %v7431_v14, %v7429_v61  ;;  %v7439_v44 = vld [vmem:[#allocation58_spill] sm:$0xff]  ;;  %v7442_v48 = vld [vmem:[#allocation124_spill] sm:$0xff] }
 0x1ab   :  { %2332 = vmatprep.mubr.f32.mxu0 %v2331_v43  ;;  %v5947_v5 = vpack.c.bf16 %v7437_v63, %v7435_v4  ;;  %v7440_v43 = vld [vmem:[#allocation123_spill] sm:$0xff]  ;;  %v7443_v1 = vand.u32 4294901760, %v7442_v48  ;;  %v7445_v61 = vld [vmem:[#allocation62_spill] sm:$0xff] }
 0x1ac   :  { %7432 = vst [vmem:[#allocation44_spill] sm:$0xff] %v5940_v30  ;;  %v7441_v22 = vand.u32 4294901760, %v7440_v43  ;;  %v7451_v4 = vld [vmem:[#allocation66_spill] sm:$0xff] }
 0x1ad   :  { %7438 = vst [vmem:[#allocation51_spill] sm:$0xff] %v5947_v5 }
 0x1ae   :  { %v5956_v14 = vpack.c.bf16 %v7443_v1, %v7441_v22  ;;  %v7457_v1 = vld [vmem:[#allocation68_spill] sm:$0xff] }
 0x1b0   :  { %3214 = vmatpush1.bf16.xpose.msra.mxu1 %v7433_v38  ;;  %7444 = vst [vmem:[#allocation45_spill] sm:$0xff] %v5956_v14  ;;  %v7448_v38 = vld [vmem:[#allocation59_spill] sm:$0xff] }
 0x1b1   :  { %3502 = vmatpush1.bf16.xpose.msra.mxu0 %v5940_v30  ;;  %3216 = vmatprep.subr.bf16.mxu1 %v7439_v44  ;;  %v7449_v3 = vand.u32 4294901760, %v7448_v38  ;;  %v7454_v30 = vld [vmem:[#allocation127_spill] sm:$0xff]  ;;  %v7460_v38 = vand.u32 4294901760, %v5498_v59  ;;  %v7469_v59 = vand.u32 4294901760, %v5545_v56 }
 0x1b2   :  { %3504 = vmatprep.subr.bf16.mxu0 %v5947_v5  ;;  %v7452_v5 = vld [vmem:[#allocation126_spill] sm:$0xff]  ;;  %v7455_v48 = vand.u32 4294901760, %v7454_v30  ;;  %v7465_v30 = vand.u32 4294901760, %v5525_v52  ;;  %v7473_v52 = vand.u32 4294901760, %v5561_v8 }
 0x1b3   :  { %v5963_v63 = vpack.c.bf16 %v7449_v3, %v7447_v2  ;;  %v7453_v43 = vand.u32 4294901760, %v7452_v5  ;;  %v7462_v3 = vld [vmem:[#allocation70_spill] sm:$0xff] }
 0x1b4   :  { %v7483_v8 = vld [vmem:[#allocation74_spill] sm:$0xff] }
 0x1b5   :  { %7450 = vst [vmem:[#allocation47_spill] sm:$0xff] %v5963_v63  ;;  %v5972_v22 = vpack.c.bf16 %v7455_v48, %v7453_v43  ;;  %v7467_v48 = vld [vmem:[#allocation73_spill] sm:$0xff] }
 0x1b7   :  { %7456 = vst [vmem:[#allocation48_spill] sm:$0xff] %v5972_v22 }
 0x1b8   :  { %3218 = vmatpush1.bf16.xpose.msra.mxu1 %v7445_v61  ;;  %v7458_v61 = vld [vmem:[#allocation65_spill] sm:$0xff] }
 0x1b9   :  { %3506 = vmatpush1.bf16.xpose.msra.mxu0 %v5956_v14  ;;  %3220 = vmatprep.subr.bf16.mxu1 %v7451_v4  ;;  %v7459_v60 = vand.u32 4294901760, %v7458_v61  ;;  %v7468_v61 = vand.u32 4294901760, %v5528_v50 }
 0x1ba   :  { %3508 = vmatprep.subr.bf16.mxu0 %v5963_v63  ;;  %v7463_v63 = vld [vmem:[#allocation64_spill] sm:$0xff] }
 0x1bb   :  { %v5979_v2 = vpack.c.bf16 %v7460_v38, %v7459_v60  ;;  %v7464_v5 = vand.u32 4294901760, %v7463_v63  ;;  %v5995_v60 = vpack.c.bf16 %v7469_v59, %v7468_v61  ;;  %v7471_v38 = vld [vmem:[#allocation77_spill] sm:$0xff]  ;;  %v7472_v63 = vand.u32 4294901760, %v5558_v11 }
 0x1bc   :  { %v7481_v59 = vld [vmem:[#allocation81_spill] sm:$0xff] }
 0x1bd   :  { %7461 = vst [vmem:[#allocation42_spill] sm:$0xff] %v5979_v2  ;;  %v5988_v43 = vpack.c.bf16 %v7465_v30, %v7464_v5  ;;  %7470 = vst [vmem:[#allocation122_spill] sm:$0xff] %v5995_v60  ;;  %v6004_v5 = vpack.c.bf16 %v7473_v52, %v7472_v63  ;;  %v7475_v30 = vld [vmem:[#allocation79_spill] sm:$0xff]  ;;  %v7484_v63 = vand.u32 4294901760, %v7483_v8  ;;  %v7485_v52 = vld [vmem:[#allocation76_spill] sm:$0xff] }
 0x1bf   :  { %7466 = vst [vmem:[#allocation46_spill] sm:$0xff] %v5988_v43  ;;  %7474 = vst [vmem:[#allocation53_spill] sm:$0xff] %v6004_v5 }
 0x1c0   :  { %3222 = vmatpush1.bf16.xpose.msra.mxu1 %v7457_v1 }
 0x1c1   :  { %3510 = vmatpush1.bf16.xpose.msra.mxu0 %v5972_v22  ;;  %3224 = vmatprep.subr.bf16.mxu1 %v7462_v3  ;;  %v7478_v22 = vld [vmem:[#allocation69_spill] sm:$0xff] }
 0x1c2   :  { %3512 = vmatprep.subr.bf16.mxu0 %v5979_v2  ;;  %v7476_v2 = vld [vmem:[#allocation16_spill] sm:$0xff]  ;;  %v7479_v56 = vand.u32 4294901760, %v7478_v22  ;;  %v7488_v22 = vld [vmem:[#allocation86_spill] sm:$0xff] }
 0x1c3   :  { %v7477_v50 = vand.u32 4294901760, %v7476_v2 }
 0x1c5   :  { %v6011_v61 = vpack.c.bf16 %v7479_v56, %v7477_v50  ;;  %v7489_v50 = vand.u32 4294901760, %v5591_v12  ;;  %v7490_v56 = vld [vmem:[#allocation78_spill] sm:$0xff]  ;;  %v7496_v12 = vand.u32 4294901760, %v5442_v7 }
 0x1c7   :  { %7480 = vst [vmem:[#allocation55_spill] sm:$0xff] %v6011_v61  ;;  %v2346_v8 = vsub.f32 %v5442_v7, %v7496_v12  ;;  %v7507_v12 = vld [vmem:[#allocation97_spill] sm:$0xff] }
 0x1c8   :  { %3226 = vmatpush1.bf16.xpose.msra.mxu1 %v7467_v48  ;;  %v7504_v48 = vld [vmem:[#allocation89_spill] sm:$0xff] }
 0x1c9   :  { %3514 = vmatpush1.bf16.xpose.msra.mxu0 %v5988_v43  ;;  %3228 = vmatprep.subr.bf16.mxu1 %v7471_v38  ;;  %v6015_v43 = vld [vmem:[#allocation2 + $0x20] sm:$0xff]  ;;  %v7502_v38 = vld [vmem:[#allocation33_spill] sm:$0xff] }
 0x1ca   :  { %3516 = vmatprep.subr.bf16.mxu0 %v5995_v60  ;;  %7482 = vst [vmem:[#allocation123_spill] sm:$0xff] %v6015_v43  ;;  %v6019_v11 = vand.u32 4294901760, %v6015_v43  ;;  %v7486_v60 = vand.u32 4294901760, %v7485_v52  ;;  %v2347_v52 = vand.u32 4294901760, %v2346_v8 }
 0x1cc   :  { %v6025_v2 = vpack.c.bf16 %v7486_v60, %v7484_v63  ;;  %v7495_v60 = vld [vmem:[#allocation91_spill] sm:$0xff] }
 0x1ce   :  { %7487 = vst [vmem:[#allocation124_spill] sm:$0xff] %v6025_v2 }
 0x1d0   :  { %3230 = vmatpush1.bf16.xpose.msra.mxu1 %v7475_v30  ;;  %v6039_v30 = vsub.f32 %v6015_v43, %v6019_v11 }
 0x1d1   :  { %3518 = vmatpush1.bf16.xpose.msra.mxu0 %v6004_v5  ;;  %3232 = vmatprep.subr.bf16.mxu1 %v7481_v59  ;;  %v7491_v5 = vand.u32 4294901760, %v7490_v56  ;;  %v7493_v59 = vand.u32 4294901760, %v5457_v35  ;;  %v7499_v56 = vld [vmem:[#allocation129_spill] sm:$0xff] }
 0x1d2   :  { %3520 = vmatprep.subr.bf16.mxu0 %v6011_v61  ;;  %7494 = vst [vmem:[#allocation59_spill] sm:$0xff] %v6039_v30  ;;  %v6943_v63 = vand.u32 4294901760, %v6039_v30 }
 0x1d3   :  { %v6032_v14 = vpack.c.bf16 %v7491_v5, %v7489_v50  ;;  %v2358_v61 = vsub.f32 %v5457_v35, %v7493_v59  ;;  %v7497_v50 = vld [vmem:[#allocation31_spill] sm:$0xff] }
 0x1d4   :  { %v7498_v59 = vand.u32 4294901760, %v7497_v50  ;;  %v2336_v8 = vsub.f32 %v6039_v30, %v6943_v63  ;;  %v7508_v50 = vand.u32 4294901760, %v5447_v40  ;;  %v7511_v63 = vld [vmem:[#allocation36_spill] sm:$0xff] }
 0x1d5   :  { %7492 = vst [vmem:[#allocation60_spill] sm:$0xff] %v6032_v14  ;;  %v2359_v5 = vand.u32 4294901760, %v2358_v61  ;;  %v7512_v30 = vand.u32 4294901760, %v7511_v63 }
 0x1d7   :  { %v3527_v61 = vpack.c.bf16 %v2359_v5, %v2347_v52  ;;  %v2337_v5 = vand.u32 4294901760, %v2336_v8  ;;  %v7521_v8 = vand.u32 4294901760, %v5494_v57 }
 0x1d8   :  { %3234 = vmatpush1.bf16.xpose.msra.mxu1 %v7488_v22  ;;  %v7500_v22 = vand.u32 4294901760, %v7499_v56 }
 0x1d9   :  { %3522 = vmatpush1.bf16.xpose.msra.mxu0 %v6025_v2  ;;  %3236 = vmatprep.subr.bf16.mxu1 %v7495_v60  ;;  %v7503_v2 = vand.u32 4294901760, %v7502_v38  ;;  %v7505_v60 = vand.u32 4294901760, %v7504_v48  ;;  %v7509_v38 = vand.u32 4294901760, %v5479_v19  ;;  %v2388_v63 = vsub.f32 %v5494_v57, %v7521_v8 }
 0x1da   :  { %3524 = vmatprep.subr.bf16.mxu0 %v6032_v14  ;;  %v6052_v43 = vpack.c.bf16 %v7500_v22, %v7498_v59  ;;  %v7506_v14 = vand.u32 4294901760, %v5472_v25  ;;  %v2370_v22 = vsub.f32 %v5447_v40, %v7508_v50  ;;  %v7513_v50 = vld [vmem:[#allocation39_spill] sm:$0xff]  ;;  %v7518_v40 = vld [vmem:[#allocation92_spill] sm:$0xff]  ;;  %v7533_v8 = vand.u32 4294901760, %v5517_v36 }
 0x1db   :  { %v3239_v3 = vpack.c.bf16 %v7505_v60, %v7503_v2  ;;  %v2382_v48 = vsub.f32 %v5479_v19, %v7509_v38  ;;  %v7515_v38 = vand.u32 4294901760, %v7413_v42  ;;  %v7519_v19 = vand.u32 4294901760, %v7518_v40 }
 0x1dc   :  { %7501 = vst [vmem:[#allocation126_spill] sm:$0xff] %v6052_v43  ;;  %v2364_v1 = vsub.f32 %v5472_v25, %v7506_v14  ;;  %v7510_v14 = vand.u32 4294901760, %v5467_v13  ;;  %v2371_v52 = vand.u32 4294901760, %v2370_v22  ;;  %v7522_v42 = vand.u32 4294901760, %v5503_v41 }
 0x1dd   :  { %v2383_v59 = vand.u32 4294901760, %v2382_v48  ;;  %v7523_v22 = vand.u32 4294901760, %v5508_v16  ;;  %v2389_v48 = vand.u32 4294901760, %v2388_v63  ;;  %v7534_v63 = vand.u32 4294901760, %v5522_v31 }
 0x1de   :  { %v2352_v2 = vsub.f32 %v5467_v13, %v7510_v14  ;;  %v2365_v60 = vand.u32 4294901760, %v2364_v1  ;;  %v7520_v1 = vand.u32 4294901760, %v5489_v33 }
 0x1df   :  { %v2406_v40 = vsub.f32 %v5508_v16, %v7523_v22 }
 0x1e0   :  { %3238 = vmatpush1.bf16.xpose.msra.mxu1 %v7507_v12  ;;  %v2353_v56 = vand.u32 4294901760, %v2352_v2  ;;  %v7514_v12 = vand.u32 4294901760, %v7513_v50 }
 0x1e1   :  { %3526 = vmatpush1.bf16.xpose.msra.mxu0 %v6052_v43  ;;  %3240 = vmatprep.subr.bf16.mxu1 %v3239_v3  ;;  %v7516_v3 = vld [vmem:[#allocation85_spill] sm:$0xff]  ;;  %v2407_v2 = vand.u32 4294901760, %v2406_v40  ;;  %v7536_v40 = vand.u32 4294901760, %v5541_v54 }
 0x1e2   :  { %3528 = vmatprep.subr.bf16.mxu0 %v3527_v61  ;;  %v3241_v4 = vpack.c.bf16 %v7514_v12, %v7512_v30  ;;  %v3529_v43 = vpack.c.bf16 %v2365_v60, %v2353_v56  ;;  %v7517_v44 = vand.u32 4294901760, %v7516_v3  ;;  %v2376_v61 = vsub.f32 %v5489_v33, %v7520_v1  ;;  %v7525_v60 = vld [vmem:[#allocation96_spill] sm:$0xff]  ;;  %v7531_v1 = vld [vmem:[#allocation102_spill] sm:$0xff] }
 0x1e3   :  { %v3531_v30 = vpack.c.bf16 %v2383_v59, %v2371_v52  ;;  %v2394_v12 = vsub.f32 %v5503_v41, %v7522_v42  ;;  %v7527_v52 = vld [vmem:[#allocation98_spill] sm:$0xff] }
 0x1e4   :  { %v3243_v14 = vpack.c.bf16 %v7519_v19, %v7517_v44  ;;  %v7524_v19 = vld [vmem:[#allocation40_spill] sm:$0xff]  ;;  %v2377_v44 = vand.u32 4294901760, %v2376_v61  ;;  %v7528_v59 = vand.u32 4294901760, %v7527_v52  ;;  %v2400_v61 = vsub.f32 %v5517_v36, %v7533_v8  ;;  %v7543_v8 = vld [vmem:[#allocation110_spill] sm:$0xff] }
 0x1e6   :  { %v3533_v50 = vpack.c.bf16 %v2389_v48, %v2377_v44  ;;  %v2430_v44 = vsub.f32 %v5541_v54, %v7536_v40  ;;  %v2401_v48 = vand.u32 4294901760, %v2400_v61  ;;  %v7545_v40 = vand.u32 4294901760, %v5554_v58 }
 0x1e7   :  { %1092 = vmatmul.mubr.f32.vlgmr.msra.gmra.mrb[0].mxu1 %v7515_v38  ;;  %v7529_v38 = vld [vmem:[#allocation101_spill] sm:$0xff] }
 0x1e8   :  { %3242 = vmatpush1.bf16.xpose.msra.mxu1 %v3241_v4  ;;  %2338 = vmatmul.mubr.f32.vlgmr.msra.gmra.mrb[0].mxu0 %v2337_v5  ;;  %v2395_v4 = vand.u32 4294901760, %v2394_v12  ;;  %v7526_v5 = vand.u32 4294901760, %v7525_v60  ;;  %v7530_v3 = vand.u32 4294901760, %v7529_v38  ;;  %v7535_v12 = vand.u32 4294901760, %v5536_v39 }
 0x1e9   :  { %3530 = vmatpush1.bf16.xpose.msra.mxu0 %v3529_v43  ;;  %3244 = vmatprep.subr.bf16.mxu1 %v3243_v14  ;;  %v7532_v43 = vand.u32 4294901760, %v7531_v1  ;;  %v2431_v52 = vand.u32 4294901760, %v2430_v44  ;;  %v7541_v1 = vld [vmem:[#allocation109_spill] sm:$0xff]  ;;  %v7548_v44 = vand.u32 4294901760, %v5599_v28 }
 0x1ea   :  { %3532 = vmatprep.subr.bf16.mxu0 %v3531_v30  ;;  %1258 = vmatprep.mubr.f32.mxu1 %v7524_v19  ;;  %v3245_v56 = vpack.c.bf16 %v7528_v59, %v7526_v5  ;;  %v2412_v30 = vsub.f32 %v5522_v31, %v7534_v63  ;;  %v3535_v42 = vpack.c.bf16 %v2407_v2, %v2395_v4  ;;  %v7537_v59 = vld [vmem:[#allocation106_spill] sm:$0xff]  ;;  %v7544_v63 = vand.u32 4294901760, %v7543_v8 }
 0x1eb   :  { %2568 = vmatprep.mubr.f32.mxu0 %v5840_v55  ;;  %v3247_v14 = vpack.c.bf16 %v7532_v43, %v7530_v3  ;;  %v2418_v22 = vsub.f32 %v5536_v39, %v7535_v12  ;;  %v7538_v38 = vand.u32 4294901760, %v7537_v59  ;;  %v7539_v3 = vld [vmem:[#allocation107_spill] sm:$0xff]  ;;  %v7542_v43 = vand.u32 4294901760, %v7541_v1  ;;  %v7553_v8 = vld [vmem:[#allocation118_spill] sm:$0xff] }
 0x1ec   :  { %v2413_v60 = vand.u32 4294901760, %v2412_v30 }
 0x1ed   :  { %v2419_v5 = vand.u32 4294901760, %v2418_v22  ;;  %v3251_v12 = vpack.c.bf16 %v7544_v63, %v7542_v43  ;;  %v7551_v43 = vld [vmem:[#allocation115_spill] sm:$0xff]  ;;  %v7554_v63 = vand.u32 4294901760, %v7553_v8 }
 0x1ee   :  { %v3537_v2 = vpack.c.bf16 %v2413_v60, %v2401_v48  ;;  %v2454_v48 = vsub.f32 %v5599_v28, %v7548_v44  ;;  %v7557_v44 = vand.u32 4294901760, %v5615_v27 }
 0x1ef   :  { %v3539_v30 = vpack.c.bf16 %v2431_v52, %v2419_v5 }
 0x1f0   :  { %3246 = vmatpush1.bf16.xpose.msra.mxu1 %v3245_v56  ;;  %v7540_v56 = vand.u32 4294901760, %v7539_v3  ;;  %v2455_v3 = vand.u32 4294901760, %v2454_v48  ;;  %v7560_v48 = vand.u32 4294901760, %v5647_v29 }
 0x1f1   :  { %3534 = vmatpush1.bf16.xpose.msra.mxu0 %v3533_v50  ;;  %3248 = vmatprep.subr.bf16.mxu1 %v3247_v14  ;;  %v2424_v50 = vsub.f32 %v5554_v58, %v7545_v40  ;;  %v7546_v14 = vand.u32 4294901760, %v5567_v46  ;;  %v7555_v40 = vld [vmem:[#allocation119_spill] sm:$0xff] }
 0x1f2   :  { %3536 = vmatprep.subr.bf16.mxu0 %v3535_v42  ;;  %v3249_v4 = vpack.c.bf16 %v7540_v56, %v7538_v38  ;;  %v7547_v42 = vand.u32 4294901760, %v5587_v37  ;;  %v7549_v56 = vld [vmem:[#allocation114_spill] sm:$0xff] }
 0x1f3   :  { %v2436_v61 = vsub.f32 %v5567_v46, %v7546_v14  ;;  %v2425_v60 = vand.u32 4294901760, %v2424_v50  ;;  %v7550_v1 = vand.u32 4294901760, %v7549_v56  ;;  %v7556_v14 = vand.u32 4294901760, %v7555_v40  ;;  %v7565_v40 = vld [vmem:[#allocation24_spill] sm:$0xff] }
 0x1f4   :  { %v2442_v22 = vsub.f32 %v5587_v37, %v7547_v42 }
 0x1f5   :  { %v2437_v59 = vand.u32 4294901760, %v2436_v61  ;;  %v3255_v42 = vpack.c.bf16 %v7556_v14, %v7554_v63  ;;  %v7563_v63 = vld [vmem:[#allocation11_spill] sm:$0xff]  ;;  %v7566_v14 = vand.u32 4294901760, %v7565_v40  ;;  %v7575_v40 = vand.u32 4294901760, %v5136_v15 }
 0x1f6   :  { %v2443_v38 = vand.u32 4294901760, %v2442_v22 }
 0x1f7   :  { %v3541_v52 = vpack.c.bf16 %v2437_v59, %v2425_v60  ;;  %v2478_v60 = vsub.f32 %v5647_v29, %v7560_v48  ;;  %v7569_v48 = vand.u32 4294901760, %v5652_v17 }
 0x1f8   :  { %3250 = vmatpush1.bf16.xpose.msra.mxu1 %v3249_v4  ;;  %v7552_v4 = vand.u32 4294901760, %v7551_v43  ;;  %v3543_v61 = vpack.c.bf16 %v2455_v3, %v2443_v38 }
 0x1f9   :  { %3538 = vmatpush1.bf16.xpose.msra.mxu0 %v3537_v2  ;;  %3252 = vmatprep.subr.bf16.mxu1 %v3251_v12  ;;  %v2448_v2 = vsub.f32 %v5615_v27, %v7557_v44  ;;  %v7558_v12 = vand.u32 4294901760, %v5631_v23  ;;  %v2479_v43 = vand.u32 4294901760, %v2478_v60  ;;  %v7567_v44 = vld [vmem:[#allocation20_spill] sm:$0xff]  ;;  %v7572_v60 = vand.u32 4294901760, %v5675_v49 }
 0x1fa   :  { %3540 = vmatprep.subr.bf16.mxu0 %v3539_v30  ;;  %v3253_v5 = vpack.c.bf16 %v7552_v4, %v7550_v1  ;;  %v7559_v30 = vand.u32 4294901760, %v5636_v10  ;;  %v7561_v4 = vld [vmem:[#allocation15_spill] sm:$0xff] }
 0x1fb   :  { %v2460_v50 = vsub.f32 %v5631_v23, %v7558_v12  ;;  %v2449_v59 = vand.u32 4294901760, %v2448_v2  ;;  %v7562_v8 = vand.u32 4294901760, %v7561_v4  ;;  %v7568_v12 = vand.u32 4294901760, %v7567_v44 }
 0x1fc   :  { %v2466_v22 = vsub.f32 %v5636_v10, %v7559_v30 }
 0x1fd   :  { %v2461_v56 = vand.u32 4294901760, %v2460_v50  ;;  %v3259_v30 = vpack.c.bf16 %v7568_v12, %v7566_v14  ;;  %v7576_v14 = vld [vmem:[#allocation23_spill] sm:$0xff] }
 0x1fe   :  { %v2467_v1 = vand.u32 4294901760, %v2466_v22  ;;  %v7577_v44 = vand.u32 4294901760, %v7576_v14 }
 0x1ff   :  { %v3545_v3 = vpack.c.bf16 %v2461_v56, %v2449_v59  ;;  %v2502_v59 = vsub.f32 %v5675_v49, %v7572_v60 }
 0x200   :  { %3254 = vmatpush1.bf16.xpose.msra.mxu1 %v3253_v5  ;;  %v7564_v5 = vand.u32 4294901760, %v7563_v63  ;;  %v3547_v50 = vpack.c.bf16 %v2479_v43, %v2467_v1  ;;  %v3263_v12 = vpack.c.bf16 %v7577_v44, %v7575_v40  ;;  %v7586_v40 = vld [vmem:[#allocation130_spill] sm:$0xff] }
 0x201   :  { %3542 = vmatpush1.bf16.xpose.msra.mxu0 %v3541_v52  ;;  %3256 = vmatprep.subr.bf16.mxu1 %v3255_v42  ;;  %v2472_v52 = vsub.f32 %v5652_v17, %v7569_v48  ;;  %v7570_v42 = vand.u32 4294901760, %v5665_v24  ;;  %v2503_v63 = vand.u32 4294901760, %v2502_v59  ;;  %v7578_v48 = vand.u32 4294901760, %v5681_v26 }
 0x202   :  { %3544 = vmatprep.subr.bf16.mxu0 %v3543_v61  ;;  %v3257_v38 = vpack.c.bf16 %v7564_v5, %v7562_v8  ;;  %v7571_v61 = vand.u32 4294901760, %v5670_v45  ;;  %v7573_v5 = vand.u32 4294901760, %v5126_v47  ;;  %v7580_v47 = vand.u32 4294901760, %v5695_v21 }
 0x203   :  { %v2484_v2 = vsub.f32 %v5665_v24, %v7570_v42  ;;  %v2473_v56 = vand.u32 4294901760, %v2472_v52  ;;  %v7582_v59 = vand.u32 4294901760, %v5157_v32 }
 0x204   :  { %v2490_v22 = vsub.f32 %v5670_v45, %v7571_v61 }
 0x205   :  { %v2485_v4 = vand.u32 4294901760, %v2484_v2  ;;  %v7581_v2 = vand.u32 4294901760, %v5700_v34 }
 0x206   :  { %v2491_v8 = vand.u32 4294901760, %v2490_v22 }
 0x207   :  { %v3549_v43 = vpack.c.bf16 %v2485_v4, %v2473_v56  ;;  %v2526_v15 = vsub.f32 %v5700_v34, %v7581_v2  ;;  %v7583_v56 = vand.u32 4294901760, %v5163_v20  ;;  %v7587_v20 = vld [vmem:[#allocation131_spill] sm:$0xff] }
 0x208   :  { %3258 = vmatpush1.bf16.xpose.msra.mxu1 %v3257_v38  ;;  %v7574_v38 = vand.u32 4294901760, %v5131_v6  ;;  %v3551_v42 = vpack.c.bf16 %v2503_v63, %v2491_v8  ;;  %v2514_v6 = vsub.f32 %v5695_v21, %v7580_v47  ;;  %v7584_v63 = vand.u32 4294901760, %v5708_v0 }
 0x209   :  { %3546 = vmatpush1.bf16.xpose.msra.mxu0 %v3545_v3  ;;  %3260 = vmatprep.subr.bf16.mxu1 %v3259_v30  ;;  %v2496_v3 = vsub.f32 %v5681_v26, %v7578_v48  ;;  %v7579_v30 = vand.u32 4294901760, %v5686_v9  ;;  %v2527_v60 = vand.u32 4294901760, %v2526_v15  ;;  %v3265_v4 = vpack.c.bf16 %v7583_v56, %v7582_v59  ;;  %v7589_v48 = vld [vmem:[#allocation14_spill] sm:$0xff]  ;;  %v7625_v15 = vld [vmem:[#allocation52_spill] sm:$0xff]  ;;  %v7634_v59 = vld [vmem:[#allocation51_spill] sm:$0xff] }
 0x20a   :  { %3548 = vmatprep.subr.bf16.mxu0 %v3547_v50  ;;  %v3261_v1 = vpack.c.bf16 %v7574_v38, %v7573_v5  ;;  %v2515_v22 = vand.u32 4294901760, %v2514_v6  ;;  %v2520_v5 = vsub.f32 %v5708_v0, %v7584_v63  ;;  %v7585_v38 = vand.u32 4294901760, %v5719_v18  ;;  %v7635_v56 = vld [vmem:[#allocation63_spill] sm:$0xff] }
 0x20b   :  { %v2508_v52 = vsub.f32 %v5686_v9, %v7579_v30  ;;  %v2497_v50 = vand.u32 4294901760, %v2496_v3  ;;  %v7590_v3 = vpack.c.bf16 %v5472_v25, %v5467_v13  ;;  %v7591_v30 = vld [vmem:[#allocation128_spill] sm:$0xff]  ;;  %v7598_v25 = vpack.c.bf16 %v5508_v16, %v5503_v41  ;;  %v7599_v13 = vld [vmem:[#allocation62_spill] sm:$0xff]  ;;  %v7638_v63 = vld [vmem:[#allocation47_spill] sm:$0xff] }
 0x20c   :  { %v2521_v14 = vand.u32 4294901760, %v2520_v5  ;;  %v7602_v47 = vpack.c.bf16 %v5541_v54, %v5536_v39  ;;  %v7605_v41 = vld [vmem:[#allocation70_spill] sm:$0xff]  ;;  %v7606_v16 = vpack.c.bf16 %v5599_v28, %v5587_v37  ;;  %v7609_v54 = vld [vmem:[#allocation77_spill] sm:$0xff]  ;;  %v7610_v39 = vpack.c.bf16 %v5647_v29, %v5636_v10  ;;  %v7617_v10 = vld [vmem:[#allocation91_spill] sm:$0xff] }
 0x20d   :  { %v2509_v61 = vand.u32 4294901760, %v2508_v52  ;;  %v7592_v52 = vld [vmem:[#allocation125_spill] sm:$0xff]  ;;  %v7614_v28 = vpack.c.bf16 %v5675_v49, %v5670_v45  ;;  %v7618_v29 = vpack.c.bf16 %v5700_v34, %v5695_v21  ;;  %v7621_v49 = vld [vmem:[#allocation50_spill] sm:$0xff]  ;;  %v7622_v45 = vld [vmem:[#allocation43_spill] sm:$0xff] }
 0x20e   :  { %v7613_v37 = vld [vmem:[#allocation81_spill] sm:$0xff]  ;;  %v7623_v6 = vand.u32 4294901760, %v7622_v45  ;;  %v7626_v21 = vld [vmem:[#allocation59_spill] sm:$0xff]  ;;  %v7639_v5 = vld [vmem:[#allocation18_spill] sm:$0xff] }
 0x20f   :  { %v3553_v8 = vpack.c.bf16 %v2509_v61, %v2497_v50  ;;  %v7627_v34 = vld [vmem:[#allocation49_spill] sm:$0xff]  ;;  %v7628_v50 = vld [vmem:[#allocation54_spill] sm:$0xff] }
 0x210   :  { %3262 = vmatpush1.bf16.xpose.msra.mxu1 %v3261_v1  ;;  %v2532_v1 = vsub.f32 %v5719_v18, %v7585_v38  ;;  %v1468_v2 = vsub.f32 %v7622_v45, %v7623_v6  ;;  %v7631_v61 = vld [vmem:[#allocation57_spill] sm:$0xff]  ;;  %v7640_v38 = vld [vmem:[#allocation48_spill] sm:$0xff] }
 0x211   :  { %3550 = vmatpush1.bf16.xpose.msra.mxu0 %v3549_v43  ;;  %3264 = vmatprep.subr.bf16.mxu1 %v3263_v12  ;;  %v3555_v43 = vpack.c.bf16 %v2527_v60, %v2515_v22  ;;  %v7588_v12 = vpack.c.bf16 %v5457_v35, %v5442_v7  ;;  %v7594_v35 = vld [vmem:[#allocation145_spill] sm:$0xff]  ;;  %v7595_v7 = vld [vmem:[#allocation56_spill] sm:$0xff] }
 0x212   :  { %3552 = vmatprep.subr.bf16.mxu0 %v3551_v42  ;;  %v2533_v32 = vand.u32 4294901760, %v2532_v1  ;;  %v7593_v42 = vpack.c.bf16 %v7591_v30, %v7592_v52  ;;  %v7632_v22 = vld [vmem:[#allocation44_spill] sm:$0xff]  ;;  %v7633_v60 = vld [vmem:[#allocation61_spill] sm:$0xff]  ;;  %v7641_v1 = vld [vmem:[#allocation71_spill] sm:$0xff] }
 0x213   :  { %v7651_v30 = vld [vmem:[#allocation35_spill] sm:$0xff] }
 0x214   :  { %v3557_v44 = vpack.c.bf16 %v2533_v32, %v2521_v14  ;;  %v7644_v14 = vld [vmem:[#allocation46_spill] sm:$0xff]  ;;  %v7645_v32 = vld [vmem:[#allocation32_spill] sm:$0xff]  ;;  %v7652_v52 = vand.u32 4294901760, %v7651_v30 }
 0x218   :  { %3266 = vmatpush1.bf16.xpose.msra.mxu1 %v3265_v4  ;;  %v7636_v4 = vld [vmem:[#allocation45_spill] sm:$0xff] }
 0x219   :  { %3554 = vmatpush1.bf16.xpose.msra.mxu0 %v3553_v8  ;;  %3268 = vmatprep.subr.bf16.mxu1 %v7586_v40  ;;  %v7637_v8 = vld [vmem:[#allocation67_spill] sm:$0xff] }
 0x21a   :  { %3556 = vmatprep.subr.bf16.mxu0 %v3555_v43  ;;  %v7642_v43 = vld [vmem:[#allocation42_spill] sm:$0xff]  ;;  %v7643_v40 = vld [vmem:[#allocation75_spill] sm:$0xff] }
 0x220   :  { %3270 = vmatpush1.bf16.xpose.msra.mxu1 %v7587_v20  ;;  %v7647_v20 = vld [vmem:[#allocation80_spill] sm:$0xff] }
 0x221   :  { %3558 = vmatpush1.bf16.xpose.msra.mxu0 %v3557_v44  ;;  %3272 = vmatprep.subr.bf16.mxu1 %v7412_v53  ;;  %v7597_v53 = vld [vmem:[#allocation58_spill] sm:$0xff] }
 0x222   :  { %3560 = vmatprep.subr.bf16.mxu0 %v7588_v12  ;;  %v7646_v44 = vld [vmem:[#allocation122_spill] sm:$0xff]  ;;  %v7648_v12 = vld [vmem:[#allocation53_spill] sm:$0xff] }
 0x227   :  { %1260 = vmatmul.mubr.f32.vlgmr.msra.gmra.mrb[0].mxu1 %v7589_v48 }
 0x228   :  { %3274 = vmatpush1.bf16.xpose.msra.mxu1 %v7418_v62  ;;  %2570 = vmatmul.mubr.f32.vlgmr.msra.gmra.mrb[0].mxu0 %v6019_v11  ;;  %v7596_v62 = vpack.c.bf16 %v5494_v57, %v5489_v33  ;;  %v7603_v33 = vld [vmem:[#allocation68_spill] sm:$0xff]  ;;  %v7604_v57 = vpack.c.bf16 %v5567_v46, %v5554_v58  ;;  %v7611_v58 = vld [vmem:[#allocation79_spill] sm:$0xff]  ;;  %v7612_v46 = vpack.c.bf16 %v5665_v24, %v5652_v17  ;;  %v7619_v17 = vld [vmem:[#allocation97_spill] sm:$0xff] }
 0x229   :  { %3562 = vmatpush1.bf16.xpose.msra.mxu0 %v7590_v3  ;;  %3276 = vmatprep.subr.bf16.mxu1 %v7425_v51  ;;  %v7600_v51 = vpack.c.bf16 %v5522_v31, %v5517_v36  ;;  %v7607_v36 = vld [vmem:[#allocation73_spill] sm:$0xff]  ;;  %v7608_v31 = vpack.c.bf16 %v5631_v23, %v5615_v27  ;;  %v7615_v23 = vld [vmem:[#allocation86_spill] sm:$0xff]  ;;  %v7616_v27 = vpack.c.bf16 %v5686_v9, %v5681_v26  ;;  %v1469_v26 = vand.u32 4294901760, %v1468_v2  ;;  %v7650_v3 = vld [vmem:[#allocation55_spill] sm:$0xff] }
 0x22a   :  { %3564 = vmatprep.subr.bf16.mxu0 %v7593_v42  ;;  %1362 = vmatprep.mubr.f32.mxu1 %v7524_v19  ;;  %v7601_v19 = vld [vmem:[#allocation66_spill] sm:$0xff]  ;;  %v7620_v24 = vpack.c.bf16 %v5719_v18, %v5708_v0  ;;  %v7624_v9 = vld [vmem:[#allocation149_spill] sm:$0xff]  ;;  %v7629_v18 = vld [vmem:[#allocation72_spill] sm:$0xff]  ;;  %v7630_v0 = vand.u32 4294901760, %v7594_v35  ;;  %v1496_v42 = vsub.f32 %v7651_v30, %v7652_v52 }
 0x22b   :  { %2705 = vmatprep.mubr.f32.mxu0 %v7594_v35  ;;  %v7653_v35 = vld [vmem:[#allocation90_spill] sm:$0xff] }
 0x230   :  { %3278 = vmatpush1.bf16.xpose.msra.mxu1 %v7595_v7  ;;  %v7654_v7 = vld [vmem:[#allocation124_spill] sm:$0xff] }
 0x231   :  { %3566 = vmatpush1.bf16.xpose.msra.mxu0 %v7596_v62  ;;  %3280 = vmatprep.subr.bf16.mxu1 %v7597_v53  ;;  %v7655_v62 = vld [vmem:[#allocation93_spill] sm:$0xff]  ;;  %v7656_v53 = vld [vmem:[#allocation83_spill] sm:$0xff] }
 0x232   :  { %3568 = vmatprep.subr.bf16.mxu0 %v7598_v25  ;;  %v7657_v25 = vand.u32 4294901760, %v7656_v53 }
 0x238   :  { %3282 = vmatpush1.bf16.xpose.msra.mxu1 %v7599_v13  ;;  %v1484_v13 = vsub.f32 %v7656_v53, %v7657_v25 }
 0x239   :  { %3570 = vmatpush1.bf16.xpose.msra.mxu0 %v7600_v51  ;;  %3284 = vmatprep.subr.bf16.mxu1 %v7601_v19  ;;  %v7658_v51 = vld [vmem:[#allocation60_spill] sm:$0xff]  ;;  %v1497_v19 = vand.u32 4294901760, %v1496_v42 }
 0x23a   :  { %3572 = vmatprep.subr.bf16.mxu0 %v7602_v47  ;;  %v1485_v47 = vand.u32 4294901760, %v1484_v13  ;;  %v7680_v13 = vand.u32 4294901760, %v7626_v21 }
 0x240   :  { %3286 = vmatpush1.bf16.xpose.msra.mxu1 %v7603_v33  ;;  %v7659_v33 = vld [vmem:[#allocation94_spill] sm:$0xff] }
 0x241   :  { %3574 = vmatpush1.bf16.xpose.msra.mxu0 %v7604_v57  ;;  %3288 = vmatprep.subr.bf16.mxu1 %v7605_v41  ;;  %v7660_v57 = vand.u32 4294901760, %v7659_v33 }
 0x242   :  { %3576 = vmatprep.subr.bf16.mxu0 %v7606_v16  ;;  %v7661_v16 = vld [vmem:[#allocation82_spill] sm:$0xff] }
 0x243   :  { %v1502_v41 = vsub.f32 %v7659_v33, %v7660_v57  ;;  %v3793_v57 = vld [vmem:[#allocation2 + $0x10] sm:$0xff] }
 0x245   :  { %v1503_v6 = vand.u32 4294901760, %v1502_v41  ;;  %v46_v41 = vmul.f32 %v3793_v57, %v3793_v57  ;;  %v7695_v57 = vld [vmem:[#allocation136_spill] sm:$0xff] }
 0x248   :  { %3290 = vmatpush1.bf16.xpose.msra.mxu1 %v7607_v36  ;;  %v7662_v36 = vand.u32 4294901760, %v7661_v16 }
 0x249   :  { %3578 = vmatpush1.bf16.xpose.msra.mxu0 %v7608_v31  ;;  %3292 = vmatprep.subr.bf16.mxu1 %v7609_v54  ;;  %v3335_v54 = vpack.c.bf16 %v1497_v19, %v1485_v47  ;;  %v3792_v19 = vld [vmem:[#allocation2] sm:$0xff] }
 0x24a   :  { %3580 = vmatprep.subr.bf16.mxu0 %v7610_v39  ;;  %v1474_v31 = vsub.f32 %v7661_v16, %v7662_v36  ;;  %v7663_v39 = vld [vmem:[#allocation95_spill] sm:$0xff]  ;;  %v44_v47 = vmul.f32 %v3792_v19, %v3792_v19  ;;  %v7681_v36 = vld [vmem:[#allocation133_spill] sm:$0xff] }
 0x24c   :  { %v1475_v2 = vand.u32 4294901760, %v1474_v31  ;;  %v7682_v31 = vld [vmem:[#allocation134_spill] sm:$0xff] }
 0x250   :  { %3294 = vmatpush1.bf16.xpose.msra.mxu1 %v7611_v58  ;;  %v7664_v58 = vand.u32 4294901760, %v7663_v39 }
 0x251   :  { %3582 = vmatpush1.bf16.xpose.msra.mxu0 %v7612_v46  ;;  %3296 = vmatprep.subr.bf16.mxu1 %v7613_v37  ;;  %v7665_v37 = vld [vmem:[#allocation37_spill] sm:$0xff] }
 0x252   :  { %3584 = vmatprep.subr.bf16.mxu0 %v7614_v28  ;;  %v1508_v46 = vsub.f32 %v7663_v39, %v7664_v58  ;;  %v7666_v28 = vand.u32 4294901760, %v7665_v37 }
 0x258   :  { %3298 = vmatpush1.bf16.xpose.msra.mxu1 %v7615_v23  ;;  %v1520_v23 = vsub.f32 %v7665_v37, %v7666_v28  ;;  %v3794_v28 = vld [vmem:[#allocation2 + $0x18] sm:$0xff] }
 0x259   :  { %3586 = vmatpush1.bf16.xpose.msra.mxu0 %v7616_v27  ;;  %3300 = vmatprep.subr.bf16.mxu1 %v7617_v10  ;;  %v7667_v27 = vld [vmem:[#allocation100_spill] sm:$0xff]  ;;  %v7668_v10 = vld [vmem:[#allocation38_spill] sm:$0xff] }
 0x25a   :  { %3588 = vmatprep.subr.bf16.mxu0 %v7618_v29  ;;  %v7669_v29 = vand.u32 4294901760, %v7668_v10 }
 0x260   :  { %3302 = vmatpush1.bf16.xpose.msra.mxu1 %v7619_v17  ;;  %v1490_v17 = vsub.f32 %v7668_v10, %v7669_v29 }
 0x261   :  { %3590 = vmatpush1.bf16.xpose.msra.mxu0 %v7620_v24  ;;  %3304 = vmatprep.subr.bf16.mxu1 %v7621_v49  ;;  %v7670_v24 = vld [vmem:[#allocation126_spill] sm:$0xff]  ;;  %v7671_v49 = vld [vmem:[#allocation132_spill] sm:$0xff] }
 0x262   :  { %3592 = vmatprep.subr.bf16.mxu0 %v7624_v9 }
 0x267   :  { %1364 = vmatmul.mubr.f32.vlgmr.msra.gmra.mrb[0].mxu1 %v7589_v48  ;;  %v7649_v48 = vld [vmem:[#allocation84_spill] sm:$0xff] }
 0x268   :  { %3306 = vmatpush1.bf16.xpose.msra.mxu1 %v7625_v15  ;;  %2708 = vmatmul.mubr.f32.vlgmr.msra.gmra.mrb[0].mxu0 %v7626_v21  ;;  %v1521_v15 = vand.u32 4294901760, %v1520_v23  ;;  %v47_v23 = vmul.f32 %v3794_v28, %v3794_v28  ;;  %v7684_v21 = vld [vmem:[#allocation123_spill] sm:$0xff]  ;;  %v7696_v28 = vld [vmem:[#allocation116_spill] sm:$0xff] }
 0x269   :  { %3594 = vmatpush1.bf16.xpose.msra.mxu0 %v7627_v34  ;;  %3308 = vmatprep.subr.bf16.mxu1 %v7628_v50  ;;  %v1491_v50 = vand.u32 4294901760, %v1490_v17 }
 0x26a   :  { %3596 = vmatprep.subr.bf16.mxu0 %v7629_v18  ;;  %1470 = vmatprep.mubr.f32.mxu1 %v1469_v26  ;;  %v1509_v26 = vand.u32 4294901760, %v1508_v46  ;;  %v7683_v46 = vld [vmem:[#allocation41_spill] sm:$0xff] }
 0x26b   :  { %2812 = vmatprep.mubr.f32.mxu0 %v7630_v0  ;;  %v3791_v0 = vld [vmem:[#allocation2 + $0x8] sm:$0xff] }
 0x270   :  { %3310 = vmatpush1.bf16.xpose.msra.mxu1 %v7631_v61  ;;  %v45_v61 = vmul.f32 %v3791_v0, %v3791_v0  ;;  %v7687_v0 = vld [vmem:[#allocation111_spill] sm:$0xff] }
 0x271   :  { %3598 = vmatpush1.bf16.xpose.msra.mxu0 %v7632_v22  ;;  %3312 = vmatprep.subr.bf16.mxu1 %v7633_v60  ;;  %v3337_v60 = vpack.c.bf16 %v1503_v6, %v1491_v50 }
 0x272   :  { %3600 = vmatprep.subr.bf16.mxu0 %v7634_v59 }
 0x278   :  { %3314 = vmatpush1.bf16.xpose.msra.mxu1 %v7635_v56  ;;  %v7672_v56 = vld [vmem:[#allocation99_spill] sm:$0xff] }
 0x279   :  { %3602 = vmatpush1.bf16.xpose.msra.mxu0 %v7636_v4  ;;  %3316 = vmatprep.subr.bf16.mxu1 %v7637_v8  ;;  %v7673_v8 = vand.u32 4294901760, %v7672_v56 }
 0x27a   :  { %3604 = vmatprep.subr.bf16.mxu0 %v7638_v63 }
 0x280   :  { %3318 = vmatpush1.bf16.xpose.msra.mxu1 %v7639_v5  ;;  %v1514_v5 = vsub.f32 %v7672_v56, %v7673_v8 }
 0x281   :  { %3606 = vmatpush1.bf16.xpose.msra.mxu0 %v7640_v38  ;;  %3320 = vmatprep.subr.bf16.mxu1 %v7641_v1  ;;  %v7674_v1 = vld [vmem:[#allocation103_spill] sm:$0xff] }
 0x282   :  { %3608 = vmatprep.subr.bf16.mxu0 %v7642_v43 }
 0x288   :  { %3322 = vmatpush1.bf16.xpose.msra.mxu1 %v7643_v40  ;;  %v7675_v40 = vand.u32 4294901760, %v7674_v1 }
 0x289   :  { %3610 = vmatpush1.bf16.xpose.msra.mxu0 %v7644_v14  ;;  %3324 = vmatprep.subr.bf16.mxu1 %v7645_v32 }
 0x28a   :  { %3612 = vmatprep.subr.bf16.mxu0 %v7646_v44  ;;  %v1526_v32 = vsub.f32 %v7674_v1, %v7675_v40 }
 0x28c   :  { %v1527_v58 = vand.u32 4294901760, %v1526_v32 }
 0x290   :  { %3326 = vmatpush1.bf16.xpose.msra.mxu1 %v7647_v20  ;;  %v3339_v20 = vpack.c.bf16 %v1521_v15, %v1509_v26 }
 0x291   :  { %3614 = vmatpush1.bf16.xpose.msra.mxu0 %v7648_v12  ;;  %3328 = vmatprep.subr.bf16.mxu1 %v7649_v48  ;;  %v7676_v48 = vld [vmem:[#allocation104_spill] sm:$0xff] }
 0x292   :  { %3616 = vmatprep.subr.bf16.mxu0 %v7650_v3  ;;  %v7677_v52 = vand.u32 4294901760, %v7676_v48 }
 0x294   :  { %v1532_v42 = vsub.f32 %v7676_v48, %v7677_v52 }
 0x296   :  { %v1533_v29 = vand.u32 4294901760, %v1532_v42 }
 0x298   :  { %3330 = vmatpush1.bf16.xpose.msra.mxu1 %v7653_v35  ;;  %v7678_v35 = vld [vmem:[#allocation105_spill] sm:$0xff] }
 0x299   :  { %3618 = vmatpush1.bf16.xpose.msra.mxu0 %v7654_v7  ;;  %3332 = vmatprep.subr.bf16.mxu1 %v7655_v62  ;;  %v7679_v62 = vand.u32 4294901760, %v7678_v35 }
 0x29a   :  { %3620 = vmatprep.subr.bf16.mxu0 %v7658_v51 }
 0x29b   :  { %v1544_v25 = vsub.f32 %v7678_v35, %v7679_v62  ;;  %v7692_v62 = vld [vmem:[#allocation113_spill] sm:$0xff] }
 0x29d   :  { %v1545_v17 = vand.u32 4294901760, %v1544_v25  ;;  %v7693_v25 = vand.u32 4294901760, %v7692_v62 }
 0x29f   :  { %v3343_v32 = vpack.c.bf16 %v1545_v17, %v1533_v29  ;;  %v7698_v29 = vld [vmem:[#allocation117_spill] sm:$0xff] }
 0x2a0   :  { %3334 = vmatpush1.bf16.xpose.msra.mxu1 %v7667_v27  ;;  %v50_v27 = vadd.f32 %v45_v61, %v44_v47  ;;  %v7694_v47 = vld [vmem:[#allocation135_spill] sm:$0xff]  ;;  %v7699_v17 = vand.u32 4294901760, %v7698_v29 }
 0x2a1   :  { %3622 = vmatpush1.bf16.xpose.msra.mxu0 %v7670_v24  ;;  %3336 = vmatprep.subr.bf16.mxu1 %v3335_v54  ;;  %v1515_v54 = vand.u32 4294901760, %v1514_v5  ;;  %v7689_v5 = vld [vmem:[#allocation139_spill] sm:$0xff] }
 0x2a2   :  { %3624 = vmatprep.subr.bf16.mxu0 %v7671_v49  ;;  %v48_v49 = vmul.f32 %v7684_v21, %v7684_v21  ;;  %v51_v6 = vadd.f32 %v50_v27, %v46_v41  ;;  %v49_v61 = vmul.f32 %v7689_v5, %v7689_v5  ;;  %v1574_v21 = vsub.f32 %v7698_v29, %v7699_v17  ;;  %v7704_v5 = vld [vmem:[#allocation137_spill] sm:$0xff] }
 0x2a3   :  { %v3341_v50 = vpack.c.bf16 %v1527_v58, %v1515_v54 }
 0x2a4   :  { %v52_v40 = vadd.f32 %v51_v6, %v47_v23  ;;  %v7697_v23 = vand.u32 4294901760, %v7696_v28  ;;  %v7700_v6 = vld [vmem:[#allocation120_spill] sm:$0xff] }
 0x2a6   :  { %v53_v19 = vadd.f32 %v52_v40, %v48_v49  ;;  %v1562_v27 = vsub.f32 %v7696_v28, %v7697_v23  ;;  %v7712_v23 = vld [vmem:[#allocation22_spill] sm:$0xff] }
 0x2a7   :  { %1476 = vmatmul.mubr.f32.vlgmr.msra.gmra.mrb[0].mxu1 %v1475_v2  ;;  %v7685_v2 = vld [vmem:[#allocation108_spill] sm:$0xff]  ;;  %v7713_v17 = vand.u32 4294901760, %v7712_v23 }
 0x2a8   :  { %3338 = vmatpush1.bf16.xpose.msra.mxu1 %v3337_v60  ;;  %2816 = vmatmul.mubr.f32.vlgmr.msra.gmra.mrb[0].mxu0 %v7680_v13  ;;  %v7686_v26 = vand.u32 4294901760, %v7685_v2  ;;  %v7688_v60 = vand.u32 4294901760, %v7687_v0  ;;  %v1568_v13 = vsub.f32 %v7692_v62, %v7693_v25  ;;  %v1563_v40 = vand.u32 4294901760, %v1562_v27 }
 0x2a9   :  { %3626 = vmatpush1.bf16.xpose.msra.mxu0 %v7681_v36  ;;  %3340 = vmatprep.subr.bf16.mxu1 %v3339_v20  ;;  %v7690_v20 = vld [vmem:[#allocation112_spill] sm:$0xff]  ;;  %v1616_v27 = vsub.f32 %v7712_v23, %v7713_v17  ;;  %v7722_v17 = vld [vmem:[#allocation34_spill] sm:$0xff] }
 0x2aa   :  { %3628 = vmatprep.subr.bf16.mxu0 %v7682_v31  ;;  %1706 = vmatprep.mubr.f32.mxu1 %v7683_v46  ;;  %v1538_v15 = vsub.f32 %v7685_v2, %v7686_v26  ;;  %v1550_v8 = vsub.f32 %v7687_v0, %v7688_v60  ;;  %v7691_v52 = vand.u32 4294901760, %v7690_v20  ;;  %v54_v31 = vadd.f32 %v53_v19, %v49_v61  ;;  %v7705_v61 = vld [vmem:[#allocation138_spill] sm:$0xff] }
 0x2ab   :  { %2982 = vmatprep.mubr.f32.mxu0 %v5840_v55  ;;  %v1569_v58 = vand.u32 4294901760, %v1568_v13  ;;  %v7701_v26 = vand.u32 4294901760, %v7700_v6  ;;  %v7706_v13 = vld [vmem:[#allocation17_spill] sm:$0xff] }
 0x2ac   :  { %v1556_v42 = vsub.f32 %v7690_v20, %v7691_v52  ;;  %v1539_v41 = vand.u32 4294901760, %v1538_v15  ;;  %v1551_v36 = vand.u32 4294901760, %v1550_v8  ;;  %55 = vadd.xlane.f32.xlu0 %v54_v31  ;;  %v7702_v15 = vld [vmem:[#allocation12_spill] sm:$0xff]  ;;  %v7707_v19 = vand.u32 4294901760, %v7706_v13 }
 0x2ad   :  { %v7703_v60 = vand.u32 4294901760, %v7702_v15 }
 0x2ae   :  { %v1557_v54 = vand.u32 4294901760, %v1556_v42  ;;  %v3345_v46 = vpack.c.bf16 %v1551_v36, %v1539_v41 }
 0x2af   :  { %v1592_v8 = vsub.f32 %v7702_v15, %v7703_v60 }
 0x2b0   :  { %3342 = vmatpush1.bf16.xpose.msra.mxu1 %v3341_v50  ;;  %v3347_v49 = vpack.c.bf16 %v1569_v58, %v1557_v54  ;;  %v1580_v50 = vsub.f32 %v7700_v6, %v7701_v26  ;;  %v7710_v54 = vld [vmem:[#allocation26_spill] sm:$0xff] }
 0x2b1   :  { %3630 = vmatpush1.bf16.xpose.msra.mxu0 %v7694_v47  ;;  %3344 = vmatprep.subr.bf16.mxu1 %v3343_v32  ;;  %v1575_v32 = vand.u32 4294901760, %v1574_v21  ;;  %v1593_v42 = vand.u32 4294901760, %v1592_v8  ;;  %v1586_v47 = vsub.f32 %v7706_v13, %v7707_v19  ;;  %v7711_v58 = vand.u32 4294901760, %v7710_v54  ;;  %v7714_v21 = vld [vmem:[#allocation140_spill] sm:$0xff] }
 0x2b2   :  { %3632 = vmatprep.subr.bf16.mxu0 %v7695_v57  ;;  %v1581_v52 = vand.u32 4294901760, %v1580_v50  ;;  %v7708_v57 = vld [vmem:[#allocation13_spill] sm:$0xff]  ;;  %v1617_v8 = vand.u32 4294901760, %v1616_v27 }
 0x2b3   :  { %v3349_v25 = vpack.c.bf16 %v1575_v32, %v1563_v40  ;;  %v7709_v41 = vand.u32 4294901760, %v7708_v57  ;;  %v1587_v26 = vand.u32 4294901760, %v1586_v47 }
 0x2b4   :  { %v3351_v31 = vpack.c.bf16 %v1593_v42, %v1581_v52  ;;  %v7718_v52 = vld [vmem:[#allocation25_spill] sm:$0xff] }
 0x2b5   :  { %v1598_v36 = vsub.f32 %v7708_v57, %v7709_v41  ;;  %v7719_v42 = vand.u32 4294901760, %v7718_v52 }
 0x2b7   :  { %v1599_v50 = vand.u32 4294901760, %v1598_v36  ;;  %v1622_v19 = vsub.f32 %v7718_v52, %v7719_v42  ;;  %v7724_v36 = vld [vmem:[#allocation142_spill] sm:$0xff] }
 0x2b8   :  { %3346 = vmatpush1.bf16.xpose.msra.mxu1 %v3345_v46  ;;  %v1604_v46 = vsub.f32 %v7710_v54, %v7711_v58 }
 0x2b9   :  { %3634 = vmatpush1.bf16.xpose.msra.mxu0 %v7704_v5  ;;  %3348 = vmatprep.subr.bf16.mxu1 %v3347_v49  ;;  %v7715_v49 = vld [vmem:[#allocation141_spill] sm:$0xff]  ;;  %v3353_v5 = vpack.c.bf16 %v1599_v50, %v1587_v26 }
 0x2ba   :  { %3636 = vmatprep.subr.bf16.mxu0 %v7705_v61  ;;  %v1605_v60 = vand.u32 4294901760, %v1604_v46  ;;  %v7716_v61 = vld [vmem:[#allocation19_spill] sm:$0xff] }
 0x2bb   :  { %v7717_v40 = vand.u32 4294901760, %v7716_v61  ;;  %v7725_v46 = vld [vmem:[#allocation143_spill] sm:$0xff] }
 0x2bc   :  { %v3355_v41 = vpack.c.bf16 %v1617_v8, %v1605_v60  ;;  %v7726_v60 = vld [vmem:[#allocation30_spill] sm:$0xff] }
 0x2bd   :  { %v1610_v32 = vsub.f32 %v7716_v61, %v7717_v40  ;;  %v7727_v8 = vand.u32 4294901760, %v7726_v60 }
 0x2bf   :  { %v1611_v27 = vand.u32 4294901760, %v1610_v32  ;;  %v1634_v42 = vsub.f32 %v7726_v60, %v7727_v8 }
 0x2c0   :  { %3350 = vmatpush1.bf16.xpose.msra.mxu1 %v3349_v25  ;;  %v7720_v25 = vld [vmem:[#allocation21_spill] sm:$0xff] }
 0x2c1   :  { %3638 = vmatpush1.bf16.xpose.msra.mxu0 %v7714_v21  ;;  %3352 = vmatprep.subr.bf16.mxu1 %v3351_v31  ;;  %v7721_v58 = vand.u32 4294901760, %v7720_v25  ;;  %v7723_v21 = vand.u32 4294901760, %v7722_v17 }
 0x2c2   :  { %3640 = vmatprep.subr.bf16.mxu0 %v7715_v49  ;;  %v1623_v49 = vand.u32 4294901760, %v1622_v19  ;;  %v7734_v19 = vld [vmem:[#allocation144_spill] sm:$0xff] }
 0x2c3   :  { %v1628_v31 = vsub.f32 %v7720_v25, %v7721_v58  ;;  %v1640_v47 = vsub.f32 %v7722_v17, %v7723_v21  ;;  %v7728_v58 = vld [vmem:[#allocation27_spill] sm:$0xff] }
 0x2c4   :  { %v3357_v40 = vpack.c.bf16 %v1623_v49, %v1611_v27  ;;  %v7729_v16 = vand.u32 4294901760, %v7728_v58 }
 0x2c5   :  { %v1629_v26 = vand.u32 4294901760, %v1628_v31  ;;  %v1641_v50 = vand.u32 4294901760, %v1640_v47  ;;  %v7735_v31 = vld [vmem:[#allocation146_spill] sm:$0xff]  ;;  %v1635_v47 = vand.u32 4294901760, %v1634_v42 }
 0x2c6   :  { %v1646_v24 = vsub.f32 %v7728_v58, %v7729_v16 }
 0x2c7   :  { %v3359_v21 = vpack.c.bf16 %v1641_v50, %v1629_v26  ;;  %v7736_v26 = vld [vmem:[#allocation88_spill] sm:$0xff] }
 0x2c8   :  { %3354 = vmatpush1.bf16.xpose.msra.mxu1 %v3353_v5  ;;  %v7730_v5 = vld [vmem:[#allocation29_spill] sm:$0xff]  ;;  %v1647_v27 = vand.u32 4294901760, %v1646_v24  ;;  %v7737_v50 = vand.u32 4294901760, %v7736_v26 }
 0x2c9   :  { %3642 = vmatpush1.bf16.xpose.msra.mxu0 %v7724_v36  ;;  %3356 = vmatprep.subr.bf16.mxu1 %v3355_v41  ;;  %v7731_v51 = vand.u32 4294901760, %v7730_v5  ;;  %v7732_v36 = vld [vmem:[#allocation87_spill] sm:$0xff] }
 0x2ca   :  { %3644 = vmatprep.subr.bf16.mxu0 %v7725_v46  ;;  %v7733_v46 = vand.u32 4294901760, %v7732_v36  ;;  %v3361_v16 = vpack.c.bf16 %v1647_v27, %v1635_v47  ;;  %v1658_v7 = vsub.f32 %v7736_v26, %v7737_v50  ;;  %v3371_v47 = vpack.c.bf16 %v7665_v37, %v7663_v39  ;;  %v7749_v39 = vld [vmem:[#allocation82_spill] sm:$0xff] }
 0x2cb   :  { %v1652_v41 = vsub.f32 %v7730_v5, %v7731_v51  ;;  %v7738_v51 = vld [vmem:[#allocation121_spill] sm:$0xff] }
 0x2cc   :  { %v1664_v32 = vsub.f32 %v7732_v36, %v7733_v46  ;;  %v7739_v5 = vand.u32 4294901760, %v7738_v51  ;;  %v1659_v42 = vand.u32 4294901760, %v1658_v7  ;;  %v7745_v7 = vld [vmem:[#allocation29_spill] sm:$0xff] }
 0x2cd   :  { %v1653_v49 = vand.u32 4294901760, %v1652_v41 }
 0x2ce   :  { %v1665_v8 = vand.u32 4294901760, %v1664_v32  ;;  %v1670_v58 = vsub.f32 %v7738_v51, %v7739_v5  ;;  %v3367_v32 = vpack.c.bf16 %v7651_v30, %v7656_v53  ;;  %v3369_v5 = vpack.c.bf16 %v7659_v33, %v7668_v10  ;;  %v7747_v53 = vld [vmem:[#allocation60_spill] sm:$0xff] }
 0x2cf   :  { %v3375_v30 = vpack.c.bf16 %v7678_v35, %v7676_v48  ;;  %v3397_v33 = vpack.c.bf16 %v7738_v51, %v7736_v26 }
 0x2d0   :  { %3358 = vmatpush1.bf16.xpose.msra.mxu1 %v3357_v40  ;;  %v3363_v46 = vpack.c.bf16 %v1665_v8, %v1653_v49  ;;  %v7740_v40 = vld [vmem:[#allocation147_spill] sm:$0xff]  ;;  %v1671_v24 = vand.u32 4294901760, %v1670_v58 }
 0x2d1   :  { %3646 = vmatpush1.bf16.xpose.msra.mxu0 %v7734_v19  ;;  %3360 = vmatprep.subr.bf16.mxu1 %v3359_v21  ;;  %v7741_v21 = vld [vmem:[#allocation148_spill] sm:$0xff]  ;;  %v7742_v19 = vld [vmem:[#allocation150_spill] sm:$0xff] }
 0x2d2   :  { %3648 = vmatprep.subr.bf16.mxu0 %v7735_v31  ;;  %v3365_v41 = vpack.c.bf16 %v1671_v24, %v1659_v42  ;;  %v7743_v31 = vld [vmem:[#allocation28_spill] sm:$0xff] }
 0x2d8   :  { %3362 = vmatpush1.bf16.xpose.msra.mxu1 %v3361_v16 }
 0x2d9   :  { %3650 = vmatpush1.bf16.xpose.msra.mxu0 %v7740_v40  ;;  %3364 = vmatprep.subr.bf16.mxu1 %v3363_v46 }
 0x2da   :  { %3652 = vmatprep.subr.bf16.mxu0 %v7741_v21 }
 0x2e0   :  { %3366 = vmatpush1.bf16.xpose.msra.mxu1 %v3365_v41 }
 0x2e1   :  { %3654 = vmatpush1.bf16.xpose.msra.mxu0 %v7742_v19  ;;  %3368 = vmatprep.subr.bf16.mxu1 %v3367_v32 }
 0x2e2   :  { %3656 = vmatprep.subr.bf16.mxu0 %v7624_v9  ;;  %v3373_v9 = vpack.c.bf16 %v7674_v1, %v7672_v56 }
 0x2e7   :  { %1708 = vmatmul.mubr.f32.vlgmr.msra.gmra.mrb[0].mxu1 %v7743_v31 }
 0x2e8   :  { %3370 = vmatpush1.bf16.xpose.msra.mxu1 %v3369_v5  ;;  %2984 = vmatmul.mubr.f32.vlgmr.msra.gmra.mrb[0].mxu0 %v6019_v11 }
 0x2e9   :  { %3658 = vmatpush1.bf16.xpose.msra.mxu0 %v7627_v34  ;;  %3372 = vmatprep.subr.bf16.mxu1 %v3371_v47  ;;  %v3377_v34 = vpack.c.bf16 %v7687_v0, %v7685_v2 }
 0x2ea   :  { %3660 = vmatprep.subr.bf16.mxu0 %v7629_v18  ;;  %1843 = vmatprep.mubr.f32.mxu1 %v7622_v45  ;;  %v3379_v45 = vpack.c.bf16 %v7692_v62, %v7690_v20  ;;  %v3383_v18 = vpack.c.bf16 %v7702_v15, %v7700_v6 }
 0x2eb   :  { %3086 = vmatprep.mubr.f32.mxu0 %v5840_v55  ;;  %v3381_v55 = vpack.c.bf16 %v7698_v29, %v7696_v28 }
 0x2f0   :  { %3374 = vmatpush1.bf16.xpose.msra.mxu1 %v3373_v9 }
 0x2f1   :  { %3662 = vmatpush1.bf16.xpose.msra.mxu0 %v7632_v22  ;;  %3376 = vmatprep.subr.bf16.mxu1 %v3375_v30  ;;  %v3385_v22 = vpack.c.bf16 %v7708_v57, %v7706_v13 }
 0x2f2   :  { %3664 = vmatprep.subr.bf16.mxu0 %v7634_v59  ;;  %v3387_v59 = vpack.c.bf16 %v7712_v23, %v7710_v54 }
 0x2f8   :  { %3378 = vmatpush1.bf16.xpose.msra.mxu1 %v3377_v34 }
 0x2f9   :  { %3666 = vmatpush1.bf16.xpose.msra.mxu0 %v7636_v4  ;;  %3380 = vmatprep.subr.bf16.mxu1 %v3379_v45  ;;  %v3389_v4 = vpack.c.bf16 %v7718_v52, %v7716_v61 }
 0x2fa   :  { %3668 = vmatprep.subr.bf16.mxu0 %v7638_v63  ;;  %v3391_v63 = vpack.c.bf16 %v7722_v17, %v7720_v25 }
 0x300   :  { %3382 = vmatpush1.bf16.xpose.msra.mxu1 %v3381_v55 }
 0x301   :  { %3670 = vmatpush1.bf16.xpose.msra.mxu0 %v7640_v38  ;;  %3384 = vmatprep.subr.bf16.mxu1 %v3383_v18  ;;  %v7744_v38 = vld [vmem:[#allocation27_spill] sm:$0xff] }
 0x302   :  { %3672 = vmatprep.subr.bf16.mxu0 %v7642_v43  ;;  %v3393_v43 = vpack.c.bf16 %v7744_v38, %v7726_v60 }
 0x308   :  { %3386 = vmatpush1.bf16.xpose.msra.mxu1 %v3385_v22 }
 0x309   :  { %3674 = vmatpush1.bf16.xpose.msra.mxu0 %v7644_v14  ;;  %3388 = vmatprep.subr.bf16.mxu1 %v3387_v59  ;;  %v3395_v14 = vpack.c.bf16 %v7732_v36, %v7745_v7 }
 0x30a   :  { %3676 = vmatprep.subr.bf16.mxu0 %v7646_v44  ;;  %v7746_v44 = vld [vmem:[#allocation124_spill] sm:$0xff] }
 0x310   :  { %3390 = vmatpush1.bf16.xpose.msra.mxu1 %v3389_v4 }
 0x311   :  { %3678 = vmatpush1.bf16.xpose.msra.mxu0 %v7648_v12  ;;  %3392 = vmatprep.subr.bf16.mxu1 %v3391_v63  ;;  %v7748_v12 = vld [vmem:[#allocation126_spill] sm:$0xff] }
 0x312   :  { %3680 = vmatprep.subr.bf16.mxu0 %v7650_v3 }
 0x318   :  { %3394 = vmatpush1.bf16.xpose.msra.mxu1 %v3393_v43 }
 0x319   :  { %3682 = vmatpush1.bf16.xpose.msra.mxu0 %v7746_v44  ;;  %3396 = vmatprep.subr.bf16.mxu1 %v3395_v14 }
 0x31a   :  { %3684 = vmatprep.subr.bf16.mxu0 %v7747_v53 }
 0x320   :  { %3398 = vmatpush1.bf16.xpose.msra.mxu1 %v3397_v33 }
 0x321   :  { %3686 = vmatpush1.bf16.xpose.msra.mxu0 %v7748_v12 }
 0x327   :  { %1846 = vmatmul.mubr.f32.vlgmr.msra.gmra.mrb[0].mxu1 %v7749_v39 }
 0x328   :  { %3088 = vmatmul.mubr.f32.vlgmr.msra.gmra.mrb[0].mxu0 %v6019_v11 }
 0x339   :  { %v56_v3 = vpop.xlane.xlu0 %55 }
 0x33a   :  { %v57_v37 = vmax.f32 %v56_v3, 1e-24 }
 0x33c   :  { %3757 = vrsqrt.f32 %v57_v37 }
 0x346   :  { %v3758_v56 = vpop.eup %3757 }
 0x3fa   :  { %v1847_v10 = vpop.f32.mrb[0].mxu1 }
 0x3fb   :  { %v3089_v1 = vpop.f32.mrb[0].mxu0  ;;  %v1849_v48 = vpop.f32.mrb[1].mxu1 }
 0x3fc   :  { %v3687_v35 = vadd.f32 %v3089_v1, %v1847_v10  ;;  %v3091_v2 = vpop.f32.mrb[1].mxu0 }
 0x3fe   :  { %v3093_v0 = vmul.f32 %v3758_v56, %v3687_v35 }
 0x400   :  { %3094 = vst [vmem:[#allocation7] sm:$0xff] %v3093_v0 }
 0x401   :  { %3850 = shalt.err (!%p3847_p6)
}
 0x402   :  { %s3851_s10 = scalar_lea.hbm %s6509_s2, 128 }
 0x403   :  { %p3852_p7 = scmp.ne.s32.totalorder %s6509_s2, %s3851_s10  ;;  %p3855_p8 = scmp.lt.u32.totalorder %s3851_s10, %s6509_s2 }
 0x405   :  { %p3857_p9 = pnand %p3855_p8, %p3852_p7 }
 0x407   :  { %3860 = shalt.err (!%p3857_p9)
}
 0x408   :  { %3104 = dma.vmem_to_hbm [thread:$0]  %s3102_s6, 128, %s6509_s2, [#allocation4]  }
 0x409   :  { %3865 = dma.done.wait [#allocation4], 128  }
 0x40a   :  { %3866 = vsyncadd [#allocation4], 4294967168 }
 0x40b   :  { %3108 = vsyncpa [#allocation3], 1 }
 0x40c   :  { %3109 = vsyncpa [#allocation6], 1 }
 0x40d   :  { %3110 = vsyncpa [#allocation4], 1 }

</bundles_post_ra>
